<compile_context>
chip_gen: v7x
topology: tpu7x:2x2x1
jax: 0.10.0
libtpu: 0.0.40
codegen_flags: <defaults>
</compile_context>

<pallas_src>
import numpy as np
import jax
import jax.numpy as jnp
from jax import lax
from jax.experimental import pallas as pl
from jax.experimental.pallas import tpu as pltpu


def _make_window_attention_kernel(M, C, num_heads):
    """M = windows_per_block * tokens_per_window (attention rows per step)."""
    head_dim = C // num_heads
    bf16 = jnp.bfloat16

    def kernel(x_ref, wqkv_ref, bqkv_ref, relb_ref, wproj_ref, bproj_ref,
               o_ref, qkv_ref, attn_ref):
        # x block: (M, C) — BW windows stacked row-wise.  Cast to bf16 in VMEM
        # (cheaper than a pre-cast pass over x in HBM: x is read once per step).
        x = x_ref[...].astype(bf16)

        # qkv = x @ Wqkv + bqkv -> (M, 3C); columns [q_h0..q_hH | k.. | v..].
        # The softmax scale is already folded into the q columns of Wqkv/bqkv.
        qkv = jnp.dot(x, wqkv_ref[...], preferred_element_type=jnp.float32)
        qkv = qkv + bqkv_ref[0]
        # Stage in VMEM (bf16) so the unrolled head loop slices from a ref
        # instead of keeping the full (M, 3C) value live in vregs.
        qkv_ref[...] = qkv.astype(bf16)

        # TODO(synk): at real SwinUNETR head counts (H up to 24), replace the
        # full Python unroll with lax.fori_loop(unroll=2..4) over heads.
        for h in range(num_heads):
            c0, c1 = h * head_dim, (h + 1) * head_dim
            q = qkv_ref[:, c0:c1]                       # (M, hd) bf16, pre-scaled
            k = qkv_ref[:, C + c0:C + c1]               # (M, hd) bf16
            v = qkv_ref[:, 2 * C + c0:2 * C + c1]       # (M, hd) bf16

            # Packed QK^T over all BW windows at once: (M, M), bf16 in /
            # f32 accumulate.  Contract last dims directly (no k.T relayout).
            s = lax.dot_general(q, k, (((1,), (1,)), ((), ())),
                                preferred_element_type=jnp.float32)
            # relb_ref[h]: relative-position bias on the diagonal window
            # blocks, -1e9 on cross-window blocks (precomputed, bf16).
            s = s + relb_ref[h].astype(jnp.float32)

            # Row softmax in f32; masked entries underflow to exactly 0.
            # NOTE(v5e): the packed softmax exponentiates BW x more entries
            # than strictly needed — cheap on v6e/v7x, check the EUP slot on
            # v5e before raising BW.
            s = s - jnp.max(s, axis=-1, keepdims=True)
            p = jnp.exp(s)
            p = p * pl.reciprocal(jnp.sum(p, axis=-1, keepdims=True),
                                  approx=True)

            o_h = jnp.dot(p.astype(bf16), v,
                          preferred_element_type=jnp.float32)    # (M, hd) f32
            # Column-write the head output into the (M, C) staging buffer —
            # no concat and no per-head K=hd projection.
            attn_ref[:, c0:c1] = o_h.astype(bf16)

        # One full-depth output projection: (M, C) @ (C, C), bf16 in, f32 acc.
        out = jnp.dot(attn_ref[...], wproj_ref[...],
                      preferred_element_type=jnp.float32)
        out = out + bproj_ref[0]
        o_ref[...] = out.astype(o_ref.dtype)

    return kernel


def window_attention_pallas(x, w_qkv, b_qkv, rel_bias, w_proj, b_proj,
                            num_heads, scale, windows_per_block=8):
    """x: (B_, N, C); w_qkv: (C, 3C); b_qkv: (3C,); rel_bias: (H, N, N);
       w_proj: (C, C); b_proj: (C,). Returns (B_, N, C).

       windows_per_block: windows packed per grid step.  8 (=128 attention
       rows at N=16) suits v5e's 128x128 MXU; 16 (=256 rows) suits the
       256x256 MXU on v6e/v7x.  The value is clamped so the grid keeps
       >= 2 steps (two v7x TensorCores + DMA/compute overlap)."""
    B_, N, C = x.shape
    H = num_heads
    f32, bf16 = jnp.float32, jnp.bfloat16

    # Pick BW: must divide B_ and keep >= 2 grid steps whenever possible.
    BW = max(1, min(windows_per_block, B_))
    while BW > 1 and (B_ % BW != 0 or B_ // BW < 2):
        BW -= 1
    M = BW * N
    # (8, 128) layout rule: the block's second-to-last dim must be a multiple
    # of 8.  TODO(synk): for real 3D SwinUNETR windows (N=343) pad N to a
    # multiple of 8 with masked tokens before blocking.
    assert M % 8 == 0, "windows_per_block * tokens_per_window must be a multiple of 8"

    # --- host-side (one-time) parameter prep -------------------------------
    # Fold the softmax scale into the q columns of the qkv projection, then
    # store the matmul weights in bf16 (MXU-native; halves DMA / VMEM).
    scale_vec = jnp.concatenate([jnp.full((C,), scale, f32),
                                 jnp.ones((2 * C,), f32)])
    w_qkv_s = (w_qkv.astype(f32) * scale_vec[None, :]).astype(bf16)
    b_qkv_s = (b_qkv.astype(f32) * scale_vec).reshape(1, 3 * C)          # f32
    w_proj_b = w_proj.astype(bf16)
    b_proj2 = b_proj.astype(f32).reshape(1, C)

    # Packed relative-position bias + block-diagonal window mask: (H, M, M)
    # in bf16 (added pre-softmax, precision irrelevant).  Diagonal N x N
    # blocks carry rel_bias; cross-window blocks are -1e9 so they vanish in
    # the softmax.
    # TODO(synk): if BW (hence M) must grow at real stage sizes, build the
    # block-diagonal mask in-kernel from broadcasted_iota // N and keep only
    # the (H, N, N) bias resident (relb scales O(H * (BW*N)^2)).
    wid = jnp.arange(M) // N
    diag = wid[:, None] == wid[None, :]                                   # (M, M)
    bias_tiled = jnp.tile(rel_bias.astype(f32), (1, BW, BW))              # (H, M, M)
    relb_packed = jnp.where(diag[None, :, :], bias_tiled, f32(-1e9)).astype(bf16)
    # TODO(synk): the shifted-window attn_mask (mask != None branch) is not
    # implemented; fold it into this packed bias with a grid-index-dependent
    # BlockSpec when needed.

    # Lane-dense 2D views of x / out (free HBM reshapes).
    x2 = x.reshape(B_ * N, C)

    kernel = _make_window_attention_kernel(M, C, H)

    # Grid-constant operands are single-buffered: their index_map is constant,
    # so double buffering only doubles their VMEM footprint.
    const1 = pl.Buffered(1)

    out2 = pl.pallas_call(
        kernel,
        out_shape=jax.ShapeDtypeStruct((B_ * N, C), x.dtype),
        grid=(B_ // BW,),
        in_specs=[
            pl.BlockSpec((M, C), lambda b: (b, 0)),                      # x, BW windows
            pl.BlockSpec((C, 3 * C), lambda b: (0, 0),
                         pipeline_mode=const1),                          # qkv weight (bf16, q cols scaled)
            pl.BlockSpec((1, 3 * C), lambda b: (0, 0),
                         pipeline_mode=const1),                          # qkv bias (f32)
            pl.BlockSpec((H, M, M), lambda b: (0, 0, 0),
                         pipeline_mode=const1),                          # packed rel bias + mask (bf16)
            pl.BlockSpec((C, C), lambda b: (0, 0),
                         pipeline_mode=const1),                          # proj weight (bf16)
            pl.BlockSpec((1, C), lambda b: (0, 0),
                         pipeline_mode=const1),                          # proj bias (f32)
        ],
        out_specs=pl.BlockSpec((M, C), lambda b: (b, 0)),
        scratch_shapes=[
            pltpu.VMEM((M, 3 * C), bf16),    # staged qkv
            pltpu.VMEM((M, C), bf16),        # assembled per-head outputs
        ],
        compiler_params=pltpu.CompilerParams(
            dimension_semantics=("parallel",),
            vmem_limit_bytes=32 * 1024 * 1024),
    )(x2, w_qkv_s, b_qkv_s, relb_packed, w_proj_b, b_proj2)

    return out2.reshape(B_, N, C)


def make_relative_position_index(window_size):
    """Replicates the PyTorch buffer `relative_position_index`."""
    Wh, Ww = window_size
    coords_h = np.arange(Wh)
    coords_w = np.arange(Ww)
    coords = np.stack(np.meshgrid(coords_h, coords_w, indexing="ij"))   # (2, Wh, Ww)
    coords_flatten = coords.reshape(2, -1)                              # (2, N)
    relative_coords = coords_flatten[:, :, None] - coords_flatten[:, None, :]
    relative_coords = relative_coords.transpose(1, 2, 0)                # (N, N, 2)
    relative_coords[:, :, 0] += Wh - 1
    relative_coords[:, :, 1] += Ww - 1
    relative_coords[:, :, 0] *= 2 * Ww - 1
    return relative_coords.sum(-1)                                      # (N, N)


def reference_window_attention(x, w_qkv, b_qkv, rel_bias, w_proj, b_proj,
                               num_heads, scale):
    """Pure-JAX f32 reference mirroring the PyTorch forward (mask=None, eval)."""
    B_, N, C = x.shape
    hd = C // num_heads
    qkv = x @ w_qkv + b_qkv                                    # (B_, N, 3C)
    qkv = qkv.reshape(B_, N, 3, num_heads, hd).transpose(2, 0, 3, 1, 4)
    q, k, v = qkv[0], qkv[1], qkv[2]                           # (B_, H, N, hd)
    q = q * scale
    attn = jnp.einsum("bhnd,bhmd->bhnm", q, k) + rel_bias[None]
    attn = jax.nn.softmax(attn, axis=-1)
    out = jnp.einsum("bhnm,bhmd->bhnd", attn, v)
    out = out.transpose(0, 2, 1, 3).reshape(B_, N, C)
    return out @ w_proj + b_proj


if __name__ == "__main__":
    # Small, module-consistent shapes (one Swin stage, 16x16 feature map,
    # 4x4 windows -> 16 windows of 16 tokens, dim=128, 4 heads).
    dim = 128
    num_heads = 4
    window_size = (4, 4)
    N = window_size[0] * window_size[1]          # 16 tokens per window
    B_ = 16                                      # num_windows * batch
    head_dim = dim // num_heads
    scale = head_dim ** -0.5

    key = jax.random.PRNGKey(0)
    kx, kt, kw1, kb1, kw2, kb2 = jax.random.split(key, 6)

    x = jax.random.normal(kx, (B_, N, dim), dtype=jnp.float32)

    # Deterministic synthetic parameters (trunc_normal ~ normal*0.02 for the table).
    table = jax.random.normal(
        kt, ((2 * window_size[0] - 1) * (2 * window_size[1] - 1), num_heads),
        dtype=jnp.float32) * 0.02
    # nn.Linear weights are (out, in); pre-transpose to (in, out) for the kernel.
    w_qkv = (jax.random.normal(kw1, (3 * dim, dim), dtype=jnp.float32) * 0.05).T
    b_qkv = jax.random.normal(kb1, (3 * dim,), dtype=jnp.float32) * 0.05
    w_proj = (jax.random.normal(kw2, (dim, dim), dtype=jnp.float32) * 0.05).T
    b_proj = jax.random.normal(kb2, (dim,), dtype=jnp.float32) * 0.05

    # Relative position bias, gathered + permuted in plain JAX (setup glue).
    rel_index = jnp.asarray(make_relative_position_index(window_size))   # (N, N)
    rel_bias = table[rel_index.reshape(-1)].reshape(N, N, num_heads)
    rel_bias = jnp.transpose(rel_bias, (2, 0, 1))                        # (H, N, N)

    # TODO(synk): only WindowAttention.forward is a Pallas kernel; the rest of
    # SwinUNETR (patch embed, MLP/LayerNorm, patch merging, conv decoder) stays
    # in plain JAX and the shifted-window mask branch is not implemented.

    out = window_attention_pallas(x, w_qkv, b_qkv, rel_bias, w_proj, b_proj,
                                  num_heads, scale, windows_per_block=8)
    out = jax.block_until_ready(out)

    ref = reference_window_attention(x, w_qkv, b_qkv, rel_bias, w_proj, b_proj,
                                     num_heads, scale)
    # Kernel matmuls run with bf16 operands (f32 accumulation / f32 softmax),
    # so compare against the pure-f32 reference at bf16-level tolerance.
    np.testing.assert_allclose(np.asarray(out), np.asarray(ref),
                               rtol=2e-2, atol=2e-2)
    print("KERNEL_OK")
</pallas_src>

<mosaic_0001>
module attributes {stable_mosaic.version = 11 : i64} {
  func.func @kernel(%arg0: i32, %arg1: memref<128x128xf32, #tpu.memory_space<vmem>>, %arg2: memref<128x384xbf16, #tpu.memory_space<vmem>>, %arg3: memref<1x384xf32, #tpu.memory_space<vmem>>, %arg4: memref<4x128x128xbf16, #tpu.memory_space<vmem>>, %arg5: memref<128x128xbf16, #tpu.memory_space<vmem>>, %arg6: memref<1x128xf32, #tpu.memory_space<vmem>>, %arg7: memref<128x128xf32, #tpu.memory_space<vmem>>, %arg8: memref<128x384xbf16, #tpu.memory_space<vmem>>, %arg9: memref<128x128xbf16, #tpu.memory_space<vmem>>) attributes {dimension_semantics = [#tpu.dimension_semantics<parallel>], iteration_bounds = array<i64: 2>, scalar_prefetch = 0 : i64, scratch_operands = 2 : i64, tpu.core_type = #tpu.core_type<tc>, window_params = [{transform_indices = @transform_0, window_bounds = array<i64: 128, 128>}, {pipeline_mode = #tpu.pipeline_mode<synchronous>, transform_indices = @transform_1, window_bounds = array<i64: 128, 384>}, {pipeline_mode = #tpu.pipeline_mode<synchronous>, transform_indices = @transform_2, window_bounds = array<i64: 1, 384>}, {pipeline_mode = #tpu.pipeline_mode<synchronous>, transform_indices = @transform_3, window_bounds = array<i64: 4, 128, 128>}, {pipeline_mode = #tpu.pipeline_mode<synchronous>, transform_indices = @transform_4, window_bounds = array<i64: 128, 128>}, {pipeline_mode = #tpu.pipeline_mode<synchronous>, transform_indices = @transform_5, window_bounds = array<i64: 1, 128>}, {transform_indices = @transform_6, window_bounds = array<i64: 128, 128>}]} {
    %c0 = arith.constant 0 : index
    %c0_0 = arith.constant 0 : index
    %0 = vector.load %arg1[%c0, %c0_0] : memref<128x128xf32, #tpu.memory_space<vmem>>, vector<128x128xf32>
    %1 = arith.truncf %0 : vector<128x128xf32> to vector<128x128xbf16>
    %c0_1 = arith.constant 0 : index
    %c0_2 = arith.constant 0 : index
    %2 = vector.load %arg2[%c0_1, %c0_2] : memref<128x384xbf16, #tpu.memory_space<vmem>>, vector<128x384xbf16>
    %cst = arith.constant dense<0.000000e+00> : vector<128x384xf32>
    %3 = tpu.matmul %1, %2, %cst {dimension_numbers = #tpu.dot_dimension_numbers<[1], [0], [0], [1], [0, 0, 1, 1], [], []>} : vector<128x128xbf16>, vector<128x384xbf16>, vector<128x384xf32> -> vector<128x384xf32>
    %c0_3 = arith.constant 0 : index
    %c0_4 = arith.constant 0 : index
    %4 = vector.load %arg3[%c0_3, %c0_4] : memref<1x384xf32, #tpu.memory_space<vmem>>, vector<1x384xf32>
    %5 = vector.shape_cast %4 : vector<1x384xf32> to vector<384xf32>
    %6 = vector.shape_cast %5 : vector<384xf32> to vector<1x384xf32>
    %7 = vector.broadcast %6 : vector<1x384xf32> to vector<128x384xf32>
    %8 = arith.addf %3, %7 : vector<128x384xf32>
    %9 = arith.truncf %8 : vector<128x384xf32> to vector<128x384xbf16>
    %c0_5 = arith.constant 0 : index
    %c0_6 = arith.constant 0 : index
    %10 = vector.load %arg8[%c0_5, %c0_6] : memref<128x384xbf16, #tpu.memory_space<vmem>>, vector<128x384xbf16>
    tpu.vector_store %arg8[%c0_5, %c0_6], %9 {strides = array<i32>} : memref<128x384xbf16, #tpu.memory_space<vmem>>, vector<128x384xbf16>,
    %c0_7 = arith.constant 0 : index
    %c0_8 = arith.constant 0 : index
    %11 = vector.load %arg8[%c0_7, %c0_8] : memref<128x384xbf16, #tpu.memory_space<vmem>>, vector<128x32xbf16>
    %c0_9 = arith.constant 0 : index
    %c128 = arith.constant 128 : index
    %12 = vector.load %arg8[%c0_9, %c128] : memref<128x384xbf16, #tpu.memory_space<vmem>>, vector<128x32xbf16>
    %c0_10 = arith.constant 0 : index
    %c256 = arith.constant 256 : index
    %13 = vector.load %arg8[%c0_10, %c256] : memref<128x384xbf16, #tpu.memory_space<vmem>>, vector<128x32xbf16>
    %cst_11 = arith.constant dense<0.000000e+00> : vector<128x128xf32>
    %14 = tpu.matmul %11, %12, %cst_11 {dimension_numbers = #tpu.dot_dimension_numbers<[1], [1], [0], [0], [0, 0, 1, 0], [], []>} : vector<128x32xbf16>, vector<128x32xbf16>, vector<128x128xf32> -> vector<128x128xf32>
    %c0_12 = arith.constant 0 : index
    %c0_13 = arith.constant 0 : index
    %c0_14 = arith.constant 0 : index
    %15 = vector.load %arg4[%c0_12, %c0_13, %c0_14] : memref<4x128x128xbf16, #tpu.memory_space<vmem>>, vector<1x128x128xbf16>
    %16 = vector.shape_cast %15 : vector<1x128x128xbf16> to vector<128x128xbf16>
    %17 = arith.extf %16 : vector<128x128xbf16> to vector<128x128xf32>
    %18 = arith.addf %14, %17 : vector<128x128xf32>
    %cst_15 = arith.constant dense<0xFF800000> : vector<128xf32>
    %19 = vector.multi_reduction <maximumf>, %18, %cst_15 [1] : vector<128x128xf32> to vector<128xf32>
    %20 = vector.shape_cast %19 : vector<128xf32> to vector<128x1xf32>
    %21 = vector.broadcast %20 : vector<128x1xf32> to vector<128x128xf32>
    %22 = arith.subf %18, %21 : vector<128x128xf32>
    %23 = math.exp %22 : vector<128x128xf32>
    %cst_16 = arith.constant dense<0.000000e+00> : vector<128xf32>
    %24 = vector.multi_reduction <add>, %23, %cst_16 [1] : vector<128x128xf32> to vector<128xf32>
    %25 = vector.shape_cast %24 : vector<128xf32> to vector<128x1xf32>
    %26 = tpu.reciprocal %25 {approx = true} : vector<128x1xf32> -> vector<128x1xf32>
    %27 = vector.broadcast %26 : vector<128x1xf32> to vector<128x128xf32>
    %28 = arith.mulf %23, %27 : vector<128x128xf32>
    %29 = arith.truncf %28 : vector<128x128xf32> to vector<128x128xbf16>
    %cst_17 = arith.constant dense<0.000000e+00> : vector<128x32xf32>
    %30 = tpu.matmul %29, %13, %cst_17 {dimension_numbers = #tpu.dot_dimension_numbers<[1], [0], [0], [1], [0, 0, 1, 1], [], []>} : vector<128x128xbf16>, vector<128x32xbf16>, vector<128x32xf32> -> vector<128x32xf32>
    %31 = arith.truncf %30 : vector<128x32xf32> to vector<128x32xbf16>
    %c0_18 = arith.constant 0 : index
    %c0_19 = arith.constant 0 : index
    %32 = vector.load %arg9[%c0_18, %c0_19] : memref<128x128xbf16, #tpu.memory_space<vmem>>, vector<128x32xbf16>
    tpu.vector_store %arg9[%c0_18, %c0_19], %31 {strides = array<i32>} : memref<128x128xbf16, #tpu.memory_space<vmem>>, vector<128x32xbf16>,
    %c0_20 = arith.constant 0 : index
    %c32 = arith.constant 32 : index
    %33 = vector.load %arg8[%c0_20, %c32] : memref<128x384xbf16, #tpu.memory_space<vmem>>, vector<128x32xbf16>
    %c0_21 = arith.constant 0 : index
    %c160 = arith.constant 160 : index
    %34 = vector.load %arg8[%c0_21, %c160] : memref<128x384xbf16, #tpu.memory_space<vmem>>, vector<128x32xbf16>
    %c0_22 = arith.constant 0 : index
    %c288 = arith.constant 288 : index
    %35 = vector.load %arg8[%c0_22, %c288] : memref<128x384xbf16, #tpu.memory_space<vmem>>, vector<128x32xbf16>
    %cst_23 = arith.constant dense<0.000000e+00> : vector<128x128xf32>
    %36 = tpu.matmul %33, %34, %cst_23 {dimension_numbers = #tpu.dot_dimension_numbers<[1], [1], [0], [0], [0, 0, 1, 0], [], []>} : vector<128x32xbf16>, vector<128x32xbf16>, vector<128x128xf32> -> vector<128x128xf32>
    %c1 = arith.constant 1 : index
    %c0_24 = arith.constant 0 : index
    %c0_25 = arith.constant 0 : index
    %37 = vector.load %arg4[%c1, %c0_24, %c0_25] : memref<4x128x128xbf16, #tpu.memory_space<vmem>>, vector<1x128x128xbf16>
    %38 = vector.shape_cast %37 : vector<1x128x128xbf16> to vector<128x128xbf16>
    %39 = arith.extf %38 : vector<128x128xbf16> to vector<128x128xf32>
    %40 = arith.addf %36, %39 : vector<128x128xf32>
    %cst_26 = arith.constant dense<0xFF800000> : vector<128xf32>
    %41 = vector.multi_reduction <maximumf>, %40, %cst_26 [1] : vector<128x128xf32> to vector<128xf32>
    %42 = vector.shape_cast %41 : vector<128xf32> to vector<128x1xf32>
    %43 = vector.broadcast %42 : vector<128x1xf32> to vector<128x128xf32>
    %44 = arith.subf %40, %43 : vector<128x128xf32>
    %45 = math.exp %44 : vector<128x128xf32>
    %cst_27 = arith.constant dense<0.000000e+00> : vector<128xf32>
    %46 = vector.multi_reduction <add>, %45, %cst_27 [1] : vector<128x128xf32> to vector<128xf32>
    %47 = vector.shape_cast %46 : vector<128xf32> to vector<128x1xf32>
    %48 = tpu.reciprocal %47 {approx = true} : vector<128x1xf32> -> vector<128x1xf32>
    %49 = vector.broadcast %48 : vector<128x1xf32> to vector<128x128xf32>
    %50 = arith.mulf %45, %49 : vector<128x128xf32>
    %51 = arith.truncf %50 : vector<128x128xf32> to vector<128x128xbf16>
    %cst_28 = arith.constant dense<0.000000e+00> : vector<128x32xf32>
    %52 = tpu.matmul %51, %35, %cst_28 {dimension_numbers = #tpu.dot_dimension_numbers<[1], [0], [0], [1], [0, 0, 1, 1], [], []>} : vector<128x128xbf16>, vector<128x32xbf16>, vector<128x32xf32> -> vector<128x32xf32>
    %53 = arith.truncf %52 : vector<128x32xf32> to vector<128x32xbf16>
    %c0_29 = arith.constant 0 : index
    %c32_30 = arith.constant 32 : index
    %54 = vector.load %arg9[%c0_29, %c32_30] : memref<128x128xbf16, #tpu.memory_space<vmem>>, vector<128x32xbf16>
    tpu.vector_store %arg9[%c0_29, %c32_30], %53 {strides = array<i32>} : memref<128x128xbf16, #tpu.memory_space<vmem>>, vector<128x32xbf16>,
    %c0_31 = arith.constant 0 : index
    %c64 = arith.constant 64 : index
    %55 = vector.load %arg8[%c0_31, %c64] : memref<128x384xbf16, #tpu.memory_space<vmem>>, vector<128x32xbf16>
    %c0_32 = arith.constant 0 : index
    %c192 = arith.constant 192 : index
    %56 = vector.load %arg8[%c0_32, %c192] : memref<128x384xbf16, #tpu.memory_space<vmem>>, vector<128x32xbf16>
    %c0_33 = arith.constant 0 : index
    %c320 = arith.constant 320 : index
    %57 = vector.load %arg8[%c0_33, %c320] : memref<128x384xbf16, #tpu.memory_space<vmem>>, vector<128x32xbf16>
    %cst_34 = arith.constant dense<0.000000e+00> : vector<128x128xf32>
    %58 = tpu.matmul %55, %56, %cst_34 {dimension_numbers = #tpu.dot_dimension_numbers<[1], [1], [0], [0], [0, 0, 1, 0], [], []>} : vector<128x32xbf16>, vector<128x32xbf16>, vector<128x128xf32> -> vector<128x128xf32>
    %c2 = arith.constant 2 : index
    %c0_35 = arith.constant 0 : index
    %c0_36 = arith.constant 0 : index
    %59 = vector.load %arg4[%c2, %c0_35, %c0_36] : memref<4x128x128xbf16, #tpu.memory_space<vmem>>, vector<1x128x128xbf16>
    %60 = vector.shape_cast %59 : vector<1x128x128xbf16> to vector<128x128xbf16>
    %61 = arith.extf %60 : vector<128x128xbf16> to vector<128x128xf32>
    %62 = arith.addf %58, %61 : vector<128x128xf32>
    %cst_37 = arith.constant dense<0xFF800000> : vector<128xf32>
    %63 = vector.multi_reduction <maximumf>, %62, %cst_37 [1] : vector<128x128xf32> to vector<128xf32>
    %64 = vector.shape_cast %63 : vector<128xf32> to vector<128x1xf32>
    %65 = vector.broadcast %64 : vector<128x1xf32> to vector<128x128xf32>
    %66 = arith.subf %62, %65 : vector<128x128xf32>
    %67 = math.exp %66 : vector<128x128xf32>
    %cst_38 = arith.constant dense<0.000000e+00> : vector<128xf32>
    %68 = vector.multi_reduction <add>, %67, %cst_38 [1] : vector<128x128xf32> to vector<128xf32>
    %69 = vector.shape_cast %68 : vector<128xf32> to vector<128x1xf32>
    %70 = tpu.reciprocal %69 {approx = true} : vector<128x1xf32> -> vector<128x1xf32>
    %71 = vector.broadcast %70 : vector<128x1xf32> to vector<128x128xf32>
    %72 = arith.mulf %67, %71 : vector<128x128xf32>
    %73 = arith.truncf %72 : vector<128x128xf32> to vector<128x128xbf16>
    %cst_39 = arith.constant dense<0.000000e+00> : vector<128x32xf32>
    %74 = tpu.matmul %73, %57, %cst_39 {dimension_numbers = #tpu.dot_dimension_numbers<[1], [0], [0], [1], [0, 0, 1, 1], [], []>} : vector<128x128xbf16>, vector<128x32xbf16>, vector<128x32xf32> -> vector<128x32xf32>
    %75 = arith.truncf %74 : vector<128x32xf32> to vector<128x32xbf16>
    %c0_40 = arith.constant 0 : index
    %c64_41 = arith.constant 64 : index
    %76 = vector.load %arg9[%c0_40, %c64_41] : memref<128x128xbf16, #tpu.memory_space<vmem>>, vector<128x32xbf16>
    tpu.vector_store %arg9[%c0_40, %c64_41], %75 {strides = array<i32>} : memref<128x128xbf16, #tpu.memory_space<vmem>>, vector<128x32xbf16>,
    %c0_42 = arith.constant 0 : index
    %c96 = arith.constant 96 : index
    %77 = vector.load %arg8[%c0_42, %c96] : memref<128x384xbf16, #tpu.memory_space<vmem>>, vector<128x32xbf16>
    %c0_43 = arith.constant 0 : index
    %c224 = arith.constant 224 : index
    %78 = vector.load %arg8[%c0_43, %c224] : memref<128x384xbf16, #tpu.memory_space<vmem>>, vector<128x32xbf16>
    %c0_44 = arith.constant 0 : index
    %c352 = arith.constant 352 : index
    %79 = vector.load %arg8[%c0_44, %c352] : memref<128x384xbf16, #tpu.memory_space<vmem>>, vector<128x32xbf16>
    %cst_45 = arith.constant dense<0.000000e+00> : vector<128x128xf32>
    %80 = tpu.matmul %77, %78, %cst_45 {dimension_numbers = #tpu.dot_dimension_numbers<[1], [1], [0], [0], [0, 0, 1, 0], [], []>} : vector<128x32xbf16>, vector<128x32xbf16>, vector<128x128xf32> -> vector<128x128xf32>
    %c3 = arith.constant 3 : index
    %c0_46 = arith.constant 0 : index
    %c0_47 = arith.constant 0 : index
    %81 = vector.load %arg4[%c3, %c0_46, %c0_47] : memref<4x128x128xbf16, #tpu.memory_space<vmem>>, vector<1x128x128xbf16>
    %82 = vector.shape_cast %81 : vector<1x128x128xbf16> to vector<128x128xbf16>
    %83 = arith.extf %82 : vector<128x128xbf16> to vector<128x128xf32>
    %84 = arith.addf %80, %83 : vector<128x128xf32>
    %cst_48 = arith.constant dense<0xFF800000> : vector<128xf32>
    %85 = vector.multi_reduction <maximumf>, %84, %cst_48 [1] : vector<128x128xf32> to vector<128xf32>
    %86 = vector.shape_cast %85 : vector<128xf32> to vector<128x1xf32>
    %87 = vector.broadcast %86 : vector<128x1xf32> to vector<128x128xf32>
    %88 = arith.subf %84, %87 : vector<128x128xf32>
    %89 = math.exp %88 : vector<128x128xf32>
    %cst_49 = arith.constant dense<0.000000e+00> : vector<128xf32>
    %90 = vector.multi_reduction <add>, %89, %cst_49 [1] : vector<128x128xf32> to vector<128xf32>
    %91 = vector.shape_cast %90 : vector<128xf32> to vector<128x1xf32>
    %92 = tpu.reciprocal %91 {approx = true} : vector<128x1xf32> -> vector<128x1xf32>
    %93 = vector.broadcast %92 : vector<128x1xf32> to vector<128x128xf32>
    %94 = arith.mulf %89, %93 : vector<128x128xf32>
    %95 = arith.truncf %94 : vector<128x128xf32> to vector<128x128xbf16>
    %cst_50 = arith.constant dense<0.000000e+00> : vector<128x32xf32>
    %96 = tpu.matmul %95, %79, %cst_50 {dimension_numbers = #tpu.dot_dimension_numbers<[1], [0], [0], [1], [0, 0, 1, 1], [], []>} : vector<128x128xbf16>, vector<128x32xbf16>, vector<128x32xf32> -> vector<128x32xf32>
    %97 = arith.truncf %96 : vector<128x32xf32> to vector<128x32xbf16>
    %c0_51 = arith.constant 0 : index
    %c96_52 = arith.constant 96 : index
    %98 = vector.load %arg9[%c0_51, %c96_52] : memref<128x128xbf16, #tpu.memory_space<vmem>>, vector<128x32xbf16>
    tpu.vector_store %arg9[%c0_51, %c96_52], %97 {strides = array<i32>} : memref<128x128xbf16, #tpu.memory_space<vmem>>, vector<128x32xbf16>,
    %c0_53 = arith.constant 0 : index
    %c0_54 = arith.constant 0 : index
    %99 = vector.load %arg9[%c0_53, %c0_54] : memref<128x128xbf16, #tpu.memory_space<vmem>>, vector<128x128xbf16>
    %c0_55 = arith.constant 0 : index
    %c0_56 = arith.constant 0 : index
    %100 = vector.load %arg5[%c0_55, %c0_56] : memref<128x128xbf16, #tpu.memory_space<vmem>>, vector<128x128xbf16>
    %cst_57 = arith.constant dense<0.000000e+00> : vector<128x128xf32>
    %101 = tpu.matmul %99, %100, %cst_57 {dimension_numbers = #tpu.dot_dimension_numbers<[1], [0], [0], [1], [0, 0, 1, 1], [], []>} : vector<128x128xbf16>, vector<128x128xbf16>, vector<128x128xf32> -> vector<128x128xf32>
    %c0_58 = arith.constant 0 : index
    %c0_59 = arith.constant 0 : index
    %102 = vector.load %arg6[%c0_58, %c0_59] : memref<1x128xf32, #tpu.memory_space<vmem>>, vector<1x128xf32>
    %103 = vector.shape_cast %102 : vector<1x128xf32> to vector<128xf32>
    %104 = vector.shape_cast %103 : vector<128xf32> to vector<1x128xf32>
    %105 = vector.broadcast %104 : vector<1x128xf32> to vector<128x128xf32>
    %106 = arith.addf %101, %105 : vector<128x128xf32>
    %c0_60 = arith.constant 0 : index
    %c0_61 = arith.constant 0 : index
    %107 = vector.load %arg7[%c0_60, %c0_61] : memref<128x128xf32, #tpu.memory_space<vmem>>, vector<128x128xf32>
    tpu.vector_store %arg7[%c0_60, %c0_61], %106 {strides = array<i32>} : memref<128x128xf32, #tpu.memory_space<vmem>>, vector<128x128xf32>,
    return
  }
  func.func @transform_0(%arg0: i32) -> (i32, i32) {
    %c0_i32 = arith.constant 0 : i32
    %c0_i32_0 = arith.constant 0 : i32
    return %arg0, %c0_i32 : i32, i32
  }
  func.func @transform_1(%arg0: i32) -> (i32, i32) {
    %c0_i32 = arith.constant 0 : i32
    %c0_i32_0 = arith.constant 0 : i32
    %c0_i32_1 = arith.constant 0 : i32
    return %c0_i32, %c0_i32_0 : i32, i32
  }
  func.func @transform_2(%arg0: i32) -> (i32, i32) {
    %c0_i32 = arith.constant 0 : i32
    %c0_i32_0 = arith.constant 0 : i32
    %c0_i32_1 = arith.constant 0 : i32
    return %c0_i32, %c0_i32_0 : i32, i32
  }
  func.func @transform_3(%arg0: i32) -> (i32, i32, i32) {
    %c0_i32 = arith.constant 0 : i32
    %c0_i32_0 = arith.constant 0 : i32
    %c0_i32_1 = arith.constant 0 : i32
    %c0_i32_2 = arith.constant 0 : i32
    return %c0_i32, %c0_i32_0, %c0_i32_1 : i32, i32, i32
  }
  func.func @transform_4(%arg0: i32) -> (i32, i32) {
    %c0_i32 = arith.constant 0 : i32
    %c0_i32_0 = arith.constant 0 : i32
    %c0_i32_1 = arith.constant 0 : i32
    return %c0_i32, %c0_i32_0 : i32, i32
  }
  func.func @transform_5(%arg0: i32) -> (i32, i32) {
    %c0_i32 = arith.constant 0 : i32
    %c0_i32_0 = arith.constant 0 : i32
    %c0_i32_1 = arith.constant 0 : i32
    return %c0_i32, %c0_i32_0 : i32, i32
  }
  func.func @transform_6(%arg0: i32) -> (i32, i32) {
    %c0_i32 = arith.constant 0 : i32
    %c0_i32_0 = arith.constant 0 : i32
    return %arg0, %c0_i32 : i32, i32
  }
}

</mosaic_0001>

<bundles_post_ra>
// kernel: tpu_custom_call.1
= control target key start
LH: loop header
LB: loop body
LE: loop exit
PB: predicated region body
PF: predicated region fallthrough
CT: control target
= control target key end

     0   :  { %s6133_s0 = inlined_call_operand.hbm [shape: f32[256,128], index: 0, kind: input, shape index: {}]   ;;  %s6134_s1 = inlined_call_operand.hbm [shape: bf16[128,384], index: 1, kind: input, shape index: {}]   ;;  %s6135_s2 = inlined_call_operand.vmem [shape: f32[1,384], index: 2, kind: input, shape index: {}]   ;;  %s6136_s3 = inlined_call_operand.hbm [shape: bf16[4,128,128], index: 3, kind: input, shape index: {}]   ;;  %s6137_s4 = inlined_call_operand.hbm [shape: bf16[128,128], index: 4, kind: input, shape index: {}]   ;;  %s6138_s5 = inlined_call_operand.vmem [shape: f32[1,128], index: 5, kind: input, shape index: {}]   ;;  %s6139_s6 = inlined_call_operand.hbm [shape: f32[256,128], index: 6, kind: output, shape index: {}]  }
   0x1   :  { %6149 = sst [smem:[#allocation23_spill]] %s6134_s1 }
   0x2   :  { %11 = vsyncpa [#allocation5], 0 }
   0x3   :  { %13 = vsyncpa [#allocation5 + $0x1], 0 }
   0x4   :  { %14 = vsyncpa [#allocation8], 0 }
   0x5   :  { %15 = vsyncpa [#allocation11], 0 }
   0x6   :  { %16 = vsyncpa [#allocation6], 0 }
   0x7   :  { %18 = vsyncpa [#allocation6 + $0x1], 0  ;;  %s4689_s21 = smov 0   ;;  %s4691_s22 = smov 0  }
   0x8   :  { %s4693_s23 = smov 0   ;;  %s4695_s24 = smov 0  }
   0x9 LB: > { %s4710_s25 = sadd.s32 4294967295, %s4635_s24   ;;  %s3291_s26 = sadd.s32 4294967294, %s4635_s24   ;;  %s4635_s24 = sphi %s4695_s24, %s6192_s24   ;;  %s4631_s23 = sphi %s4693_s23, %s6191_s23   ;;  %s4627_s22 = sphi %s4691_s22, %s6190_s22   ;;  %s4623_s21 = sphi %s4689_s21, %s6189_s21  }
   0xa   : > { %p44_p0 = scmp.ne.s32.totalorder %s4627_s22, %s4623_s21  ;;  %p6140_p1 = scmp.eq.s32.totalorder %s4710_s25, 0 }
   0xb   : > { %p179_p3 = scmp.eq.s32.totalorder %s3291_s26, 1  ;;  %p3292_p5 = scmp.ge.s32.totalorder %s4635_s24, 1 }
   0xc   : > { %p4719_p4 = por %p6140_p1, %p44_p0  ;;  %p186_p7 = scmp.lt.s32.totalorder %s4635_s24, 3 }
   0xd   : > { %p4724_p6 = por %p179_p3, %p44_p0  ;;  %s4637_s30 = smov [#allocation7]  }
   0xe   : > { %s6150_s27 = scalar_select %p4719_p4, 1, 0 }
   0xf   : > { %s6151_s28 = scalar_select %p4724_p6, 1, 0 }
  0x10   : > { %p4729_p8 = pnand %p3292_p5, %p186_p7  ;;  %s198_s7 = sshll.u32 %s4637_s30, 4  ;;  %s4733_s7 = int_to_ptr.vmem [resolvable:$true] %s198_s7 }
  0x11   : > { %s4638_s9 = smov [#allocation9]   ;;  %s6154_s1 = sld [smem:[#allocation23_spill]] }
  0x12   : > { %s6152_s29 = scalar_select %p4729_p8, 1, 0 }
  0x13   : > { %p4078_p9 = pneg %p4729_p8  ;;  %s214_s10 = sshll.u32 %s4638_s9, 4  ;;  %s4744_s10 = int_to_ptr.vmem [resolvable:$true] %s214_s10 }
  0x15   : > { %p4740_p11 = pnand %p4078_p9, %p6140_p1 }
  0x17   : > { %s4447_s13 = scalar_lea.hbm %s6154_s1, 3072  ;;  %p4754_p13 = pneg %p4740_p11 }
  0x18   : > { %p4448_p12 = scmp.ne.s32.totalorder %s6154_s1, %s4447_s13  ;;  %p4454_p5 = scmp.lt.u32.totalorder %s4447_s13, %s6154_s1 }
  0x1a   : > { %p4450_p0 = pnand %p4754_p13, %p4448_p12 }
  0x1c   : > { %p4451_p3 = pneg %p4450_p0 }
  0x1e   : > { %p4456_p7 = pnand %p4454_p5, %p4451_p3 }
  0x20   : > { %4459 = shalt.err (!%p4456_p7)
}
  0x21   : > { %s4460_s19 = scalar_lea.vmem %s4733_s7, 3072  ;;  %p4468_p2 = scmp.lt.s32.totalorder %s4733_s7, %s4733_s7 }
  0x22   : > { %p4461_p9 = scmp.ne.s32.totalorder %s4733_s7, %s4460_s19  ;;  %p4469_p6 = scmp.lt.s32.totalorder %s4460_s19, %s4460_s19 }
  0x24   : > { %p4463_p10 = pnand %p4461_p9, %p4754_p13  ;;  %p4470_p12 = por %p4469_p6, %p4468_p2 }
  0x26   : > { %p4464_p1 = pneg %p4463_p10 }
  0x28   : > { %p4471_p0 = pnand %p4470_p12, %p4464_p1 }
  0x2a   : > { %4474 = shalt.err (!%p4471_p0)
}
  0x2b   : > { %s4639_s20 = smov 192   ;;  %s4640_s26 = smov 12  }
  0x2c   : > { %4081 = dma.hbm_to_vmem [thread:$0]  (!%p4740_p11), %s6154_s1, 3072, %s4733_s7, [#allocation8], %s4639_s20, %s4639_s20, %s4640_s26  }
  0x2d   : > { %s4475_s13 = scalar_lea.hbm %s6136_s3, 4096 }
  0x2e   : > { %p4476_p2 = scmp.ne.s32.totalorder %s6136_s3, %s4475_s13  ;;  %p4482_p10 = scmp.lt.u32.totalorder %s4475_s13, %s6136_s3 }
  0x30   : > { %p4478_p1 = pnand %p4476_p2, %p4754_p13 }
  0x32   : > { %p4479_p6 = pneg %p4478_p1 }
  0x34   : > { %p4484_p3 = pnand %p4482_p10, %p4479_p6 }
  0x36   : > { %4487 = shalt.err (!%p4484_p3)
}
  0x37   : > { %s4488_s7 = scalar_lea.vmem %s4744_s10, 4096  ;;  %p4496_p12 = scmp.lt.s32.totalorder %s4744_s10, %s4744_s10 }
  0x38   : > { %p4489_p5 = scmp.ne.s32.totalorder %s4744_s10, %s4488_s7  ;;  %p4497_p0 = scmp.lt.s32.totalorder %s4488_s7, %s4488_s7 }
  0x3a   : > { %p4491_p7 = pnand %p4489_p5, %p4754_p13  ;;  %p4498_p2 = por %p4497_p0, %p4496_p12 }
  0x3c   : > { %p4492_p9 = pneg %p4491_p7 }
  0x3e   : > { %p4499_p1 = pnand %p4498_p2, %p4492_p9 }
  0x40   : > { %4502 = shalt.err (!%p4499_p1)
}
  0x41   : > { %s4641_s19 = smov 64   ;;  %s4642_s20 = smov 4  }
  0x42   : > { %4084 = dma.hbm_to_vmem [thread:$0]  (!%p4740_p11), %s6136_s3, 4096, %s4744_s10, [#allocation8], %s4641_s19, %s4641_s19, %s4642_s20  }
  0x43   : > { %s4643_s9 = smov [#allocation10]   ;;  %s4799_s12 = sadd.s32 1, %s4635_s24  }
  0x44   : > { %s227_s11 = sshll.u32 %s4643_s9, 4  ;;  %s4503_s15 = scalar_lea.hbm %s6137_s4, 1024  ;;  %s228_s11 = int_to_ptr.vmem [resolvable:$true] %s227_s11 }
  0x45   : > { %p4504_p6 = scmp.ne.s32.totalorder %s6137_s4, %s4503_s15  ;;  %p4510_p5 = scmp.lt.u32.totalorder %s4503_s15, %s6137_s4 }
  0x47   : > { %p4506_p10 = pnand %p4504_p6, %p4754_p13 }
  0x49   : > { %p4507_p3 = pneg %p4506_p10 }
  0x4b   : > { %p4512_p7 = pnand %p4510_p5, %p4507_p3 }
  0x4d   : > { %4515 = shalt.err (!%p4512_p7)
}
  0x4e   : > { %s4516_s10 = scalar_lea.vmem %s228_s11, 1024  ;;  %p4524_p2 = scmp.lt.s32.totalorder %s228_s11, %s228_s11 }
  0x4f   : > { %p4517_p9 = scmp.ne.s32.totalorder %s228_s11, %s4516_s10  ;;  %p4525_p1 = scmp.lt.s32.totalorder %s4516_s10, %s4516_s10 }
  0x51   : > { %p4519_p12 = pnand %p4517_p9, %p4754_p13  ;;  %p4526_p4 = por %p4525_p1, %p4524_p2 }
  0x53   : > { %p4520_p0 = pneg %p4519_p12 }
  0x55   : > { %p4527_p8 = pnand %p4526_p4, %p4520_p0 }
  0x57   : > { %4530 = shalt.err (!%p4527_p8)
}
  0x58   : > { %4087 = dma.hbm_to_vmem [thread:$0]  (!%p4740_p11), %s6137_s4, 1024, %s228_s11, [#allocation11], %s4641_s19, %s4641_s19, %s4642_s20  }
  0x59   : > { %s28_s1 = ssub.s32 %s4635_s24, %s4799_s12  ;;  %s31_s16 = sadd.s32 1, %s4631_s23 }
  0x5a   : > { %p29_p4 = scmp.eq.s32.totalorder %s28_s1, 0  ;;  %p38_p8 = scmp.ne.s32.totalorder %s4631_s23, %s4627_s22 }
  0x5b   : > { %p39_p13 = scmp.eq.s32.totalorder %s4635_s24, 0  ;;  %p4099_p6 = scmp.lt.s32.totalorder %s4635_s24, 2 }
  0x5c   : > { %s4827_s8 = scalar_select %p29_p4, %s4631_s23, %s31_s16  }
  0x5d   : > { %p40_p10 = por %p39_p13, %p38_p8  ;;  %p6156_p3 = scmp.eq.s32.totalorder %s4710_s25, 1 }
  0x5e   : > { %s244_s13 = sand.u32 1, %s4631_s23   ;;  %s3376_s14 = sshll.u32 %s4635_s24, 11 }
  0x5f   : > { %p4831_p5 = por %p6156_p3, %p38_p8  ;;  %s3297_s15 = sshll.u32 %s244_s13, 7 }
  0x60   : > { %s4840_s19 = scalar_lea.hbm %s6133_s0, %s3376_s14  ;;  %s248_s20 = scalar_lea.vmem [#allocation4], %s3297_s15 }
  0x61   : > { %s255_s11 = sshll.u32 %s248_s20, 4  ;;  %p4842_p11 = pnand %p4099_p6, %p40_p10  ;;  %s4846_s11 = int_to_ptr.vmem [resolvable:$true] %s255_s11 }
  0x62   : > { %s4848_s10 = scalar_lea.sflag [#allocation5], %s244_s13  ;;  %s4531_s26 = scalar_lea.hbm %s4840_s19, 2048 }
  0x63   : > { %p4532_p7 = scmp.ne.s32.totalorder %s4840_s19, %s4531_s26  ;;  %p4533_p9 = pneg %p4842_p11 }
  0x64   : > { %s4536_s16 = scalar_lea.hbm %s6133_s0, 4096  ;;  %p4537_p2 = scmp.lt.u32.totalorder %s4840_s19, %s6133_s0 }
  0x65   : > { %p4534_p12 = pnand %p4533_p9, %p4532_p7  ;;  %p4538_p1 = scmp.lt.u32.totalorder %s4536_s16, %s4531_s26 }
  0x66   : > { %p4540_p8 = scmp.lt.u32.totalorder %s4531_s26, %s4840_s19 }
  0x67   : > { %p4535_p0 = pneg %p4534_p12  ;;  %p4539_p4 = por %p4538_p1, %p4537_p2 }
  0x69   : > { %p4541_p13 = por %p4540_p8, %p4539_p4 }
  0x6b   : > { %p4542_p6 = pnand %p4541_p13, %p4535_p0 }
  0x6d   : > { %4545 = shalt.err (!%p4542_p6)
}
  0x6e   : > { %s4546_s13 = scalar_lea.vmem %s4846_s11, 2048  ;;  %s4644_s17 = smov [#allocation4]  }
  0x6f   : > { %p4547_p10 = scmp.ne.s32.totalorder %s4846_s11, %s4546_s13  ;;  %s4551_s18 = sshll.u32 %s4644_s17, 4  ;;  %s4552_s18 = int_to_ptr.vmem [resolvable:$false] %s4551_s18 }
  0x70   : > { %s4553_s20 = scalar_lea.vmem %s4552_s18, 4096  ;;  %p4554_p12 = scmp.lt.s32.totalorder %s4846_s11, %s4552_s18 }
  0x71   : > { %p4549_p3 = pnand %p4547_p10, %p4533_p9  ;;  %p4555_p2 = scmp.lt.s32.totalorder %s4553_s20, %s4546_s13 }
  0x73   : > { %p4550_p7 = pneg %p4549_p3  ;;  %p4556_p1 = por %p4555_p2, %p4554_p12 }
  0x75   : > { %p4557_p4 = pnand %p4556_p1, %p4550_p7 }
  0x77   : > { %4560 = shalt.err (!%p4557_p4)
}
  0x78   : > { %s4645_s26 = smov 128   ;;  %s4646_s30 = smov 8  }
  0x79   : > { %4091 = dma.hbm_to_vmem [thread:$0]  (!%p4842_p11), %s4840_s19, 2048, %s4846_s11, %s4848_s10, %s4645_s26, %s4645_s26, %s4646_s30  }
  0x7a   : > { %p6159_p9 = scmp.ne.s32.totalorder %s6152_s29, 0 }
  0x7c   : > { %267 = sbr.rel (%p6159_p9) target bundleno = 3521 (0xdc1), region = 44 }
  0x83   : > { %s4879_s1 = sand.u32 1, %s4627_s22   ;;  %p6160_p0 = scmp.ne.s32.totalorder %s6150_s27, 0 }
  0x84   : > { %s3301_s16 = sshll.u32 %s4879_s1, 7  ;;  %s270_s14 = scalar_lea.sflag [#allocation5], %s4879_s1 }
  0x85   : > { %s4885_s15 = scalar_lea.vmem [#allocation4], %s3301_s16 }
  0x86   : > { %4606 = dma.done.wait (%p6160_p0), %s270_s14, 2048  }
  0x87   : > { %4608 = vsyncadd (%p6160_p0), %s270_s14, 4294965248  ;;  %p6161_p11 = scmp.eq.s32.totalorder %s4710_s25, 0 }
  0x89   : > { %4610 = dma.done.wait (%p6161_p11), [#allocation8], 7168   ;;  %p6162_p8 = pmov %p6161_p11 }
  0x8b   : > { %4612 = vsyncadd (%p6162_p8), [#allocation8], 4294960128  ;;  %p6163_p13 = pmov %p6162_p8 }
  0x8c   : > { %p6164_p6 = pmov %p6162_p8 }
  0x8d   : > { %4614 = dma.done.wait (%p6163_p13), [#allocation11], 1024  }
  0x8e   : > { %4616 = vsyncadd (%p6164_p6), [#allocation11], 4294966272  ;;  %v4647_v0 = vmov 0   ;;  %v4151_v1 = vld [vmem:[#allocation7 + $0x4] ss:$12 sps:$4 sm:$0xff]   ;;  %v318_v10 = vld [vmem:[%s4885_s15 + $0x8] sm:$0xff]  ;;  %v375_v49 = vlaneseq }
  0x8f   : > { %550 = vmatprep.mubr.bf16.mxu0 %v4647_v0  ;;  %v4153_v2 = vld [vmem:[#allocation7] ss:$12 sps:$4 sm:$0xff]   ;;  %518 = vmatprep.subr.bf16.mxu0 %v4151_v1  ;;  %v4154_v3 = vld [vmem:[#allocation7 + $0x1c] ss:$12 sps:$4 sm:$0xff]   ;;  %v4156_v4 = vld [vmem:[#allocation7 + $0x18] ss:$12 sps:$4 sm:$0xff]  }
  0x90   : > { %519 = vmatpush1.bf16.msra.mxu0 %v4153_v2  ;;  %v4157_v5 = vld [vmem:[#allocation7 + $0x34] ss:$12 sps:$4 sm:$0xff]   ;;  %v4159_v6 = vld [vmem:[#allocation7 + $0x30] ss:$12 sps:$4 sm:$0xff]   ;;  %v4160_v7 = vld [vmem:[#allocation7 + $0x4c] ss:$12 sps:$4 sm:$0xff]  }
  0x91   : > { %520 = vmatprep.subr.bf16.mxu0 %v4154_v3  ;;  %v317_v8 = vld [vmem:[%s4885_s15] sm:$0xff]  ;;  %v4162_v9 = vld [vmem:[#allocation7 + $0x48] ss:$12 sps:$4 sm:$0xff]   ;;  %v4171_v20 = vld [vmem:[#allocation7 + $0x90] ss:$12 sps:$4 sm:$0xff]   ;;  %v376_v50 = vshrl.u32 %v375_v49, 7 }
  0x92   : > { %v4163_v11 = vld [vmem:[#allocation7 + $0x64] ss:$12 sps:$4 sm:$0xff]   ;;  %v333_v12 = vpack.c.bf16 %v318_v10, %v317_v8  ;;  %v4165_v13 = vld [vmem:[#allocation7 + $0x60] ss:$12 sps:$4 sm:$0xff]   ;;  %v4166_v14 = vld [vmem:[#allocation7 + $0x7c] ss:$12 sps:$4 sm:$0xff]  }
  0x93   : > { %v4175_v15 = vld [vmem:[#allocation7 + $0x8] ss:$12 sps:$4 sm:$0xff]   ;;  %v4176_v16 = vld [vmem:[#allocation7 + $0x20] ss:$12 sps:$4 sm:$0xff]   ;;  %v4168_v17 = vld [vmem:[#allocation7 + $0x78] ss:$12 sps:$4 sm:$0xff]  }
  0x94   : > { %521 = vmatpush1.bf16.msra.mxu0 %v4156_v4  ;;  %3710 = vmatprep.mubr.bf16.mxu1 %v333_v12  ;;  %v4169_v18 = vld [vmem:[#allocation7 + $0x94] ss:$12 sps:$4 sm:$0xff]   ;;  %v4177_v19 = vld [vmem:[#allocation7 + $0x38] ss:$12 sps:$4 sm:$0xff]   ;;  %v4178_v22 = vld [vmem:[#allocation7 + $0x50] ss:$12 sps:$4 sm:$0xff]  }
  0x95   : > { %522 = vmatprep.subr.bf16.mxu0 %v4157_v5  ;;  %3694 = vmatprep.subr.bf16.mxu1 %v4175_v15  ;;  %v4172_v21 = vld [vmem:[#allocation7 + $0xac] ss:$12 sps:$4 sm:$0xff]   ;;  %v4174_v23 = vld [vmem:[#allocation7 + $0xa8] ss:$12 sps:$4 sm:$0xff]   ;;  %v4182_v30 = vld [vmem:[#allocation7 + $0xb0] ss:$12 sps:$4 sm:$0xff]  }
  0x96   : > { %3695 = vmatpush3.bf16.msra.mxu1 %v4175_v15  ;;  %v4179_v24 = vld [vmem:[#allocation7 + $0x68] ss:$12 sps:$4 sm:$0xff]   ;;  %v4180_v25 = vld [vmem:[#allocation7 + $0x80] ss:$12 sps:$4 sm:$0xff]   ;;  %v320_v27 = vld [vmem:[%s4885_s15 + $0x18] sm:$0xff]  ;;  %v377_v51 = vsub.s32 0, %v376_v50 }
  0x97   : > { %3696 = vmatprep.subr.bf16.mxu1 %v4176_v16  ;;  %v319_v26 = vld [vmem:[%s4885_s15 + $0x10] sm:$0xff]  ;;  %v4181_v28 = vld [vmem:[#allocation7 + $0x98] ss:$12 sps:$4 sm:$0xff]   ;;  %v322_v32 = vld [vmem:[%s4885_s15 + $0x28] sm:$0xff]  ;;  %v381_v53 = vsub.s32 1, %v376_v50  ;;  %vm832_vm0 = vcmask 261120  }
  0x98   : > { %523 = vmatpush1.bf16.msra.mxu0 %v4159_v6  ;;  %v334_v29 = vpack.c.bf16 %v320_v27, %v319_v26  ;;  %v321_v31 = vld [vmem:[%s4885_s15 + $0x20] sm:$0xff]  ;;  %v323_v34 = vld [vmem:[%s4885_s15 + $0x30] sm:$0xff]  ;;  %v324_v35 = vld [vmem:[%s4885_s15 + $0x38] sm:$0xff]  ;;  %s4648_s19 = smov 96   ;;  %s4649_s11 = smov 64   ;;  %vm1814_vm1 = vcmask 523520  }
  0x99   : > { %524 = vmatprep.subr.bf16.mxu0 %v4160_v7  ;;  %v335_v33 = vpack.c.bf16 %v322_v32, %v321_v31  ;;  %v336_v36 = vpack.c.bf16 %v324_v35, %v323_v34  ;;  %v325_v37 = vld [vmem:[%s4885_s15 + $0x40] sm:$0xff]  ;;  %v326_v38 = vld [vmem:[%s4885_s15 + $0x48] sm:$0xff]  ;;  %v327_v40 = vld [vmem:[%s4885_s15 + $0x50] sm:$0xff]  ;;  %v385_v7 = vsub.s32 2, %v376_v50  ;;  %s4650_s7 = smov 32   ;;  %vm2394_vm2 = vcmask 785920  }
  0x9a   : > { %3697 = vmatpush3.bf16.msra.mxu1 %v4176_v16  ;;  %v337_v39 = vpack.c.bf16 %v326_v38, %v325_v37  ;;  %v328_v41 = vld [vmem:[%s4885_s15 + $0x58] sm:$0xff]  ;;  %v329_v42 = vld [vmem:[%s4885_s15 + $0x60] sm:$0xff]  ;;  %v330_v43 = vld [vmem:[%s4885_s15 + $0x68] sm:$0xff]  ;;  %vm2974_vm3 = vcmask 1048320   ;;  %s6064_s17 = scalar_lea.vmem [#allocation12], %s3301_s16  ;;  %s3377_s18 = sshll.u32 %s4710_s25, 11 }
  0x9b   : > { %3698 = vmatprep.subr.bf16.mxu1 %v4177_v19  ;;  %v338_v44 = vpack.c.bf16 %v328_v41, %v327_v40  ;;  %v339_v45 = vpack.c.bf16 %v330_v43, %v329_v42  ;;  %v331_v46 = vld [vmem:[%s4885_s15 + $0x70] sm:$0xff]  ;;  %v332_v47 = vld [vmem:[%s4885_s15 + $0x78] sm:$0xff]  ;;  %v373_v52 = vld [vmem:[%s6135_s2] sm:$0x7]  ;;  %s3189_s20 = sshll.u32 %s6064_s17, 4  ;;  %s6084_s16 = scalar_lea.hbm %s6139_s6, %s3377_s18  ;;  %s6086_s20 = int_to_ptr.vmem [resolvable:$true] %s3189_s20 }
  0x9c   : > { %525 = vmatpush1.bf16.msra.mxu0 %v4162_v9  ;;  %v340_v48 = vpack.c.bf16 %v332_v47, %v331_v46  ;;  %v4926_v54 = vrot.slane %v373_v52, %v377_v51  ;;  %v4928_v56 = vrot.slane %v373_v52, %v381_v53  ;;  %s3176_s25 = scalar_lea.sflag [#allocation6], %s4879_s1  ;;  %s4561_s14 = scalar_lea.vmem %s6086_s20, 2048 }
  0x9d   : > { %526 = vmatprep.subr.bf16.mxu0 %v4163_v11  ;;  %p4562_p10 = scmp.ne.s32.totalorder %s6086_s20, %s4561_s14  ;;  %s4651_s15 = smov [#allocation12]  }
  0x9e   : > { %3699 = vmatpush3.bf16.msra.mxu1 %v4177_v19  ;;  %s4565_s27 = sshll.u32 %s4651_s15, 4  ;;  %s4566_s27 = int_to_ptr.vmem [resolvable:$false] %s4565_s27 }
  0x9f   : > { %3700 = vmatprep.subr.bf16.mxu1 %v4178_v22  ;;  %p4563_p3 = pnand %p4562_p10, %p4831_p5  ;;  %s4567_s29 = scalar_lea.vmem %s4566_s27, 4096 }
  0xa0   : > { %527 = vmatpush1.bf16.msra.mxu0 %v4165_v13  ;;  %p4568_p12 = scmp.lt.s32.totalorder %s6086_s20, %s4566_s27  ;;  %p4569_p2 = scmp.lt.s32.totalorder %s4567_s29, %s4561_s14 }
  0xa1   : > { %528 = vmatprep.subr.bf16.mxu0 %v4166_v14  ;;  %v4954_v14 = vrot.slane %v373_v52, %v385_v7  ;;  %p4564_p7 = pneg %p4563_p3 }
  0xa2   : > { %3701 = vmatpush3.bf16.msra.mxu1 %v4178_v22  ;;  %p4570_p1 = por %p4569_p2, %p4568_p12 }
  0xa3   : > { %3702 = vmatprep.subr.bf16.mxu1 %v4179_v24 }
  0xa4   : > { %529 = vmatpush1.bf16.msra.mxu0 %v4168_v17  ;;  %p4571_p4 = pnand %p4570_p1, %p4564_p7 }
  0xa5   : > { %530 = vmatprep.subr.bf16.mxu0 %v4169_v18 }
  0xa6   : > { %3703 = vmatpush3.bf16.msra.mxu1 %v4179_v24 }
  0xa7   : > { %3704 = vmatprep.subr.bf16.mxu1 %v4180_v25 }
  0xa8   : > { %531 = vmatpush1.bf16.msra.mxu0 %v4171_v20 }
  0xa9   : > { %532 = vmatprep.subr.bf16.mxu0 %v4172_v21 }
  0xaa   : > { %3705 = vmatpush3.bf16.msra.mxu1 %v4180_v25 }
  0xab   : > { %3706 = vmatprep.subr.bf16.mxu1 %v4181_v28 }
  0xac   : > { %533 = vmatpush1.bf16.msra.mxu0 %v4174_v23 }
  0xae   : > { %3707 = vmatpush3.bf16.msra.mxu1 %v4181_v28 }
  0xaf   : > { %551 = vmatmul.mubr.bf16.vlgmr.msra.gmra.mrb[0].mxu0 %v333_v12  ;;  %3708 = vmatprep.subr.bf16.mxu1 %v4182_v30 }
  0xb0   : > { %560 = vmatprep.mubr.bf16.mxu0 %v4647_v0 }
  0xb2   : > { %3709 = vmatpush3.bf16.msra.mxu1 %v4182_v30 }
  0xb5   : > { %3711 = vmatmul.mubr.bf16.vlgmr.msra.gmra.mrb[0].mxu1 %v334_v29 }
  0xb6   : > { %3714 = vmatprep.mubr.bf16.mxu1 %v335_v33 }
  0xb7   : > { %561 = vmatmul.mubr.bf16.gmra.mrb[4].mxu0 %v334_v29 }
  0xb8   : > { %570 = vmatprep.mubr.bf16.mxu0 %v4647_v0 }
  0xbd   : > { %3715 = vmatmul.mubr.bf16.gmra.mrb[4].mxu1 %v336_v36 }
  0xbe   : > { %3718 = vmatprep.mubr.bf16.mxu1 %v337_v39 }
  0xbf   : > { %571 = vmatmul.mubr.bf16.gmra.mrb[8].mxu0 %v335_v33 }
  0xc0   : > { %580 = vmatprep.mubr.bf16.mxu0 %v4647_v0 }
  0xc5   : > { %3719 = vmatmul.mubr.bf16.gmra.mrb[8].mxu1 %v338_v44 }
  0xc6   : > { %3722 = vmatprep.mubr.bf16.mxu1 %v339_v45 }
  0xc7   : > { %581 = vmatmul.mubr.bf16.gmra.mrb[12].mxu0 %v336_v36 }
  0xc8   : > { %590 = vmatprep.mubr.bf16.mxu0 %v4647_v0 }
  0xcd   : > { %3723 = vmatmul.mubr.bf16.gmra.mrb[12].mxu1 %v340_v48 }
  0xcf   : > { %591 = vmatmul.mubr.bf16.gmra.mrb[16].mxu0 %v337_v39 }
  0xd0   : > { %600 = vmatprep.mubr.bf16.mxu0 %v4647_v0 }
  0xd7   : > { %601 = vmatmul.mubr.bf16.gmra.mrb[20].mxu0 %v338_v44 }
  0xd8   : > { %610 = vmatprep.mubr.bf16.mxu0 %v4647_v0 }
  0xdf   : > { %611 = vmatmul.mubr.bf16.gmra.mrb[24].mxu0 %v339_v45 }
  0xe0   : > { %620 = vmatprep.mubr.bf16.mxu0 %v4647_v0 }
  0xe7   : > { %621 = vmatmul.mubr.bf16.gmra.mrb[28].mxu0 %v340_v48 }
 0x182   : > { %v552_v55 = vpop.f32.mrb[0].mxu0 }
 0x183   : > { %v554_v57 = vpop.f32.mrb[1].mxu0  ;;  %v553_v59 = vadd.f32 %v552_v55, %v4926_v54 }
 0x184   : > { %v556_v58 = vpop.f32.mrb[2].mxu0  ;;  %v555_v62 = vadd.f32 %v554_v57, %v4928_v56 }
 0x185   : > { %v557_v60 = vadd.f32 %v556_v58, %v4926_v54  ;;  %v558_v61 = vpop.f32.mrb[3].mxu0 }
 0x186   : > { %v559_v63 = vadd.f32 %v558_v61, %v4928_v56 }
 0x187   : > { %v4934_v0 = vpack.c.bf16 %v557_v60, %v553_v59 }
 0x188   : > { %v4936_v1 = vpack.c.bf16 %v559_v63, %v555_v62  ;;  %v3712_v17 = vpop.f32.mrb[0].mxu1 }
 0x189   : > { %3742 = vmatprep.mubr.msk.bf16.mxu0 %vm832_vm0, %v4934_v0  ;;  %v674_v20 = vadd.f32 %v3712_v17, %v4954_v14  ;;  %v665_v21 = vpop.f32.mrb[1].mxu1 }
 0x18a   : > { %v562_v2 = vpop.f32.mrb[4].mxu0  ;;  %1332 = vrot.lane.b32.xlu0 %v4936_v1, %s4648_s19  ;;  %4030 = vmatprep.subr.msk.bf16.mxu0 %vm832_vm0, %v4936_v1  ;;  %v858_v3 = vsel %vm832_vm0, %v4936_v1, 0  ;;  %v666_v23 = vadd.f32 %v665_v21, %v4954_v14  ;;  %v3713_v24 = vpop.f32.mrb[2].mxu1 }
 0x18b   : > { %v563_v4 = vadd.f32 %v562_v2, %v4926_v54  ;;  %v564_v5 = vpop.f32.mrb[5].mxu0  ;;  %3727 = vmatpush3.bf16.xpose.msra.mxu0 %v858_v3  ;;  %v677_v27 = vadd.f32 %v3713_v24, %v4954_v14  ;;  %v668_v28 = vpop.f32.mrb[3].mxu1 }
 0x18c   : > { %v566_v6 = vpop.f32.mrb[6].mxu0  ;;  %v565_v10 = vadd.f32 %v564_v5, %v4928_v56  ;;  %v669_v31 = vadd.f32 %v668_v28, %v4954_v14 }
 0x18d   : > { %v567_v8 = vadd.f32 %v566_v6, %v4926_v54  ;;  %v568_v9 = vpop.f32.mrb[7].mxu0  ;;  %v4972_v33 = vpack.c.bf16 %v677_v27, %v674_v20 }
 0x18e   : > { %v569_v11 = vadd.f32 %v568_v9, %v4928_v56  ;;  %v4976_v35 = vpack.c.bf16 %v669_v31, %v666_v23 }
 0x18f   : > { %v4950_v12 = vpack.c.bf16 %v567_v8, %v563_v4 }
 0x190   : > { %v4952_v13 = vpack.c.bf16 %v569_v11, %v565_v10  ;;  %v3716_v38 = vpop.f32.mrb[4].mxu1  ;;  %3758 = vmatprep.subr.bf16.mxu1 %v4976_v35 }
 0x191   : > { %v690_v41 = vadd.f32 %v3716_v38, %v4954_v14  ;;  %v681_v42 = vpop.f32.mrb[5].mxu1  ;;  %3759 = vmatpush3.bf16.msra.mxu1 %v4976_v35 }
 0x192   : > { %v572_v15 = vpop.f32.mrb[8].mxu0  ;;  %1334 = vrot.lane.b32.xlu1 %v4952_v13, %s4648_s19  ;;  %4031 = vmatprep.subr.msk.bf16.mxu0 %vm832_vm0, %v4952_v13  ;;  %v861_v16 = vsel %vm832_vm0, %v4952_v13, 0  ;;  %v682_v44 = vadd.f32 %v681_v42, %v4954_v14  ;;  %v3717_v45 = vpop.f32.mrb[6].mxu1 }
 0x193   : > { %v573_v18 = vadd.f32 %v572_v15, %v4926_v54  ;;  %v574_v19 = vpop.f32.mrb[9].mxu0  ;;  %3729 = vmatpush3.bf16.xpose.msra.mxu0 %v861_v16  ;;  %3760 = vmatprep.subr.bf16.mxu1 %v4972_v33  ;;  %v693_v48 = vadd.f32 %v3717_v45, %v4954_v14  ;;  %v684_v49 = vpop.f32.mrb[7].mxu1 }
 0x194   : > { %v576_v22 = vpop.f32.mrb[10].mxu0  ;;  %v575_v29 = vadd.f32 %v574_v19, %v4928_v56  ;;  %v685_v52 = vadd.f32 %v684_v49, %v4954_v14 }
 0x195   : > { %v577_v25 = vadd.f32 %v576_v22, %v4926_v54  ;;  %v578_v26 = vpop.f32.mrb[11].mxu0  ;;  %v4995_v55 = vpack.c.bf16 %v693_v48, %v690_v41  ;;  %3761 = vmatpush3.bf16.msra.mxu1 %v4972_v33 }
 0x196   : > { %v579_v30 = vadd.f32 %v578_v26, %v4928_v56  ;;  %v5000_v58 = vpack.c.bf16 %v685_v52, %v682_v44 }
 0x197   : > { %v4970_v32 = vpack.c.bf16 %v577_v25, %v573_v18 }
 0x198   : > { %v4974_v34 = vpack.c.bf16 %v579_v30, %v575_v29  ;;  %v3720_v61 = vpop.f32.mrb[8].mxu1  ;;  %3762 = vmatprep.subr.bf16.mxu1 %v5000_v58 }
 0x199   : > { %v706_v2 = vadd.f32 %v3720_v61, %v4954_v14  ;;  %v697_v3 = vpop.f32.mrb[9].mxu1  ;;  %3763 = vmatpush3.bf16.msra.mxu1 %v5000_v58 }
 0x19a   : > { %v582_v36 = vpop.f32.mrb[12].mxu0  ;;  %4032 = vmatprep.subr.msk.bf16.mxu0 %vm832_vm0, %v4974_v34  ;;  %v864_v37 = vsel %vm832_vm0, %v4974_v34, 0  ;;  %v698_v5 = vadd.f32 %v697_v3, %v4954_v14  ;;  %v3721_v6 = vpop.f32.mrb[10].mxu1  ;;  %3764 = vmatprep.subr.bf16.mxu1 %v4995_v55 }
 0x19b   : > { %v583_v39 = vadd.f32 %v582_v36, %v4926_v54  ;;  %v584_v40 = vpop.f32.mrb[13].mxu0  ;;  %3731 = vmatpush3.bf16.xpose.msra.mxu0 %v864_v37  ;;  %v709_v9 = vadd.f32 %v3721_v6, %v4954_v14  ;;  %v700_v10 = vpop.f32.mrb[11].mxu1 }
 0x19c   : > { %v586_v43 = vpop.f32.mrb[14].mxu0  ;;  %v585_v50 = vadd.f32 %v584_v40, %v4928_v56  ;;  %v701_v16 = vadd.f32 %v700_v10, %v4954_v14 }
 0x19d   : > { %v587_v46 = vadd.f32 %v586_v43, %v4926_v54  ;;  %v588_v47 = vpop.f32.mrb[15].mxu0  ;;  %v5019_v18 = vpack.c.bf16 %v709_v9, %v706_v2  ;;  %3765 = vmatpush3.bf16.msra.mxu1 %v4995_v55 }
 0x19e   : > { %v589_v51 = vadd.f32 %v588_v47, %v4928_v56  ;;  %v5024_v20 = vpack.c.bf16 %v701_v16, %v698_v5 }
 0x19f   : > { %v4993_v53 = vpack.c.bf16 %v587_v46, %v583_v39 }
 0x1a0   : > { %v4998_v57 = vpack.c.bf16 %v589_v51, %v585_v50  ;;  %v3724_v23 = vpop.f32.mrb[12].mxu1  ;;  %3766 = vmatprep.subr.bf16.mxu1 %v5024_v20 }
 0x1a1   : > { %v722_v26 = vadd.f32 %v3724_v23, %v4954_v14  ;;  %v713_v27 = vpop.f32.mrb[13].mxu1  ;;  %3767 = vmatpush3.bf16.msra.mxu1 %v5024_v20 }
 0x1a2   : > { %v592_v59 = vpop.f32.mrb[16].mxu0  ;;  %4033 = vmatprep.subr.msk.bf16.mxu0 %vm832_vm0, %v4998_v57  ;;  %v867_v60 = vsel %vm832_vm0, %v4998_v57, 0  ;;  %v714_v29 = vadd.f32 %v713_v27, %v4954_v14  ;;  %v3725_v30 = vpop.f32.mrb[14].mxu1  ;;  %3768 = vmatprep.subr.bf16.mxu1 %v5019_v18 }
 0x1a3   : > { %v593_v62 = vadd.f32 %v592_v59, %v4926_v54  ;;  %v594_v63 = vpop.f32.mrb[17].mxu0  ;;  %3733 = vmatpush3.bf16.xpose.msra.mxu0 %v867_v60  ;;  %v725_v37 = vadd.f32 %v3725_v30, %v4954_v14  ;;  %v716_v38 = vpop.f32.mrb[15].mxu1 }
 0x1a4   : > { %v596_v4 = vpop.f32.mrb[18].mxu0  ;;  %v595_v11 = vadd.f32 %v594_v63, %v4928_v56  ;;  %v717_v41 = vadd.f32 %v716_v38, %v4954_v14  ;;  %v3507_v38 = vld [vmem:[#allocation9 + $0x10] sm:$0xff]  }
 0x1a5   : > { %v597_v7 = vadd.f32 %v596_v4, %v4926_v54  ;;  %v598_v8 = vpop.f32.mrb[19].mxu0  ;;  %v5043_v43 = vpack.c.bf16 %v725_v37, %v722_v26  ;;  %3769 = vmatpush3.bf16.msra.mxu1 %v5019_v18 }
 0x1a6   : > { %v599_v15 = vadd.f32 %v598_v8, %v4928_v56  ;;  %v5048_v45 = vpack.c.bf16 %v717_v41, %v714_v29  ;;  %v3508_v29 = vld [vmem:[#allocation9 + $0x18] sm:$0xff]  }
 0x1a7   : > { %v5017_v17 = vpack.c.bf16 %v597_v7, %v593_v62 }
 0x1a8   : > { %v5022_v19 = vpack.c.bf16 %v599_v15, %v595_v11  ;;  %3770 = vmatprep.subr.bf16.mxu1 %v5048_v45  ;;  %v3379_v15 = vld [vmem:[#allocation9] sm:$0xff]  }
 0x1a9   : > { %3771 = vmatpush3.bf16.msra.mxu1 %v5048_v45 }
 0x1aa   : > { %v602_v21 = vpop.f32.mrb[20].mxu0  ;;  %4034 = vmatprep.subr.msk.bf16.mxu0 %vm832_vm0, %v5022_v19  ;;  %v870_v22 = vsel %vm832_vm0, %v5022_v19, 0  ;;  %3772 = vmatprep.subr.bf16.mxu1 %v5043_v43 }
 0x1ab   : > { %v603_v24 = vadd.f32 %v602_v21, %v4926_v54  ;;  %v604_v25 = vpop.f32.mrb[21].mxu0  ;;  %3735 = vmatpush3.bf16.xpose.msra.mxu0 %v870_v22  ;;  %v3380_v21 = vunpack.c.l.bf16 %v3379_v15 }
 0x1ac   : > { %v606_v28 = vpop.f32.mrb[22].mxu0  ;;  %v605_v39 = vadd.f32 %v604_v25, %v4928_v56 }
 0x1ad   : > { %v607_v31 = vadd.f32 %v606_v28, %v4926_v54  ;;  %v608_v36 = vpop.f32.mrb[23].mxu0  ;;  %3773 = vmatpush3.bf16.msra.mxu1 %v5043_v43  ;;  %v3381_v28 = vunpack.c.h.bf16 %v3379_v15 }
 0x1ae   : > { %v609_v40 = vadd.f32 %v608_v36, %v4928_v56  ;;  %v3392_v36 = vunpack.c.l.bf16 %v3508_v29 }
 0x1af   : > { %v5041_v42 = vpack.c.bf16 %v607_v31, %v603_v24 }
 0x1b0   : > { %v5046_v44 = vpack.c.bf16 %v609_v40, %v605_v39  ;;  %v3393_v39 = vunpack.c.h.bf16 %v3508_v29 }
 0x1b2   : > { %v612_v46 = vpop.f32.mrb[24].mxu0  ;;  %4035 = vmatprep.subr.msk.bf16.mxu0 %vm832_vm0, %v5046_v44  ;;  %v873_v47 = vsel %vm832_vm0, %v5046_v44, 0 }
 0x1b3   : > { %v613_v14 = vadd.f32 %v612_v46, %v4926_v54  ;;  %v614_v48 = vpop.f32.mrb[25].mxu0  ;;  %3737 = vmatpush3.bf16.xpose.msra.mxu0 %v873_v47  ;;  %v3388_v47 = vunpack.c.l.bf16 %v3507_v38 }
 0x1b4   : > { %v616_v49 = vpop.f32.mrb[26].mxu0  ;;  %v615_v52 = vadd.f32 %v614_v48, %v4928_v56  ;;  %v3510_v48 = vld [vmem:[#allocation9 + $0x28] sm:$0xff]  }
 0x1b5   : > { %v617_v50 = vadd.f32 %v616_v49, %v4926_v54  ;;  %v618_v51 = vpop.f32.mrb[27].mxu0 }
 0x1b6   : > { %v619_v59 = vadd.f32 %v618_v51, %v4928_v56 }
 0x1b7   : > { %v5061_v60 = vpack.c.bf16 %v617_v50, %v613_v14  ;;  %v3389_v50 = vunpack.c.h.bf16 %v3507_v38 }
 0x1b8   : > { %v5064_v61 = vpack.c.bf16 %v619_v59, %v615_v52  ;;  %v3400_v52 = vunpack.c.l.bf16 %v3510_v48 }
 0x1ba   : > { %v622_v62 = vpop.f32.mrb[28].mxu0  ;;  %4036 = vmatprep.subr.msk.bf16.mxu0 %vm832_vm0, %v5064_v61  ;;  %v876_v63 = vsel %vm832_vm0, %v5064_v61, 0 }
 0x1bb   : > { %v623_v2 = vadd.f32 %v622_v62, %v4926_v54  ;;  %v624_v3 = vpop.f32.mrb[29].mxu0  ;;  %3739 = vmatpush3.bf16.xpose.msra.mxu0 %v876_v63  ;;  %v3509_v63 = vld [vmem:[#allocation9 + $0x20] sm:$0xff]  }
 0x1bc   : > { %v626_v4 = vpop.f32.mrb[30].mxu0  ;;  %v625_v7 = vadd.f32 %v624_v3, %v4928_v56 }
 0x1bd   : > { %v627_v5 = vadd.f32 %v626_v4, %v4926_v54  ;;  %v628_v6 = vpop.f32.mrb[31].mxu0 }
 0x1be   : > { %v629_v8 = vadd.f32 %v628_v6, %v4928_v56  ;;  %v3506_v56 = vld [vmem:[#allocation9 + $0x8] sm:$0xff]   ;;  %v3396_v6 = vunpack.c.l.bf16 %v3509_v63 }
 0x1bf   : > { %v5074_v9 = vpack.c.bf16 %v627_v5, %v623_v2  ;;  %v3384_v16 = vunpack.c.l.bf16 %v3506_v56  ;;  %v3385_v25 = vunpack.c.h.bf16 %v3506_v56  ;;  %v3401_v2 = vunpack.c.h.bf16 %v3510_v48 }
 0x1c0   : > { %v5076_v10 = vpack.c.bf16 %v629_v8, %v625_v7  ;;  %v3512_v8 = vld [vmem:[#allocation9 + $0x38] sm:$0xff]   ;;  %v3397_v56 = vunpack.c.h.bf16 %v3509_v63 }
 0x1c2   : > { %4037 = vmatprep.subr.msk.bf16.mxu0 %vm832_vm0, %v5076_v10  ;;  %v879_v11 = vsel %vm832_vm0, %v5076_v10, 0 }
 0x1c3   : > { %3741 = vmatpush3.bf16.xpose.msra.mxu0 %v879_v11 }
 0x1ca   : > { %3743 = vmatmul.mubr.msk.bf16.vlgmr.msra.gmra.mrb[32].mxu0 %vm832_vm0, %v4950_v12 }
 0x1cb   : > { %3746 = vmatprep.mubr.msk.bf16.mxu0 %vm832_vm0, %v4970_v32 }
 0x1d2   : > { %3747 = vmatmul.mubr.msk.bf16.gmra.mrb[36].mxu0 %vm832_vm0, %v4993_v53 }
 0x1d3   : > { %3750 = vmatprep.mubr.msk.bf16.mxu0 %vm832_vm0, %v5017_v17 }
 0x1da   : > { %3751 = vmatmul.mubr.msk.bf16.gmra.mrb[40].mxu0 %vm832_vm0, %v5041_v42 }
 0x1db   : > { %3754 = vmatprep.mubr.msk.bf16.mxu0 %vm832_vm0, %v5061_v60 }
 0x1e2   : > { %3755 = vmatmul.mubr.msk.bf16.gmra.mrb[44].mxu0 %vm832_vm0, %v5074_v9 }
 0x1fc   : > { %v5096_v54 = vpop.permute.xlu0 %1332 }
 0x1fd   : > { %4038 = vmatprep.subr.msk.bf16.mxu1 %vm832_vm0, %v5096_v54 }
 0x29d   : > { %v3744_v22 = vpop.f32.mrb[32].mxu0 }
 0x29e   : > { %v5100_v23 = vadd.f32 %v3744_v22, %v3384_v16  ;;  %v915_v24 = vpop.f32.mrb[33].mxu0  ;;  %v3408_v16 = vunpack.c.l.bf16 %v3512_v8 }
 0x29f   : > { %v5102_v26 = vadd.f32 %v3380_v21, %v915_v24  ;;  %v3745_v27 = vpop.f32.mrb[34].mxu0  ;;  %v3511_v24 = vld [vmem:[#allocation9 + $0x30] sm:$0xff]  }
 0x2a0   : > { %982 = vmax.xlane.f32.xlu1 %v5100_v23  ;;  %v918_v30 = vpop.f32.mrb[35].mxu0  ;;  %v5106_v31 = vadd.f32 %v3745_v27, %v3385_v25  ;;  %v3404_v29 = vunpack.c.l.bf16 %v3511_v24 }
 0x2a1   : > { %978 = vmax.xlane.f32.xlu0 %v5102_v26  ;;  %v5108_v37 = vadd.f32 %v3381_v28, %v918_v30 }
 0x2a4   : > { %984 = vmax.xlane.f32.xlu1 %v5106_v31 }
 0x2a5   : > { %v3748_v40 = vpop.f32.mrb[36].mxu0  ;;  %980 = vmax.xlane.f32.xlu0 %v5108_v37 }
 0x2a6   : > { %v5112_v41 = vadd.f32 %v3748_v40, %v3392_v36  ;;  %v931_v46 = vpop.f32.mrb[37].mxu0 }
 0x2a7   : > { %v3749_v14 = vpop.f32.mrb[38].mxu0  ;;  %v5118_v59 = vadd.f32 %v3388_v47, %v931_v46  ;;  %v3405_v46 = vunpack.c.h.bf16 %v3511_v24 }
 0x2a8   : > { %v5114_v49 = vadd.f32 %v3749_v14, %v3393_v39  ;;  %v934_v51 = vpop.f32.mrb[39].mxu0  ;;  %v3409_v39 = vunpack.c.h.bf16 %v3512_v8  ;;  %v5152_v14 = vpop.permute.xlu1 %1334 }
 0x2a9   : > { %990 = vmax.xlane.f32.xlu0 %v5112_v41  ;;  %v5120_v62 = vadd.f32 %v3389_v50, %v934_v51 }
 0x2aa   : > { %992 = vmax.xlane.f32.xlu1 %v5114_v49 }
 0x2ad   : > { %v3752_v3 = vpop.f32.mrb[40].mxu0  ;;  %986 = vmax.xlane.f32.xlu0 %v5118_v59 }
 0x2ae   : > { %v5123_v4 = vadd.f32 %v3752_v3, %v3400_v52  ;;  %v947_v5 = vpop.f32.mrb[41].mxu0  ;;  %988 = vmax.xlane.f32.xlu1 %v5120_v62 }
 0x2af   : > { %v3753_v7 = vpop.f32.mrb[42].mxu0  ;;  %v5130_v21 = vadd.f32 %v3396_v6, %v947_v5 }
 0x2b0   : > { %v5126_v11 = vadd.f32 %v3753_v7, %v3401_v2  ;;  %v950_v15 = vpop.f32.mrb[43].mxu0 }
 0x2b1   : > { %998 = vmax.xlane.f32.xlu0 %v5123_v4  ;;  %v5132_v22 = vadd.f32 %v3397_v56, %v950_v15 }
 0x2b2   : > { %1000 = vmax.xlane.f32.xlu1 %v5126_v11 }
 0x2b5   : > { %v3756_v25 = vpop.f32.mrb[44].mxu0  ;;  %994 = vmax.xlane.f32.xlu0 %v5130_v21 }
 0x2b6   : > { %v5135_v27 = vadd.f32 %v3756_v25, %v3408_v16  ;;  %v963_v28 = vpop.f32.mrb[45].mxu0  ;;  %996 = vmax.xlane.f32.xlu1 %v5132_v22 }
 0x2b7   : > { %v3757_v30 = vpop.f32.mrb[46].mxu0  ;;  %v5139_v38 = vadd.f32 %v3404_v29, %v963_v28 }
 0x2b8   : > { %v966_v36 = vpop.f32.mrb[47].mxu0  ;;  %v5146_v40 = vadd.f32 %v3757_v30, %v3409_v39 }
 0x2b9   : > { %1006 = vmax.xlane.f32.xlu0 %v5135_v27  ;;  %v5149_v47 = vadd.f32 %v3405_v46, %v966_v36 }
 0x2bd   : > { %1002 = vmax.xlane.f32.xlu0 %v5139_v38 }
 0x2c7   : > { %1338 = vrot.lane.b32.xlu1 %v4998_v57, %s4648_s19 }
 0x2d3   : > { %1336 = vrot.lane.b32.xlu0 %v4974_v34, %s4648_s19 }
 0x2eb   : > { %1008 = vmax.xlane.f32.xlu1 %v5146_v40 }
 0x2ef   : > { %1004 = vmax.xlane.f32.xlu1 %v5149_v47 }
 0x32d   : > { %v983_v48 = vpop.xlane.xlu1 %982 }
 0x32e   : > { %v1012_v50 = vsub.f32 %v5100_v23, %v983_v48  ;;  %v979_v51 = vpop.xlane.xlu0 %978 }
 0x32f   : > { %v1010_v52 = vsub.f32 %v5102_v26, %v979_v51 }
 0x330   : > { %v1030_v63 = vmul.f32 1.442695, %v1012_v50 }
 0x331   : > { %v1026_v2 = vmul.f32 1.442695, %v1010_v52  ;;  %v985_v3 = vpop.xlane.xlu1 %984 }
 0x332   : > { %4191 = vpow2.f32 %v1030_v63  ;;  %v1013_v5 = vsub.f32 %v5106_v31, %v985_v3  ;;  %v981_v6 = vpop.xlane.xlu0 %980 }
 0x333   : > { %v1011_v7 = vsub.f32 %v5108_v37, %v981_v6  ;;  %4193 = vpow2.f32 %v1026_v2 }
 0x334   : > { %v1032_v8 = vmul.f32 1.442695, %v1013_v5 }
 0x335   : > { %v1028_v56 = vmul.f32 1.442695, %v1011_v7 }
 0x336   : > { %4195 = vpow2.f32 %v1032_v8  ;;  %v991_v37 = vpop.xlane.xlu0 %990 }
 0x337   : > { %4197 = vpow2.f32 %v1028_v56  ;;  %v993_v25 = vpop.xlane.xlu1 %992  ;;  %v1016_v30 = vsub.f32 %v5112_v41, %v991_v37 }
 0x338   : > { %v1017_v51 = vsub.f32 %v5114_v49, %v993_v25 }
 0x339   : > { %v1038_v46 = vmul.f32 1.442695, %v1016_v30 }
 0x33a   : > { %v987_v16 = vpop.xlane.xlu0 %986  ;;  %v1040_v5 = vmul.f32 1.442695, %v1017_v51 }
 0x33b   : > { %v989_v29 = vpop.xlane.xlu1 %988  ;;  %v1014_v36 = vsub.f32 %v5118_v59, %v987_v16  ;;  %4199 = vpow2.f32 %v1038_v46 }
 0x33c   : > { %v5158_v15 = vpop.eup %4191  ;;  %v1015_v48 = vsub.f32 %v5120_v62, %v989_v29 }
 0x33d   : > { %1062 = vadd.xlane.f32.xlu0 %v5158_v15  ;;  %v5161_v23 = vpop.eup %4193  ;;  %v1034_v52 = vmul.f32 1.442695, %v1014_v36 }
 0x33e   : > { %v999_v24 = vpop.xlane.xlu0 %998  ;;  %v1036_v63 = vmul.f32 1.442695, %v1015_v48 }
 0x33f   : > { %v1001_v50 = vpop.xlane.xlu1 %1000  ;;  %4201 = vpow2.f32 %v1034_v52  ;;  %v1020_v6 = vsub.f32 %v5123_v4, %v999_v24 }
 0x340   : > { %v5163_v26 = vpop.eup %4195  ;;  %4203 = vpow2.f32 %v1036_v63  ;;  %v1021_v4 = vsub.f32 %v5126_v11, %v1001_v50 }
 0x341   : > { %1064 = vadd.xlane.f32.xlu1 %v5163_v26  ;;  %1058 = vadd.xlane.f32.xlu0 %v5161_v23  ;;  %v5167_v31 = vpop.eup %4197  ;;  %4205 = vpow2.f32 %v1040_v5  ;;  %v1046_v62 = vmul.f32 1.442695, %v1020_v6 }
 0x342   : > { %v995_v28 = vpop.xlane.xlu0 %994  ;;  %v1048_v25 = vmul.f32 1.442695, %v1021_v4 }
 0x343   : > { %v997_v41 = vpop.xlane.xlu1 %996  ;;  %v1018_v8 = vsub.f32 %v5130_v21, %v995_v28 }
 0x344   : > { %v1019_v28 = vsub.f32 %v5132_v22, %v997_v41 }
 0x345   : > { %1060 = vadd.xlane.f32.xlu1 %v5167_v31  ;;  %v5184_v37 = vpop.eup %4199 }
 0x346   : > { %v1007_v39 = vpop.xlane.xlu0 %1006 }
 0x347   : > { %v1024_v2 = vsub.f32 %v5135_v27, %v1007_v39  ;;  %v5182_v56 = vpop.permute.xlu1 %1338  ;;  %v1042_v27 = vmul.f32 1.442695, %v1018_v8 }
 0x349   : > { %v1054_v59 = vmul.f32 1.442695, %v1024_v2  ;;  %v5188_v16 = vpop.eup %4201 }
 0x34a   : > { %v1003_v3 = vpop.xlane.xlu0 %1002  ;;  %v5190_v24 = vpop.eup %4203 }
 0x34b   : > { %v1022_v7 = vsub.f32 %v5139_v38, %v1003_v3  ;;  %4207 = vpow2.f32 %v1054_v59  ;;  %v5196_v30 = vpop.eup %4205 }
 0x34c   : > { %4209 = vpow2.f32 %v1046_v62 }
 0x34d   : > { %v1050_v49 = vmul.f32 1.442695, %v1022_v7 }
 0x34e   : > { %v1337_v2 = vpop.permute.xlu0 %1336 }
 0x34f   : > { %4211 = vpow2.f32 %v1050_v49 }
 0x350   : > { %4213 = vpow2.f32 %v1042_v27 }
 0x355   : > { %v5198_v36 = vpop.eup %4207 }
 0x356   : > { %1342 = vrot.lane.b32.xlu1 %v5046_v44, %s4648_s19  ;;  %v5203_v46 = vpop.eup %4209 }
 0x357   : > { %1340 = vrot.lane.b32.xlu0 %v5022_v19, %s4648_s19 }
 0x359   : > { %v5205_v48 = vpop.eup %4211 }
 0x35a   : > { %v5209_v50 = vpop.eup %4213 }
 0x376   : > { %1070 = vadd.xlane.f32.xlu0 %v5184_v37 }
 0x378   : > { %v1009_v38 = vpop.xlane.xlu1 %1008 }
 0x379   : > { %v1025_v21 = vsub.f32 %v5146_v40, %v1009_v38  ;;  %v1044_v40 = vmul.f32 1.442695, %v1019_v28  ;;  %v1373_v28 = vsel %vm832_vm0, %v5096_v54, 0 }
 0x37a   : > { %1068 = vadd.xlane.f32.xlu0 %v5190_v24  ;;  %1066 = vadd.xlane.f32.xlu1 %v5188_v16 }
 0x37b   : > { %v1056_v29 = vmul.f32 1.442695, %v1025_v21 }
 0x37c   : > { %v1005_v11 = vpop.xlane.xlu1 %1004 }
 0x37d   : > { %4215 = vpow2.f32 %v1056_v29  ;;  %v1023_v39 = vsub.f32 %v5149_v47, %v1005_v11 }
 0x37e   : > { %1072 = vadd.xlane.f32.xlu1 %v5196_v30  ;;  %1086 = vadd.xlane.f32.xlu0 %v5198_v36  ;;  %4217 = vpow2.f32 %v1048_v25 }
 0x37f   : > { %4219 = vpow2.f32 %v1044_v40  ;;  %v1052_v22 = vmul.f32 1.442695, %v1023_v39 }
 0x381   : > { %4221 = vpow2.f32 %v1052_v22 }
 0x382   : > { %1078 = vadd.xlane.f32.xlu1 %v5203_v46  ;;  %1082 = vadd.xlane.f32.xlu0 %v5205_v48 }
 0x386   : > { %1074 = vadd.xlane.f32.xlu1 %v5209_v50 }
 0x387   : > { %v5212_v51 = vpop.eup %4215 }
 0x388   : > { %1088 = vadd.xlane.f32.xlu0 %v5212_v51  ;;  %v5215_v47 = vpop.eup %4217 }
 0x389   : > { %v5218_v52 = vpop.eup %4219 }
 0x38a   : > { %1080 = vadd.xlane.f32.xlu1 %v5215_v47 }
 0x38b   : > { %v5221_v63 = vpop.eup %4221 }
 0x38e   : > { %1076 = vadd.xlane.f32.xlu1 %v5218_v52 }
 0x392   : > { %1084 = vadd.xlane.f32.xlu1 %v5221_v63 }
 0x39e   : > { %1344 = vrot.lane.b32.xlu0 %v5064_v61, %s4648_s19 }
 0x3a2   : > { %1308 = vrot.lane.b32.xlu0 %v4934_v0, %s4648_s19 }
 0x3a3   : > { %1346 = vrot.lane.b32.xlu1 %v5076_v10, %s4648_s19 }
 0x3a6   : > { %1312 = vrot.lane.b32.xlu0 %v4970_v32, %s4648_s19 }
 0x3a7   : > { %1310 = vrot.lane.b32.xlu1 %v4950_v12, %s4648_s19 }
 0x3aa   : > { %1316 = vrot.lane.b32.xlu0 %v5017_v17, %s4648_s19 }
 0x3ab   : > { %1314 = vrot.lane.b32.xlu1 %v4993_v53, %s4648_s19 }
 0x3ae   : > { %1320 = vrot.lane.b32.xlu0 %v5061_v60, %s4648_s19 }
 0x3af   : > { %1318 = vrot.lane.b32.xlu1 %v5041_v42, %s4648_s19 }
 0x3b2   : > { %1653 = vrot.lane.b32.xlu0 %v4976_v35, %s4648_s19 }
 0x3b3   : > { %1322 = vrot.lane.b32.xlu1 %v5074_v9, %s4648_s19 }
 0x3b6   : > { %1657 = vrot.lane.b32.xlu0 %v5000_v58, %s4648_s19 }
 0x3b7   : > { %1655 = vrot.lane.b32.xlu1 %v4972_v33, %s4648_s19 }
 0x3ba   : > { %1661 = vrot.lane.b32.xlu0 %v5024_v20, %s4648_s19 }
 0x3bb   : > { %1659 = vrot.lane.b32.xlu1 %v4995_v55, %s4648_s19 }
 0x3be   : > { %1665 = vrot.lane.b32.xlu0 %v5048_v45, %s4648_s19 }
 0x3bf   : > { %1663 = vrot.lane.b32.xlu1 %v5019_v18, %s4648_s19 }
 0x3c2   : > { %1912 = vrot.lane.b32.xlu0 %v4936_v1, %s4649_s11 }
 0x3c3   : > { %1667 = vrot.lane.b32.xlu1 %v5043_v43, %s4648_s19 }
 0x3c7   : > { %1914 = vrot.lane.b32.xlu1 %v4952_v13, %s4649_s11 }
 0x3ca   : > { %v1063_v3 = vpop.xlane.xlu0 %1062 }
 0x3ce   : > { %v1065_v5 = vpop.xlane.xlu1 %1064  ;;  %v1059_v6 = vpop.xlane.xlu0 %1058 }
 0x3cf   : > { %4223 = vrcp.f32 %v1065_v5 }
 0x3d0   : > { %4225 = vrcp.f32 %v1059_v6 }
 0x3d1   : > { %4227 = vrcp.f32 %v1063_v3 }
 0x3d2   : > { %v1061_v41 = vpop.xlane.xlu1 %1060  ;;  %v1341_v54 = vpop.permute.xlu0 %1340 }
 0x3d3   : > { %4229 = vrcp.f32 %v1061_v41  ;;  %v1385_v29 = vsel %vm832_vm0, %v1341_v54, 0 }
 0x3d9   : > { %v4224_v59 = vpop.eup %4223 }
 0x3da   : > { %v4226_v7 = vpop.eup %4225  ;;  %v1109_v49 = vmul.f32 %v4224_v59, %v5163_v26  ;;  %v1376_v26 = vsel %vm832_vm0, %v5152_v14, 0 }
 0x3db   : > { %v4228_v62 = vpop.eup %4227  ;;  %v1106_v4 = vmul.f32 %v4226_v7, %v5161_v23  ;;  %v1379_v23 = vsel %vm832_vm0, %v1337_v2, 0 }
 0x3dc   : > { %v1108_v38 = vmul.f32 %v4228_v62, %v5158_v15  ;;  %v1382_v15 = vsel %vm832_vm0, %v5182_v56, 0 }
 0x3dd   : > { %v4230_v8 = vpop.eup %4229 }
 0x3de   : > { %v1107_v27 = vmul.f32 %v4230_v8, %v5167_v31  ;;  %v1123_v25 = vpack.c.bf16 %v1109_v49, %v1108_v38  ;;  %v1343_v31 = vpop.permute.xlu1 %1342 }
 0x3df   : > { %v1388_v22 = vsel %vm832_vm0, %v1343_v31, 0 }
 0x3e0   : > { %v1122_v21 = vpack.c.bf16 %v1107_v27, %v1106_v4 }
 0x3e2   : > { %3774 = vmatprep.mubr.bf16.mxu1 %v1122_v21 }
 0x3e3   : > { %3775 = vmatmul.mubr.bf16.vlgmr.msra.gmra.mrb[16].mxu1 %v1123_v25 }
 0x3e4   : > { %3791 = vmatpush3.bf16.xpose.msra.mxu1 %v1373_v28 }
 0x3e5   : > { %4039 = vmatprep.subr.msk.bf16.mxu1 %vm832_vm0, %v5152_v14 }
 0x3ec   : > { %3793 = vmatpush3.bf16.xpose.msra.mxu1 %v1376_v26 }
 0x3ed   : > { %4040 = vmatprep.subr.msk.bf16.mxu1 %vm832_vm0, %v1337_v2 }
 0x3f4   : > { %3795 = vmatpush3.bf16.xpose.msra.mxu1 %v1379_v23 }
 0x3f5   : > { %4041 = vmatprep.subr.msk.bf16.mxu1 %vm832_vm0, %v5182_v56 }
 0x3fc   : > { %3797 = vmatpush3.bf16.xpose.msra.mxu1 %v1382_v15 }
 0x3fd   : > { %4042 = vmatprep.subr.msk.bf16.mxu1 %vm832_vm0, %v1341_v54 }
 0x403   : > { %v1071_v14 = vpop.xlane.xlu0 %1070 }
 0x404   : > { %3799 = vmatpush3.bf16.xpose.msra.mxu1 %v1385_v29 }
 0x405   : > { %4043 = vmatprep.subr.msk.bf16.mxu1 %vm832_vm0, %v1343_v31 }
 0x407   : > { %v1067_v11 = vpop.xlane.xlu1 %1066  ;;  %v1069_v40 = vpop.xlane.xlu0 %1068 }
 0x408   : > { %4231 = vrcp.f32 %v1067_v11 }
 0x409   : > { %4233 = vrcp.f32 %v1069_v40 }
 0x40a   : > { %4235 = vrcp.f32 %v1071_v14 }
 0x40b   : > { %v1073_v39 = vpop.xlane.xlu1 %1072  ;;  %v1087_v56 = vpop.xlane.xlu0 %1086 }
 0x40c   : > { %4237 = vrcp.f32 %v1073_v39  ;;  %3801 = vmatpush3.bf16.xpose.msra.mxu1 %v1388_v22 }
 0x40f   : > { %v1079_v2 = vpop.xlane.xlu1 %1078  ;;  %v1083_v3 = vpop.xlane.xlu0 %1082 }
 0x412   : > { %v4232_v5 = vpop.eup %4231 }
 0x413   : > { %v4234_v6 = vpop.eup %4233  ;;  %v1075_v41 = vpop.xlane.xlu1 %1074  ;;  %v1110_v59 = vmul.f32 %v4232_v5, %v5188_v16 }
 0x414   : > { %v4236_v7 = vpop.eup %4235  ;;  %v1111_v62 = vmul.f32 %v4234_v6, %v5190_v24 }
 0x415   : > { %v1089_v8 = vpop.xlane.xlu0 %1088  ;;  %v1112_v38 = vmul.f32 %v4236_v7, %v5184_v37 }
 0x416   : > { %v4238_v49 = vpop.eup %4237  ;;  %v1124_v4 = vpack.c.bf16 %v1111_v62, %v1110_v59 }
 0x417   : > { %v1081_v27 = vpop.xlane.xlu1 %1080  ;;  %v1113_v21 = vmul.f32 %v4238_v49, %v5196_v30 }
 0x418   : > { %3778 = vmatprep.mubr.bf16.mxu1 %v1124_v4  ;;  %4239 = vrcp.f32 %v1081_v27 }
 0x419   : > { %v1345_v25 = vpop.permute.xlu0 %1344  ;;  %v1125_v28 = vpack.c.bf16 %v1113_v21, %v1112_v38  ;;  %4241 = vrcp.f32 %v1075_v41 }
 0x41a   : > { %4044 = vmatprep.subr.msk.bf16.mxu1 %vm832_vm0, %v1345_v25  ;;  %v1391_v16 = vsel %vm832_vm0, %v1345_v25, 0  ;;  %4243 = vrcp.f32 %v1079_v2 }
 0x41b   : > { %v1077_v26 = vpop.xlane.xlu1 %1076  ;;  %3779 = vmatmul.mubr.bf16.gmra.mrb[20].mxu1 %v1125_v28 }
 0x41c   : > { %4245 = vrcp.f32 %v1077_v26  ;;  %3803 = vmatpush3.bf16.xpose.msra.mxu1 %v1391_v16 }
 0x41d   : > { %v1309_v24 = vpop.permute.xlu0 %1308  ;;  %4247 = vrcp.f32 %v1083_v3 }
 0x41f   : > { %v1085_v23 = vpop.xlane.xlu1 %1084 }
 0x420   : > { %4249 = vrcp.f32 %v1085_v23 }
 0x421   : > { %4251 = vrcp.f32 %v1089_v8  ;;  %v1313_v37 = vpop.permute.xlu0 %1312 }
 0x422   : > { %v4240_v30 = vpop.eup %4239  ;;  %4253 = vrcp.f32 %v1087_v56 }
 0x423   : > { %v1347_v15 = vpop.permute.xlu1 %1346  ;;  %v4242_v54 = vpop.eup %4241  ;;  %v1117_v40 = vmul.f32 %v4240_v30, %v5215_v47 }
 0x424   : > { %4045 = vmatprep.subr.msk.bf16.mxu1 %vm832_vm0, %v1347_v15  ;;  %v1394_v31 = vsel %vm832_vm0, %v1347_v15, 0  ;;  %v4244_v29 = vpop.eup %4243  ;;  %v1114_v22 = vmul.f32 %v4242_v54, %v5209_v50 }
 0x425   : > { %3805 = vmatpush3.bf16.xpose.msra.mxu1 %v1394_v31  ;;  %v1317_v14 = vpop.permute.xlu0 %1316  ;;  %v1116_v56 = vmul.f32 %v4244_v29, %v5203_v46 }
 0x426   : > { %v4246_v11 = vpop.eup %4245 }
 0x427   : > { %v1311_v39 = vpop.permute.xlu1 %1310  ;;  %v1115_v2 = vmul.f32 %v4246_v11, %v5218_v52  ;;  %v4248_v3 = vpop.eup %4247  ;;  %v1127_v59 = vpack.c.bf16 %v1117_v40, %v1116_v56 }
 0x428   : > { %v1118_v8 = vmul.f32 %v4248_v3, %v5205_v48 }
 0x429   : > { %v1321_v5 = vpop.permute.xlu0 %1320  ;;  %v1126_v6 = vpack.c.bf16 %v1115_v2, %v1114_v22 }
 0x42a   : > { %v4250_v41 = vpop.eup %4249 }
 0x42b   : > { %v4252_v7 = vpop.eup %4251  ;;  %v1315_v62 = vpop.permute.xlu1 %1314  ;;  %3782 = vmatprep.mubr.bf16.mxu1 %v1126_v6  ;;  %v1119_v49 = vmul.f32 %v4250_v41, %v5221_v63 }
 0x42c   : > { %3783 = vmatmul.mubr.bf16.gmra.mrb[24].mxu1 %v1127_v59  ;;  %v4254_v47 = vpop.eup %4253  ;;  %v1121_v52 = vmul.f32 %v4252_v7, %v5212_v51 }
 0x42d   : > { %v1654_v4 = vpop.permute.xlu0 %1653  ;;  %v1128_v50 = vpack.c.bf16 %v1119_v49, %v1118_v8  ;;  %v1120_v46 = vmul.f32 %v4254_v47, %v5198_v36 }
 0x42e   : > { %3822 = vmatprep.subr.bf16.mxu0 %v1654_v4 }
 0x42f   : > { %v1319_v27 = vpop.permute.xlu1 %1318  ;;  %3786 = vmatprep.mubr.bf16.mxu1 %v1128_v50  ;;  %3823 = vmatpush3.bf16.msra.mxu0 %v1654_v4  ;;  %v1129_v38 = vpack.c.bf16 %v1121_v52, %v1120_v46  ;;  %v3411_v50 = vld [vmem:[#allocation9 + $0x40] sm:$0xff]  }
 0x431   : > { %v1658_v63 = vpop.permute.xlu0 %1657 }
 0x433   : > { %v1323_v21 = vpop.permute.xlu1 %1322 }
 0x434   : > { %3787 = vmatmul.mubr.bf16.gmra.mrb[28].mxu1 %v1129_v38  ;;  %v3412_v38 = vunpack.c.l.bf16 %v3411_v50 }
 0x435   : > { %3806 = vmatprep.mubr.msk.bf16.mxu1 %vm832_vm0, %v1309_v24  ;;  %v1662_v51 = vpop.permute.xlu0 %1661 }
 0x437   : > { %v1656_v48 = vpop.permute.xlu1 %1655 }
 0x438   : > { %3824 = vmatprep.subr.bf16.mxu0 %v1656_v48 }
 0x439   : > { %3825 = vmatpush3.bf16.msra.mxu0 %v1656_v48  ;;  %v1666_v28 = vpop.permute.xlu0 %1665 }
 0x43a   : > { %3826 = vmatprep.subr.bf16.mxu0 %v1658_v63 }
 0x43b   : > { %v1660_v25 = vpop.permute.xlu1 %1659 }
 0x43c   : > { %3807 = vmatmul.mubr.msk.bf16.vlgmr.msra.gmra.mrb[32].mxu1 %vm832_vm0, %v1311_v39 }
 0x43d   : > { %3810 = vmatprep.mubr.msk.bf16.mxu1 %vm832_vm0, %v1313_v37  ;;  %3827 = vmatpush3.bf16.msra.mxu0 %v1658_v63  ;;  %v5307_v26 = vpop.permute.xlu0 %1912 }
 0x43e   : > { %3828 = vmatprep.subr.bf16.mxu0 %v1660_v25 }
 0x43f   : > { %v1664_v36 = vpop.permute.xlu1 %1663 }
 0x441   : > { %3829 = vmatpush3.bf16.msra.mxu0 %v1660_v25 }
 0x442   : > { %3830 = vmatprep.subr.bf16.mxu0 %v1662_v51 }
 0x443   : > { %v1668_v16 = vpop.permute.xlu1 %1667 }
 0x444   : > { %3811 = vmatmul.mubr.msk.bf16.gmra.mrb[36].mxu1 %vm832_vm0, %v1315_v62  ;;  %v3513_v62 = vld [vmem:[#allocation9 + $0x48] sm:$0xff]  }
 0x445   : > { %3814 = vmatprep.mubr.msk.bf16.mxu1 %vm832_vm0, %v1317_v14  ;;  %3831 = vmatpush3.bf16.msra.mxu0 %v1662_v51  ;;  %v3416_v4 = vunpack.c.l.bf16 %v3513_v62 }
 0x446   : > { %3832 = vmatprep.subr.bf16.mxu0 %v1664_v36 }
 0x449   : > { %3833 = vmatpush3.bf16.msra.mxu0 %v1664_v36  ;;  %v3417_v36 = vunpack.c.h.bf16 %v3513_v62 }
 0x44a   : > { %3834 = vmatprep.subr.bf16.mxu0 %v1666_v28 }
 0x44c   : > { %3815 = vmatmul.mubr.msk.bf16.gmra.mrb[40].mxu1 %vm832_vm0, %v1319_v27  ;;  %v3413_v27 = vunpack.c.h.bf16 %v3411_v50 }
 0x44d   : > { %3818 = vmatprep.mubr.msk.bf16.mxu1 %vm832_vm0, %v1321_v5  ;;  %3835 = vmatpush3.bf16.msra.mxu0 %v1666_v28  ;;  %v3515_v28 = vld [vmem:[#allocation9 + $0x58] sm:$0xff]  }
 0x44e   : > { %3836 = vmatprep.subr.bf16.mxu0 %v1668_v16 }
 0x451   : > { %3837 = vmatpush3.bf16.msra.mxu0 %v1668_v16  ;;  %v3425_v16 = vunpack.c.h.bf16 %v3515_v28 }
 0x452   : > { %4046 = vmatprep.subr.msk.bf16.mxu0 %vm832_vm0, %v5307_v26 }
 0x454   : > { %3819 = vmatmul.mubr.msk.bf16.gmra.mrb[44].mxu1 %vm832_vm0, %v1323_v21 }
 0x4b6   : > { %v3776_v24 = vpop.f32.mrb[16].mxu1 }
 0x4b7   : > { %v1164_v23 = vpop.f32.mrb[17].mxu1 }
 0x4b8   : > { %v3777_v37 = vpop.f32.mrb[18].mxu1 }
 0x4b9   : > { %v1228_v30 = vpack.c.bf16 %v3777_v37, %v3776_v24  ;;  %v1167_v15 = vpop.f32.mrb[19].mxu1  ;;  %v3424_v37 = vunpack.c.l.bf16 %v3515_v28 }
 0x4ba   : > { %v1227_v54 = vpack.c.bf16 %v1167_v15, %v1164_v23  ;;  %v3514_v15 = vld [vmem:[#allocation9 + $0x50] sm:$0xff]  }
 0x4bb   : > { %1236 = vst.msk [vmem:[#allocation3 + $0x8] sm:$0xff] %vm832_vm0, %v1228_v30 }
 0x4bc   : > { %1235 = vst.msk [vmem:[#allocation3] sm:$0xff] %vm832_vm0, %v1227_v54 }
 0x4ee   : > { %v3780_v31 = vpop.f32.mrb[20].mxu1 }
 0x4ef   : > { %v1180_v29 = vpop.f32.mrb[21].mxu1 }
 0x4f0   : > { %v3781_v14 = vpop.f32.mrb[22].mxu1 }
 0x4f1   : > { %v1230_v11 = vpack.c.bf16 %v3781_v14, %v3780_v31  ;;  %v1183_v40 = vpop.f32.mrb[23].mxu1 }
 0x4f2   : > { %v1229_v39 = vpack.c.bf16 %v1183_v40, %v1180_v29  ;;  %v3421_v29 = vunpack.c.h.bf16 %v3514_v15  ;;  %v3420_v40 = vunpack.c.l.bf16 %v3514_v15 }
 0x4f3   : > { %1238 = vst.msk [vmem:[#allocation3 + $0x18] sm:$0xff] %vm832_vm0, %v1230_v11 }
 0x4f4   : > { %1237 = vst.msk [vmem:[#allocation3 + $0x10] sm:$0xff] %vm832_vm0, %v1229_v39  ;;  %v3517_v39 = vld [vmem:[#allocation9 + $0x68] sm:$0xff]  }
 0x4ff   : > { %v3784_v22 = vpop.f32.mrb[24].mxu1 }
 0x500   : > { %v1196_v2 = vpop.f32.mrb[25].mxu1 }
 0x501   : > { %v3785_v3 = vpop.f32.mrb[26].mxu1 }
 0x502   : > { %v1232_v56 = vpack.c.bf16 %v3785_v3, %v3784_v22  ;;  %v1199_v5 = vpop.f32.mrb[27].mxu1 }
 0x503   : > { %v1231_v6 = vpack.c.bf16 %v1199_v5, %v1196_v2  ;;  %v3433_v2 = vunpack.c.h.bf16 %v3517_v39  ;;  %v3432_v5 = vunpack.c.l.bf16 %v3517_v39 }
 0x504   : > { %1240 = vst.msk [vmem:[#allocation3 + $0x28] sm:$0xff] %vm832_vm0, %v1232_v56 }
 0x505   : > { %1239 = vst.msk [vmem:[#allocation3 + $0x20] sm:$0xff] %vm832_vm0, %v1231_v6 }
 0x507   : > { %v3788_v41 = vpop.f32.mrb[28].mxu1 }
 0x508   : > { %v1212_v59 = vpop.f32.mrb[29].mxu1 }
 0x509   : > { %v3789_v7 = vpop.f32.mrb[30].mxu1 }
 0x50a   : > { %v1234_v8 = vpack.c.bf16 %v3789_v7, %v3788_v41  ;;  %v1215_v49 = vpop.f32.mrb[31].mxu1  ;;  %v3516_v41 = vld [vmem:[#allocation9 + $0x60] sm:$0xff]  }
 0x50b   : > { %v1233_v47 = vpack.c.bf16 %v1215_v49, %v1212_v59  ;;  %v3429_v62 = vunpack.c.h.bf16 %v3516_v41 }
 0x50c   : > { %1242 = vst.msk [vmem:[#allocation3 + $0x38] sm:$0xff] %vm832_vm0, %v1234_v8 }
 0x50d   : > { %1241 = vst.msk [vmem:[#allocation3 + $0x30] sm:$0xff] %vm832_vm0, %v1233_v47  ;;  %v3428_v47 = vunpack.c.l.bf16 %v3516_v41 }
 0x50f   : > { %v3808_v52 = vpop.f32.mrb[32].mxu1 }
 0x510   : > { %v5320_v46 = vadd.f32 %v3808_v52, %v3416_v4  ;;  %v1430_v21 = vpop.f32.mrb[33].mxu1  ;;  %v3519_v4 = vld [vmem:[#allocation9 + $0x78] sm:$0xff]  }
 0x511   : > { %v3809_v48 = vpop.f32.mrb[34].mxu1  ;;  %v5325_v51 = vadd.f32 %v3412_v38, %v1430_v21  ;;  %v3440_v38 = vunpack.c.l.bf16 %v3519_v4 }
 0x512   : > { %1497 = vmax.xlane.f32.xlu0 %v5320_v46  ;;  %v1433_v63 = vpop.f32.mrb[35].mxu1  ;;  %v5329_v23 = vadd.f32 %v3809_v48, %v3417_v36  ;;  %v3518_v48 = vld [vmem:[#allocation9 + $0x70] sm:$0xff]  }
 0x513   : > { %v5323_v25 = vadd.f32 %v3413_v27, %v1433_v63  ;;  %v3437_v15 = vunpack.c.h.bf16 %v3518_v48 }
 0x515   : > { %1495 = vmax.xlane.f32.xlu1 %v5323_v25 }
 0x516   : > { %1493 = vmax.xlane.f32.xlu0 %v5325_v51 }
 0x517   : > { %v3812_v24 = vpop.f32.mrb[36].mxu1 }
 0x518   : > { %v1446_v30 = vpop.f32.mrb[37].mxu1  ;;  %v5334_v11 = vadd.f32 %v3812_v24, %v3424_v37  ;;  %v3441_v37 = vunpack.c.h.bf16 %v3519_v4 }
 0x519   : > { %v3813_v54 = vpop.f32.mrb[38].mxu1  ;;  %v5340_v56 = vadd.f32 %v3420_v40, %v1446_v30 }
 0x51a   : > { %v5331_v31 = vadd.f32 %v3813_v54, %v3425_v16  ;;  %1499 = vmax.xlane.f32.xlu0 %v5329_v23  ;;  %v1449_v14 = vpop.f32.mrb[39].mxu1  ;;  %v3436_v16 = vunpack.c.l.bf16 %v3518_v48 }
 0x51b   : > { %v5337_v22 = vadd.f32 %v3421_v29, %v1449_v14  ;;  %v5372_v29 = vpop.permute.xlu1 %1914 }
 0x51c   : > { %1507 = vmax.xlane.f32.xlu1 %v5331_v31 }
 0x51e   : > { %1505 = vmax.xlane.f32.xlu0 %v5334_v11 }
 0x51f   : > { %v3816_v3 = vpop.f32.mrb[40].mxu1 }
 0x520   : > { %1503 = vmax.xlane.f32.xlu1 %v5337_v22  ;;  %v1462_v6 = vpop.f32.mrb[41].mxu1  ;;  %v5346_v49 = vadd.f32 %v3816_v3, %v3432_v5 }
 0x521   : > { %v3817_v59 = vpop.f32.mrb[42].mxu1  ;;  %v5352_v27 = vadd.f32 %v3428_v47, %v1462_v6 }
 0x522   : > { %v5343_v7 = vadd.f32 %v3817_v59, %v3433_v2  ;;  %1501 = vmax.xlane.f32.xlu0 %v5340_v56  ;;  %v1465_v8 = vpop.f32.mrb[43].mxu1 }
 0x523   : > { %v5349_v50 = vadd.f32 %v3429_v62, %v1465_v8 }
 0x524   : > { %1515 = vmax.xlane.f32.xlu1 %v5343_v7 }
 0x526   : > { %1513 = vmax.xlane.f32.xlu0 %v5346_v49 }
 0x527   : > { %v3820_v52 = vpop.f32.mrb[44].mxu1 }
 0x528   : > { %1511 = vmax.xlane.f32.xlu1 %v5349_v50  ;;  %v1478_v21 = vpop.f32.mrb[45].mxu1  ;;  %v5356_v28 = vadd.f32 %v3820_v52, %v3440_v38 }
 0x529   : > { %v3821_v63 = vpop.f32.mrb[46].mxu1  ;;  %v5359_v24 = vadd.f32 %v3436_v16, %v1478_v21 }
 0x52a   : > { %1509 = vmax.xlane.f32.xlu0 %v5352_v27  ;;  %v1481_v36 = vpop.f32.mrb[47].mxu1  ;;  %v5366_v30 = vadd.f32 %v3821_v63, %v3441_v37 }
 0x52b   : > { %v5369_v54 = vadd.f32 %v3437_v15, %v1481_v36 }
 0x52e   : > { %1521 = vmax.xlane.f32.xlu0 %v5356_v28 }
 0x532   : > { %1517 = vmax.xlane.f32.xlu0 %v5359_v24 }
 0x539   : > { %1918 = vrot.lane.b32.xlu1 %v4998_v57, %s4649_s11 }
 0x548   : > { %1916 = vrot.lane.b32.xlu0 %v4974_v34, %s4649_s11 }
 0x55d   : > { %1523 = vmax.xlane.f32.xlu1 %v5366_v30 }
 0x561   : > { %1519 = vmax.xlane.f32.xlu1 %v5369_v54 }
 0x59f   : > { %v1498_v14 = vpop.xlane.xlu0 %1497 }
 0x5a0   : > { %v1527_v40 = vsub.f32 %v5320_v46, %v1498_v14 }
 0x5a2   : > { %v1545_v39 = vmul.f32 1.442695, %v1527_v40  ;;  %v1496_v2 = vpop.xlane.xlu1 %1495 }
 0x5a3   : > { %v1526_v3 = vsub.f32 %v5323_v25, %v1496_v2  ;;  %v1494_v5 = vpop.xlane.xlu0 %1493 }
 0x5a4   : > { %4255 = vpow2.f32 %v1545_v39  ;;  %v1525_v6 = vsub.f32 %v5325_v51, %v1494_v5 }
 0x5a5   : > { %v1543_v41 = vmul.f32 1.442695, %v1526_v3 }
 0x5a6   : > { %v1541_v59 = vmul.f32 1.442695, %v1525_v6 }
 0x5a7   : > { %4257 = vpow2.f32 %v1543_v41  ;;  %v1500_v62 = vpop.xlane.xlu0 %1499 }
 0x5a8   : > { %4259 = vpow2.f32 %v1541_v59  ;;  %v1528_v8 = vsub.f32 %v5329_v23, %v1500_v62 }
 0x5a9   : > { %v1508_v38 = vpop.xlane.xlu1 %1507 }
 0x5aa   : > { %v1547_v47 = vmul.f32 1.442695, %v1528_v8  ;;  %v1532_v39 = vsub.f32 %v5331_v31, %v1508_v38 }
 0x5ab   : > { %v1506_v52 = vpop.xlane.xlu0 %1505 }
 0x5ac   : > { %4261 = vpow2.f32 %v1547_v47  ;;  %v1531_v48 = vsub.f32 %v5334_v11, %v1506_v52  ;;  %v1555_v6 = vmul.f32 1.442695, %v1532_v39 }
 0x5ad   : > { %v1504_v63 = vpop.xlane.xlu1 %1503 }
 0x5ae   : > { %v5378_v4 = vpop.eup %4255  ;;  %v1553_v16 = vmul.f32 1.442695, %v1531_v48  ;;  %v1530_v15 = vsub.f32 %v5337_v22, %v1504_v63 }
 0x5af   : > { %1577 = vadd.xlane.f32.xlu1 %v5378_v4  ;;  %v1502_v23 = vpop.xlane.xlu0 %1501 }
 0x5b0   : > { %v1529_v37 = vsub.f32 %v5340_v56, %v1502_v23  ;;  %4263 = vpow2.f32 %v1553_v16  ;;  %v1551_v3 = vmul.f32 1.442695, %v1530_v15 }
 0x5b1   : > { %v5381_v46 = vpop.eup %4257  ;;  %v1516_v14 = vpop.xlane.xlu1 %1515 }
 0x5b2   : > { %v5383_v25 = vpop.eup %4259  ;;  %1575 = vadd.xlane.f32.xlu0 %v5381_v46  ;;  %v1549_v2 = vmul.f32 1.442695, %v1529_v37  ;;  %v1536_v31 = vsub.f32 %v5343_v7, %v1516_v14 }
 0x5b3   : > { %1573 = vadd.xlane.f32.xlu1 %v5383_v25  ;;  %v1514_v21 = vpop.xlane.xlu0 %1513 }
 0x5b4   : > { %v1535_v5 = vsub.f32 %v5346_v49, %v1514_v21  ;;  %4265 = vpow2.f32 %v1549_v2  ;;  %v1563_v23 = vmul.f32 1.442695, %v1536_v31 }
 0x5b5   : > { %v1512_v41 = vpop.xlane.xlu1 %1511  ;;  %4267 = vpow2.f32 %v1551_v3 }
 0x5b6   : > { %v5387_v51 = vpop.eup %4261  ;;  %v1561_v59 = vmul.f32 1.442695, %v1535_v5  ;;  %4269 = vpow2.f32 %v1555_v6 }
 0x5b7   : > { %1579 = vadd.xlane.f32.xlu1 %v5387_v51  ;;  %v1510_v36 = vpop.xlane.xlu0 %1509 }
 0x5b8   : > { %v1533_v56 = vsub.f32 %v5352_v27, %v1510_v36  ;;  %4271 = vpow2.f32 %v1561_v59  ;;  %v1534_v27 = vsub.f32 %v5349_v50, %v1512_v41 }
 0x5b9   : > { %v5405_v49 = vpop.permute.xlu1 %1918 }
 0x5ba   : > { %v1557_v47 = vmul.f32 1.442695, %v1533_v56  ;;  %v5403_v52 = vpop.eup %4263  ;;  %v1559_v48 = vmul.f32 1.442695, %v1534_v27  ;;  %v1953_v27 = vsel %vm832_vm0, %v5307_v26, 0 }
 0x5bb   : > { %v1522_v40 = vpop.xlane.xlu0 %1521 }
 0x5bc   : > { %v1539_v11 = vsub.f32 %v5356_v28, %v1522_v40 }
 0x5be   : > { %v1569_v22 = vmul.f32 1.442695, %v1539_v11  ;;  %v5409_v38 = vpop.eup %4265 }
 0x5bf   : > { %v1518_v62 = vpop.xlane.xlu0 %1517 }
 0x5c0   : > { %v1537_v8 = vsub.f32 %v5359_v24, %v1518_v62  ;;  %4273 = vpow2.f32 %v1569_v22  ;;  %v5411_v24 = vpop.eup %4267 }
 0x5c1   : > { %4275 = vpow2.f32 %v1557_v47  ;;  %v5416_v36 = vpop.eup %4269 }
 0x5c2   : > { %v1565_v28 = vmul.f32 1.442695, %v1537_v8  ;;  %v5418_v50 = vpop.eup %4271 }
 0x5c3   : > { %v1917_v5 = vpop.permute.xlu0 %1916 }
 0x5c4   : > { %4277 = vpow2.f32 %v1565_v28 }
 0x5c5   : > { %4279 = vpow2.f32 %v1563_v23 }
 0x5c8   : > { %1920 = vrot.lane.b32.xlu0 %v5022_v19, %s4649_s11  ;;  %1922 = vrot.lane.b32.xlu1 %v5046_v44, %s4649_s11 }
 0x5ca   : > { %v5423_v15 = vpop.eup %4273 }
 0x5cb   : > { %v5425_v14 = vpop.eup %4275 }
 0x5ce   : > { %v5429_v40 = vpop.eup %4277 }
 0x5cf   : > { %v5431_v39 = vpop.eup %4279 }
 0x5e7   : > { %1585 = vadd.xlane.f32.xlu0 %v5403_v52 }
 0x5ea   : > { %v1524_v21 = vpop.xlane.xlu1 %1523 }
 0x5eb   : > { %v1540_v7 = vsub.f32 %v5366_v30, %v1524_v21  ;;  %1581 = vadd.xlane.f32.xlu0 %v5409_v38 }
 0x5ec   : > { %1583 = vadd.xlane.f32.xlu1 %v5411_v24 }
 0x5ed   : > { %v1571_v63 = vmul.f32 1.442695, %v1540_v7 }
 0x5ee   : > { %v1520_v16 = vpop.xlane.xlu1 %1519 }
 0x5ef   : > { %4281 = vpow2.f32 %v1571_v63  ;;  %v1538_v37 = vsub.f32 %v5369_v54, %v1520_v16  ;;  %1587 = vadd.xlane.f32.xlu0 %v5416_v36 }
 0x5f0   : > { %1593 = vadd.xlane.f32.xlu1 %v5418_v50  ;;  %4283 = vpow2.f32 %v1559_v48 }
 0x5f1   : > { %v1567_v30 = vmul.f32 1.442695, %v1538_v37 }
 0x5f3   : > { %1601 = vadd.xlane.f32.xlu0 %v5423_v15  ;;  %4285 = vpow2.f32 %v1567_v30 }
 0x5f4   : > { %1589 = vadd.xlane.f32.xlu1 %v5425_v14 }
 0x5f7   : > { %1597 = vadd.xlane.f32.xlu0 %v5429_v40 }
 0x5f8   : > { %1595 = vadd.xlane.f32.xlu1 %v5431_v39 }
 0x5f9   : > { %v5435_v54 = vpop.eup %4281 }
 0x5fa   : > { %v5437_v2 = vpop.eup %4283 }
 0x5fb   : > { %1603 = vadd.xlane.f32.xlu0 %v5435_v54 }
 0x5fc   : > { %1591 = vadd.xlane.f32.xlu1 %v5437_v2 }
 0x5fd   : > { %v5441_v3 = vpop.eup %4285 }
 0x600   : > { %1599 = vadd.xlane.f32.xlu1 %v5441_v3 }
 0x611   : > { %1926 = vrot.lane.b32.xlu1 %v5076_v10, %s4649_s11  ;;  %1924 = vrot.lane.b32.xlu0 %v5064_v61, %s4649_s11 }
 0x615   : > { %1890 = vrot.lane.b32.xlu1 %v4950_v12, %s4649_s11  ;;  %1888 = vrot.lane.b32.xlu0 %v4934_v0, %s4649_s11 }
 0x619   : > { %1894 = vrot.lane.b32.xlu1 %v4993_v53, %s4649_s11  ;;  %1892 = vrot.lane.b32.xlu0 %v4970_v32, %s4649_s11 }
 0x61d   : > { %1898 = vrot.lane.b32.xlu1 %v5041_v42, %s4649_s11  ;;  %1896 = vrot.lane.b32.xlu0 %v5017_v17, %s4649_s11 }
 0x621   : > { %1902 = vrot.lane.b32.xlu1 %v5074_v9, %s4649_s11  ;;  %1900 = vrot.lane.b32.xlu0 %v5061_v60, %s4649_s11 }
 0x625   : > { %2235 = vrot.lane.b32.xlu1 %v4972_v33, %s4649_s11  ;;  %2233 = vrot.lane.b32.xlu0 %v4976_v35, %s4649_s11 }
 0x629   : > { %2239 = vrot.lane.b32.xlu1 %v4995_v55, %s4649_s11  ;;  %2237 = vrot.lane.b32.xlu0 %v5000_v58, %s4649_s11 }
 0x62d   : > { %2243 = vrot.lane.b32.xlu1 %v5019_v18, %s4649_s11  ;;  %2241 = vrot.lane.b32.xlu0 %v5024_v20, %s4649_s11 }
 0x631   : > { %2247 = vrot.lane.b32.xlu1 %v5043_v43, %s4649_s11  ;;  %2245 = vrot.lane.b32.xlu0 %v5048_v45, %s4649_s11 }
 0x635   : > { %2494 = vrot.lane.b32.xlu1 %v4952_v13, %s4650_s7  ;;  %2492 = vrot.lane.b32.xlu0 %v4936_v1, %s4650_s7 }
 0x63c   : > { %v1578_v6 = vpop.xlane.xlu1 %1577 }
 0x63f   : > { %v1576_v41 = vpop.xlane.xlu0 %1575 }
 0x640   : > { %4287 = vrcp.f32 %v1576_v41  ;;  %v1574_v11 = vpop.xlane.xlu1 %1573 }
 0x641   : > { %4289 = vrcp.f32 %v1574_v11 }
 0x642   : > { %4291 = vrcp.f32 %v1578_v6 }
 0x643   : > { %v1921_v26 = vpop.permute.xlu0 %1920 }
 0x644   : > { %v1580_v59 = vpop.xlane.xlu1 %1579 }
 0x645   : > { %4293 = vrcp.f32 %v1580_v59 }
 0x64a   : > { %v4288_v56 = vpop.eup %4287 }
 0x64b   : > { %v4290_v62 = vpop.eup %4289  ;;  %v1622_v22 = vmul.f32 %v4288_v56, %v5381_v46  ;;  %v1956_v46 = vsel %vm832_vm0, %v5372_v29, 0 }
 0x64c   : > { %v1621_v8 = vmul.f32 %v4290_v62, %v5383_v25  ;;  %v4292_v31 = vpop.eup %4291  ;;  %v1962_v25 = vsel %vm832_vm0, %v5405_v49, 0 }
 0x64d   : > { %v1623_v1 = vmul.f32 %v4292_v31, %v5378_v4  ;;  %v1959_v4 = vsel %vm832_vm0, %v1917_v5, 0 }
 0x64e   : > { %v1637_v13 = vpack.c.bf16 %v1622_v22, %v1621_v8 }
 0x64f   : > { %v4294_v47 = vpop.eup %4293 }
 0x650   : > { %v1624_v28 = vmul.f32 %v4294_v47, %v5387_v51  ;;  %3838 = vmatprep.mubr.bf16.mxu0 %v1637_v13  ;;  %v1965_v51 = vsel %vm832_vm0, %v1921_v26, 0 }
 0x652   : > { %v1638_v23 = vpack.c.bf16 %v1624_v28, %v1623_v1 }
 0x654   : > { %3839 = vmatmul.mubr.bf16.vlgmr.msra.gmra.mrb[48].mxu0 %v1638_v23 }
 0x655   : > { %3855 = vmatpush3.bf16.xpose.msra.mxu0 %v1953_v27 }
 0x656   : > { %4047 = vmatprep.subr.msk.bf16.mxu0 %vm832_vm0, %v5372_v29  ;;  %v1923_v29 = vpop.permute.xlu1 %1922 }
 0x657   : > { %v1968_v63 = vsel %vm832_vm0, %v1923_v29, 0 }
 0x65d   : > { %3857 = vmatpush3.bf16.xpose.msra.mxu0 %v1956_v46 }
 0x65e   : > { %4048 = vmatprep.subr.msk.bf16.mxu0 %vm832_vm0, %v1917_v5 }
 0x665   : > { %3859 = vmatpush3.bf16.xpose.msra.mxu0 %v1959_v4 }
 0x666   : > { %4049 = vmatprep.subr.msk.bf16.mxu0 %vm832_vm0, %v5405_v49 }
 0x66d   : > { %3861 = vmatpush3.bf16.xpose.msra.mxu0 %v1962_v25 }
 0x66e   : > { %4050 = vmatprep.subr.msk.bf16.mxu0 %vm832_vm0, %v1921_v26 }
 0x674   : > { %v1586_v21 = vpop.xlane.xlu0 %1585 }
 0x675   : > { %3863 = vmatpush3.bf16.xpose.msra.mxu0 %v1965_v51 }
 0x676   : > { %4051 = vmatprep.subr.msk.bf16.mxu0 %vm832_vm0, %v1923_v29 }
 0x678   : > { %v1582_v7 = vpop.xlane.xlu0 %1581 }
 0x679   : > { %4295 = vrcp.f32 %v1582_v7  ;;  %v1584_v48 = vpop.xlane.xlu1 %1583 }
 0x67a   : > { %4297 = vrcp.f32 %v1584_v48 }
 0x67b   : > { %4299 = vrcp.f32 %v1586_v21 }
 0x67c   : > { %v1588_v16 = vpop.xlane.xlu0 %1587 }
 0x67d   : > { %3865 = vmatpush3.bf16.xpose.msra.mxu0 %v1968_v63  ;;  %4301 = vrcp.f32 %v1588_v16  ;;  %v1594_v49 = vpop.xlane.xlu1 %1593 }
 0x680   : > { %v1602_v37 = vpop.xlane.xlu0 %1601 }
 0x681   : > { %v1590_v30 = vpop.xlane.xlu1 %1589 }
 0x683   : > { %v4296_v5 = vpop.eup %4295 }
 0x684   : > { %v4298_v6 = vpop.eup %4297  ;;  %v1598_v41 = vpop.xlane.xlu0 %1597  ;;  %v1625_v11 = vmul.f32 %v4296_v5, %v5409_v38 }
 0x685   : > { %v4300_v59 = vpop.eup %4299  ;;  %v1596_v56 = vpop.xlane.xlu1 %1595  ;;  %v1626_v62 = vmul.f32 %v4298_v6, %v5411_v24 }
 0x686   : > { %4303 = vrcp.f32 %v1596_v56  ;;  %v1627_v13 = vmul.f32 %v4300_v59, %v5403_v52 }
 0x687   : > { %v4302_v22 = vpop.eup %4301  ;;  %v1639_v8 = vpack.c.bf16 %v1626_v62, %v1625_v11  ;;  %4305 = vrcp.f32 %v1590_v30 }
 0x688   : > { %v1604_v31 = vpop.xlane.xlu0 %1603  ;;  %v1628_v47 = vmul.f32 %v4302_v22, %v5416_v36  ;;  %4307 = vrcp.f32 %v1594_v49 }
 0x689   : > { %v1592_v1 = vpop.xlane.xlu1 %1591  ;;  %3842 = vmatprep.mubr.bf16.mxu0 %v1639_v8 }
 0x68a   : > { %4309 = vrcp.f32 %v1592_v1  ;;  %v1640_v28 = vpack.c.bf16 %v1628_v47, %v1627_v13 }
 0x68b   : > { %4311 = vrcp.f32 %v1598_v41 }
 0x68c   : > { %3843 = vmatmul.mubr.bf16.gmra.mrb[52].mxu0 %v1640_v28  ;;  %v1925_v38 = vpop.permute.xlu0 %1924 }
 0x68d   : > { %v1600_v23 = vpop.xlane.xlu1 %1599  ;;  %4052 = vmatprep.subr.msk.bf16.mxu0 %vm832_vm0, %v1925_v38  ;;  %v1971_v24 = vsel %vm832_vm0, %v1925_v38, 0 }
 0x68e   : > { %4313 = vrcp.f32 %v1600_v23  ;;  %3867 = vmatpush3.bf16.xpose.msra.mxu0 %v1971_v24 }
 0x68f   : > { %4315 = vrcp.f32 %v1604_v31 }
 0x690   : > { %v1889_v27 = vpop.permute.xlu0 %1888  ;;  %v4304_v52 = vpop.eup %4303  ;;  %4317 = vrcp.f32 %v1602_v37 }
 0x691   : > { %v1927_v36 = vpop.permute.xlu1 %1926  ;;  %v4306_v46 = vpop.eup %4305  ;;  %v1632_v51 = vmul.f32 %v4304_v52, %v5431_v39 }
 0x692   : > { %4053 = vmatprep.subr.msk.bf16.mxu0 %vm832_vm0, %v1927_v36  ;;  %v4308_v4 = vpop.eup %4307  ;;  %v1974_v29 = vsel %vm832_vm0, %v1927_v36, 0  ;;  %v1629_v7 = vmul.f32 %v4306_v46, %v5425_v14 }
 0x693   : > { %v1631_v16 = vmul.f32 %v4308_v4, %v5418_v50 }
 0x694   : > { %v4310_v25 = vpop.eup %4309  ;;  %v1893_v26 = vpop.permute.xlu0 %1892 }
 0x695   : > { %v1891_v21 = vpop.permute.xlu1 %1890  ;;  %v1630_v48 = vmul.f32 %v4310_v25, %v5437_v2  ;;  %v4312_v63 = vpop.eup %4311  ;;  %v1642_v5 = vpack.c.bf16 %v1632_v51, %v1631_v16 }
 0x696   : > { %3869 = vmatpush3.bf16.xpose.msra.mxu0 %v1974_v29  ;;  %v1633_v39 = vmul.f32 %v4312_v63, %v5429_v40  ;;  %v3526_v63 = vld [vmem:[#allocation9 + $0xb8] sm:$0xff]  }
 0x697   : > { %v1641_v49 = vpack.c.bf16 %v1630_v48, %v1629_v7 }
 0x698   : > { %v4314_v37 = vpop.eup %4313  ;;  %v1897_v30 = vpop.permute.xlu0 %1896 }
 0x699   : > { %v4316_v6 = vpop.eup %4315  ;;  %v1895_v41 = vpop.permute.xlu1 %1894  ;;  %3846 = vmatprep.mubr.bf16.mxu0 %v1641_v49  ;;  %v1634_v11 = vmul.f32 %v4314_v37, %v5441_v3 }
 0x69a   : > { %3847 = vmatmul.mubr.bf16.gmra.mrb[56].mxu0 %v1642_v5  ;;  %v4318_v59 = vpop.eup %4317  ;;  %v1636_v2 = vmul.f32 %v4316_v6, %v5435_v54  ;;  %v3520_v6 = vld [vmem:[#allocation9 + $0x88] sm:$0xff]  }
 0x69b   : > { %v1643_v14 = vpack.c.bf16 %v1634_v11, %v1633_v39  ;;  %v1635_v50 = vmul.f32 %v4318_v59, %v5423_v15  ;;  %v3448_v59 = vunpack.c.l.bf16 %v3520_v6 }
 0x69c   : > { %v1901_v56 = vpop.permute.xlu0 %1900 }
 0x69d   : > { %v1899_v62 = vpop.permute.xlu1 %1898  ;;  %3850 = vmatprep.mubr.bf16.mxu0 %v1643_v14  ;;  %v1644_v8 = vpack.c.bf16 %v1636_v2, %v1635_v50  ;;  %v3443_v14 = vld [vmem:[#allocation9 + $0x80] sm:$0xff]  }
 0x69e   : > { %v3445_v2 = vunpack.c.h.bf16 %v3443_v14  ;;  %v3444_v50 = vunpack.c.l.bf16 %v3443_v14 }
 0x6a0   : > { %v2234_v22 = vpop.permute.xlu0 %2233 }
 0x6a1   : > { %v1903_v31 = vpop.permute.xlu1 %1902  ;;  %3886 = vmatprep.subr.bf16.mxu1 %v2234_v22 }
 0x6a2   : > { %3851 = vmatmul.mubr.bf16.gmra.mrb[60].mxu0 %v1644_v8  ;;  %3887 = vmatpush3.bf16.msra.mxu1 %v2234_v22 }
 0x6a3   : > { %3870 = vmatprep.mubr.msk.bf16.mxu0 %vm832_vm0, %v1889_v27  ;;  %v3472_v27 = vunpack.c.l.bf16 %v3526_v63 }
 0x6a4   : > { %v2238_v3 = vpop.permute.xlu0 %2237 }
 0x6a5   : > { %v2236_v40 = vpop.permute.xlu1 %2235 }
 0x6a6   : > { %3888 = vmatprep.subr.bf16.mxu1 %v2236_v40 }
 0x6a7   : > { %3889 = vmatpush3.bf16.msra.mxu1 %v2236_v40 }
 0x6a8   : > { %3890 = vmatprep.subr.bf16.mxu1 %v2238_v3  ;;  %v2242_v15 = vpop.permute.xlu0 %2241 }
 0x6a9   : > { %v2240_v54 = vpop.permute.xlu1 %2239 }
 0x6aa   : > { %3871 = vmatmul.mubr.msk.bf16.vlgmr.msra.gmra.mrb[64].mxu0 %vm832_vm0, %v1891_v21 }
 0x6ab   : > { %3874 = vmatprep.mubr.msk.bf16.mxu0 %vm832_vm0, %v1893_v26  ;;  %3891 = vmatpush3.bf16.msra.mxu1 %v2238_v3 }
 0x6ac   : > { %3892 = vmatprep.subr.bf16.mxu1 %v2240_v54  ;;  %v2246_v47 = vpop.permute.xlu0 %2245 }
 0x6ad   : > { %v2244_v13 = vpop.permute.xlu1 %2243 }
 0x6af   : > { %3893 = vmatpush3.bf16.msra.mxu1 %v2240_v54  ;;  %v3449_v54 = vunpack.c.h.bf16 %v3520_v6 }
 0x6b0   : > { %3894 = vmatprep.subr.bf16.mxu1 %v2242_v15  ;;  %v5527_v28 = vpop.permute.xlu0 %2492 }
 0x6b1   : > { %v2248_v1 = vpop.permute.xlu1 %2247 }
 0x6b2   : > { %3875 = vmatmul.mubr.msk.bf16.gmra.mrb[68].mxu0 %vm832_vm0, %v1895_v41  ;;  %v3523_v41 = vld [vmem:[#allocation9 + $0xa0] sm:$0xff]  }
 0x6b3   : > { %3878 = vmatprep.mubr.msk.bf16.mxu0 %vm832_vm0, %v1897_v30  ;;  %3895 = vmatpush3.bf16.msra.mxu1 %v2242_v15  ;;  %v3522_v15 = vld [vmem:[#allocation9 + $0x98] sm:$0xff]  }
 0x6b4   : > { %3896 = vmatprep.subr.bf16.mxu1 %v2244_v13 }
 0x6b7   : > { %3897 = vmatpush3.bf16.msra.mxu1 %v2244_v13  ;;  %v3457_v13 = vunpack.c.h.bf16 %v3522_v15 }
 0x6b8   : > { %3898 = vmatprep.subr.bf16.mxu1 %v2246_v47 }
 0x6ba   : > { %3879 = vmatmul.mubr.msk.bf16.gmra.mrb[72].mxu0 %vm832_vm0, %v1899_v62 }
 0x6bb   : > { %3882 = vmatprep.mubr.msk.bf16.mxu0 %vm832_vm0, %v1901_v56  ;;  %3899 = vmatpush3.bf16.msra.mxu1 %v2246_v47 }
 0x6bc   : > { %3900 = vmatprep.subr.bf16.mxu1 %v2248_v1 }
 0x6bf   : > { %3901 = vmatpush3.bf16.msra.mxu1 %v2248_v1 }
 0x6c0   : > { %4054 = vmatprep.subr.msk.bf16.mxu1 %vm832_vm0, %v5527_v28 }
 0x6c2   : > { %3883 = vmatmul.mubr.msk.bf16.gmra.mrb[76].mxu0 %vm832_vm0, %v1903_v31 }
 0x727   : > { %v5532_v38 = vpop.f32.mrb[48].mxu0 }
 0x728   : > { %v5534_v23 = vpop.f32.mrb[49].mxu0 }
 0x729   : > { %6165 = vst [vmem:[#allocation17_spill] sm:$0xff] %v5534_v23  ;;  %v5536_v24 = vpop.f32.mrb[50].mxu0 }
 0x72a   : > { %v5540_v52 = vpop.f32.mrb[51].mxu0 }
 0x72b   : > { %6166 = vst [vmem:[#allocation18_spill] sm:$0xff] %v5540_v52 }
 0x75f   : > { %v5544_v46 = vpop.f32.mrb[52].mxu0 }
 0x760   : > { %6167 = vst [vmem:[#allocation19_spill] sm:$0xff] %v5544_v46  ;;  %v5546_v4 = vpop.f32.mrb[53].mxu0 }
 0x761   : > { %6168 = vst [vmem:[#allocation20_spill] sm:$0xff] %v5546_v4  ;;  %v5548_v25 = vpop.f32.mrb[54].mxu0 }
 0x762   : > { %6169 = vst [vmem:[#allocation21_spill] sm:$0xff] %v5548_v25  ;;  %v5552_v51 = vpop.f32.mrb[55].mxu0 }
 0x763   : > { %6170 = vst [vmem:[#allocation22_spill] sm:$0xff] %v5552_v51 }
 0x76d   : > { %v5556_v29 = vpop.f32.mrb[56].mxu0 }
 0x76e   : > { %v5558_v7 = vpop.f32.mrb[57].mxu0 }
 0x76f   : > { %v5560_v48 = vpop.f32.mrb[58].mxu0 }
 0x770   : > { %v5564_v16 = vpop.f32.mrb[59].mxu0 }
 0x775   : > { %v5568_v37 = vpop.f32.mrb[60].mxu0 }
 0x776   : > { %v5570_v30 = vpop.f32.mrb[61].mxu0 }
 0x777   : > { %v5572_v5 = vpop.f32.mrb[62].mxu0 }
 0x778   : > { %v5576_v39 = vpop.f32.mrb[63].mxu0 }
 0x77d   : > { %v3872_v56 = vpop.f32.mrb[64].mxu0 }
 0x77e   : > { %v5580_v62 = vadd.f32 %v3872_v56, %v3448_v59  ;;  %v2010_v22 = vpop.f32.mrb[65].mxu0  ;;  %v3456_v59 = vunpack.c.l.bf16 %v3522_v15  ;;  %v3521_v56 = vld [vmem:[#allocation9 + $0x90] sm:$0xff]  }
 0x77f   : > { %v3873_v8 = vpop.f32.mrb[66].mxu0  ;;  %v5585_v3 = vadd.f32 %v3444_v50, %v2010_v22  ;;  %v3452_v22 = vunpack.c.l.bf16 %v3521_v56 }
 0x780   : > { %2077 = vmax.xlane.f32.xlu0 %v5580_v62  ;;  %v2013_v31 = vpop.f32.mrb[67].mxu0  ;;  %v5589_v1 = vadd.f32 %v3873_v8, %v3449_v54 }
 0x781   : > { %v5583_v40 = vadd.f32 %v3445_v2, %v2013_v31  ;;  %v3453_v2 = vunpack.c.h.bf16 %v3521_v56  ;;  %v3524_v31 = vld [vmem:[#allocation9 + $0xa8] sm:$0xff]  }
 0x782   : > { %v3465_v8 = vunpack.c.h.bf16 %v3524_v31 }
 0x783   : > { %2075 = vmax.xlane.f32.xlu1 %v5583_v40 }
 0x784   : > { %2073 = vmax.xlane.f32.xlu0 %v5585_v3 }
 0x785   : > { %v3876_v47 = vpop.f32.mrb[68].mxu0 }
 0x786   : > { %v2026_v14 = vpop.f32.mrb[69].mxu0  ;;  %v5594_v6 = vadd.f32 %v3876_v47, %v3456_v59  ;;  %v3461_v59 = vunpack.c.h.bf16 %v3523_v41 }
 0x787   : > { %v3877_v26 = vpop.f32.mrb[70].mxu0  ;;  %v5600_v15 = vadd.f32 %v3452_v22, %v2026_v14 }
 0x788   : > { %v5591_v21 = vadd.f32 %v3877_v26, %v3457_v13  ;;  %2079 = vmax.xlane.f32.xlu0 %v5589_v1  ;;  %v2029_v50 = vpop.f32.mrb[71].mxu0  ;;  %v3464_v26 = vunpack.c.l.bf16 %v3524_v31 }
 0x789   : > { %v5597_v36 = vadd.f32 %v3453_v2, %v2029_v50  ;;  %v3460_v50 = vunpack.c.l.bf16 %v3523_v41 }
 0x78a   : > { %2087 = vmax.xlane.f32.xlu1 %v5591_v21 }
 0x78c   : > { %2085 = vmax.xlane.f32.xlu0 %v5594_v6 }
 0x78d   : > { %v3880_v54 = vpop.f32.mrb[72].mxu0 }
 0x78e   : > { %2083 = vmax.xlane.f32.xlu1 %v5597_v36  ;;  %v2042_v13 = vpop.f32.mrb[73].mxu0  ;;  %v5606_v2 = vadd.f32 %v3880_v54, %v3464_v26 }
 0x78f   : > { %v3881_v11 = vpop.f32.mrb[74].mxu0  ;;  %v5612_v31 = vadd.f32 %v3460_v50, %v2042_v13  ;;  %v3473_v13 = vunpack.c.h.bf16 %v3526_v63 }
 0x790   : > { %v5603_v47 = vadd.f32 %v3881_v11, %v3465_v8  ;;  %2081 = vmax.xlane.f32.xlu0 %v5600_v15  ;;  %v2045_v56 = vpop.f32.mrb[75].mxu0  ;;  %v3525_v8 = vld [vmem:[#allocation9 + $0xb0] sm:$0xff]  }
 0x791   : > { %v5609_v14 = vadd.f32 %v3461_v59, %v2045_v56  ;;  %v3468_v26 = vunpack.c.l.bf16 %v3525_v8  ;;  %v3469_v50 = vunpack.c.h.bf16 %v3525_v8 }
 0x792   : > { %2095 = vmax.xlane.f32.xlu1 %v5603_v47 }
 0x794   : > { %2093 = vmax.xlane.f32.xlu0 %v5606_v2 }
 0x795   : > { %v3884_v22 = vpop.f32.mrb[76].mxu0 }
 0x796   : > { %2091 = vmax.xlane.f32.xlu1 %v5609_v14  ;;  %v2058_v11 = vpop.f32.mrb[77].mxu0  ;;  %v5616_v41 = vadd.f32 %v3884_v22, %v3472_v27  ;;  %v5632_v22 = vpop.permute.xlu1 %2494 }
 0x797   : > { %v3885_v49 = vpop.f32.mrb[78].mxu0  ;;  %v5619_v59 = vadd.f32 %v3468_v26, %v2058_v11 }
 0x798   : > { %2089 = vmax.xlane.f32.xlu0 %v5612_v31  ;;  %v2061_v54 = vpop.f32.mrb[79].mxu0  ;;  %v5626_v56 = vadd.f32 %v3885_v49, %v3473_v13 }
 0x799   : > { %v5629_v27 = vadd.f32 %v3469_v50, %v2061_v54 }
 0x79c   : > { %2101 = vmax.xlane.f32.xlu0 %v5616_v41 }
 0x7a0   : > { %2097 = vmax.xlane.f32.xlu0 %v5619_v59 }
 0x7a7   : > { %2498 = vrot.lane.b32.xlu1 %v4998_v57, %s4650_s7 }
 0x7b6   : > { %2496 = vrot.lane.b32.xlu0 %v4974_v34, %s4650_s7 }
 0x7cb   : > { %2103 = vmax.xlane.f32.xlu1 %v5626_v56 }
 0x7cf   : > { %2099 = vmax.xlane.f32.xlu1 %v5629_v27 }
 0x80d   : > { %v2078_v11 = vpop.xlane.xlu0 %2077 }
 0x80e   : > { %v2107_v26 = vsub.f32 %v5580_v62, %v2078_v11 }
 0x810   : > { %v2125_v46 = vmul.f32 1.442695, %v2107_v26  ;;  %v2076_v57 = vpop.xlane.xlu1 %2075 }
 0x811   : > { %v2106_v25 = vsub.f32 %v5583_v40, %v2076_v57  ;;  %v2074_v34 = vpop.xlane.xlu0 %2073 }
 0x812   : > { %4319 = vpow2.f32 %v2125_v46  ;;  %v2105_v63 = vsub.f32 %v5585_v3, %v2074_v34 }
 0x813   : > { %v2123_v49 = vmul.f32 1.442695, %v2106_v25 }
 0x814   : > { %v2121_v8 = vmul.f32 1.442695, %v2105_v63 }
 0x815   : > { %4321 = vpow2.f32 %v2123_v49  ;;  %v2080_v54 = vpop.xlane.xlu0 %2079 }
 0x816   : > { %4323 = vpow2.f32 %v2121_v8  ;;  %v2108_v13 = vsub.f32 %v5589_v1, %v2080_v54 }
 0x817   : > { %v2088_v1 = vpop.xlane.xlu1 %2087 }
 0x818   : > { %v2127_v50 = vmul.f32 1.442695, %v2108_v13 }
 0x819   : > { %v2086_v25 = vpop.xlane.xlu0 %2085 }
 0x81a   : > { %4325 = vpow2.f32 %v2127_v50  ;;  %v2111_v26 = vsub.f32 %v5594_v6, %v2086_v25  ;;  %v2112_v50 = vsub.f32 %v5591_v21, %v2088_v1 }
 0x81b   : > { %v2084_v57 = vpop.xlane.xlu1 %2083 }
 0x81c   : > { %v5638_v4 = vpop.eup %4319  ;;  %v2133_v63 = vmul.f32 1.442695, %v2111_v26  ;;  %v2110_v8 = vsub.f32 %v5597_v36, %v2084_v57  ;;  %v2135_v23 = vmul.f32 1.442695, %v2112_v50 }
 0x81d   : > { %2157 = vadd.xlane.f32.xlu1 %v5638_v4  ;;  %v2082_v3 = vpop.xlane.xlu0 %2081 }
 0x81e   : > { %v2109_v49 = vsub.f32 %v5600_v15, %v2082_v3  ;;  %4327 = vpow2.f32 %v2133_v63  ;;  %v2131_v51 = vmul.f32 1.442695, %v2110_v8 }
 0x81f   : > { %v5641_v62 = vpop.eup %4321  ;;  %v2096_v54 = vpop.xlane.xlu1 %2095 }
 0x820   : > { %v5643_v40 = vpop.eup %4323  ;;  %2155 = vadd.xlane.f32.xlu0 %v5641_v62  ;;  %v2116_v21 = vsub.f32 %v5603_v47, %v2096_v54 }
 0x821   : > { %2153 = vadd.xlane.f32.xlu1 %v5643_v40  ;;  %v2094_v11 = vpop.xlane.xlu0 %2093 }
 0x823   : > { %v2092_v52 = vpop.xlane.xlu1 %2091 }
 0x824   : > { %v5647_v46 = vpop.eup %4325 }
 0x825   : > { %2159 = vadd.xlane.f32.xlu1 %v5647_v46  ;;  %v2090_v34 = vpop.xlane.xlu0 %2089 }
 0x826   : > { %v2113_v15 = vsub.f32 %v5612_v31, %v2090_v34  ;;  %v2114_v31 = vsub.f32 %v5609_v14, %v2092_v52 }
 0x828   : > { %v2137_v1 = vmul.f32 1.442695, %v2113_v15  ;;  %v5663_v57 = vpop.eup %4327  ;;  %v2139_v34 = vmul.f32 1.442695, %v2114_v31 }
 0x829   : > { %v2102_v13 = vpop.xlane.xlu0 %2101 }
 0x82a   : > { %v2119_v6 = vsub.f32 %v5616_v41, %v2102_v13  ;;  %v2143_v41 = vmul.f32 1.442695, %v2116_v21 }
 0x82c   : > { %v2149_v36 = vmul.f32 1.442695, %v2119_v6 }
 0x82d   : > { %v2098_v3 = vpop.xlane.xlu0 %2097 }
 0x82e   : > { %v2117_v26 = vsub.f32 %v5619_v59, %v2098_v3  ;;  %v2533_v3 = vsel %vm832_vm0, %v5527_v28, 0 }
 0x836   : > { %2500 = vrot.lane.b32.xlu0 %v5022_v19, %s4650_s7  ;;  %2502 = vrot.lane.b32.xlu1 %v5046_v44, %s4650_s7  ;;  %v2129_v19 = vmul.f32 1.442695, %v2109_v49  ;;  %v2115_v44 = vsub.f32 %v5606_v2, %v2094_v11  ;;  %v5665_v2 = vpop.permute.xlu1 %2498 }
 0x838   : > { %4329 = vpow2.f32 %v2129_v19  ;;  %v2141_v25 = vmul.f32 1.442695, %v2115_v44 }
 0x839   : > { %4331 = vpow2.f32 %v2131_v51  ;;  %v2145_v51 = vmul.f32 1.442695, %v2117_v26 }
 0x83a   : > { %4333 = vpow2.f32 %v2135_v23 }
 0x83b   : > { %4335 = vpow2.f32 %v2141_v25 }
 0x83c   : > { %4337 = vpow2.f32 %v2149_v36 }
 0x83d   : > { %4339 = vpow2.f32 %v2137_v1 }
 0x83e   : > { %4341 = vpow2.f32 %v2145_v51 }
 0x83f   : > { %4343 = vpow2.f32 %v2143_v41 }
 0x842   : > { %v5669_v23 = vpop.eup %4329 }
 0x843   : > { %v5671_v59 = vpop.eup %4331 }
 0x844   : > { %v5676_v49 = vpop.eup %4333 }
 0x845   : > { %v5678_v52 = vpop.eup %4335 }
 0x846   : > { %v5683_v54 = vpop.eup %4337 }
 0x847   : > { %v5685_v13 = vpop.eup %4339 }
 0x848   : > { %v5689_v50 = vpop.eup %4341 }
 0x849   : > { %v5691_v19 = vpop.eup %4343 }
 0x855   : > { %2165 = vadd.xlane.f32.xlu0 %v5663_v57 }
 0x858   : > { %v2104_v11 = vpop.xlane.xlu1 %2103 }
 0x859   : > { %v2120_v47 = vsub.f32 %v5626_v56, %v2104_v11  ;;  %2161 = vadd.xlane.f32.xlu0 %v5669_v23 }
 0x85a   : > { %2163 = vadd.xlane.f32.xlu1 %v5671_v59 }
 0x85b   : > { %v2151_v63 = vmul.f32 1.442695, %v2120_v47 }
 0x85c   : > { %v2100_v8 = vpop.xlane.xlu1 %2099 }
 0x85d   : > { %4345 = vpow2.f32 %v2151_v63  ;;  %v2118_v14 = vsub.f32 %v5629_v27, %v2100_v8  ;;  %2167 = vadd.xlane.f32.xlu0 %v5676_v49 }
 0x85e   : > { %2173 = vadd.xlane.f32.xlu1 %v5678_v52  ;;  %4347 = vpow2.f32 %v2139_v34 }
 0x85f   : > { %v2147_v56 = vmul.f32 1.442695, %v2118_v14 }
 0x861   : > { %2181 = vadd.xlane.f32.xlu0 %v5683_v54  ;;  %4349 = vpow2.f32 %v2147_v56 }
 0x862   : > { %2169 = vadd.xlane.f32.xlu1 %v5685_v13 }
 0x865   : > { %2177 = vadd.xlane.f32.xlu0 %v5689_v50 }
 0x866   : > { %2175 = vadd.xlane.f32.xlu1 %v5691_v19 }
 0x867   : > { %v5695_v27 = vpop.eup %4345 }
 0x868   : > { %v5697_v44 = vpop.eup %4347 }
 0x869   : > { %2183 = vadd.xlane.f32.xlu0 %v5695_v27 }
 0x86a   : > { %2171 = vadd.xlane.f32.xlu1 %v5697_v44 }
 0x86b   : > { %v5701_v6 = vpop.eup %4349 }
 0x86e   : > { %2179 = vadd.xlane.f32.xlu1 %v5701_v6 }
 0x87f   : > { %2506 = vrot.lane.b32.xlu1 %v5076_v10, %s4650_s7  ;;  %2504 = vrot.lane.b32.xlu0 %v5064_v61, %s4650_s7 }
 0x883   : > { %2470 = vrot.lane.b32.xlu1 %v4950_v12, %s4650_s7  ;;  %2468 = vrot.lane.b32.xlu0 %v4934_v0, %s4650_s7  ;;  %v2497_v0 = vpop.permute.xlu0 %2496 }
 0x887   : > { %2474 = vrot.lane.b32.xlu1 %v4993_v53, %s4650_s7  ;;  %2472 = vrot.lane.b32.xlu0 %v4970_v32, %s4650_s7 }
 0x88b   : > { %2478 = vrot.lane.b32.xlu1 %v5041_v42, %s4650_s7  ;;  %2476 = vrot.lane.b32.xlu0 %v5017_v17, %s4650_s7 }
 0x88f   : > { %2482 = vrot.lane.b32.xlu1 %v5074_v9, %s4650_s7  ;;  %2480 = vrot.lane.b32.xlu0 %v5061_v60, %s4650_s7 }
 0x893   : > { %2815 = vrot.lane.b32.xlu1 %v4972_v33, %s4650_s7  ;;  %2813 = vrot.lane.b32.xlu0 %v4976_v35, %s4650_s7 }
 0x897   : > { %2817 = vrot.lane.b32.xlu0 %v5000_v58, %s4650_s7 }
 0x8aa   : > { %v2158_v12 = vpop.xlane.xlu1 %2157 }
 0x8ad   : > { %v2156_v32 = vpop.xlane.xlu0 %2155 }
 0x8ae   : > { %4351 = vrcp.f32 %v2156_v32  ;;  %v2154_v53 = vpop.xlane.xlu1 %2153 }
 0x8af   : > { %4353 = vrcp.f32 %v2154_v53 }
 0x8b0   : > { %4355 = vrcp.f32 %v2158_v12 }
 0x8b1   : > { %v2501_v28 = vpop.permute.xlu0 %2500 }
 0x8b2   : > { %v2160_v17 = vpop.xlane.xlu1 %2159 }
 0x8b3   : > { %4357 = vrcp.f32 %v2160_v17 }
 0x8b8   : > { %v4352_v42 = vpop.eup %4351 }
 0x8b9   : > { %v4354_v60 = vpop.eup %4353  ;;  %v2202_v61 = vmul.f32 %v4352_v42, %v5641_v62  ;;  %v2536_v62 = vsel %vm832_vm0, %v5632_v22, 0 }
 0x8ba   : > { %v2201_v33 = vmul.f32 %v4354_v60, %v5643_v40  ;;  %v4356_v9 = vpop.eup %4355  ;;  %v2542_v40 = vsel %vm832_vm0, %v5665_v2, 0 }
 0x8bb   : > { %v2203_v58 = vmul.f32 %v4356_v9, %v5638_v4  ;;  %v2539_v4 = vsel %vm832_vm0, %v2497_v0, 0 }
 0x8bc   : > { %v2217_v35 = vpack.c.bf16 %v2202_v61, %v2201_v33 }
 0x8bd   : > { %v4358_v10 = vpop.eup %4357 }
 0x8be   : > { %v2204_v25 = vmul.f32 %v4358_v10, %v5647_v46  ;;  %3902 = vmatprep.mubr.bf16.mxu1 %v2217_v35  ;;  %v2545_v46 = vsel %vm832_vm0, %v2501_v28, 0 }
 0x8c0   : > { %v2218_v15 = vpack.c.bf16 %v2204_v25, %v2203_v58 }
 0x8c2   : > { %3903 = vmatmul.mubr.bf16.vlgmr.msra.gmra.mrb[48].mxu1 %v2218_v15 }
 0x8c3   : > { %3919 = vmatpush3.bf16.xpose.msra.mxu1 %v2533_v3 }
 0x8c4   : > { %4055 = vmatprep.subr.msk.bf16.mxu1 %vm832_vm0, %v5632_v22  ;;  %v2503_v22 = vpop.permute.xlu1 %2502 }
 0x8c5   : > { %v2548_v1 = vsel %vm832_vm0, %v2503_v22, 0 }
 0x8cb   : > { %3921 = vmatpush3.bf16.xpose.msra.mxu1 %v2536_v62 }
 0x8cc   : > { %4056 = vmatprep.subr.msk.bf16.mxu1 %vm832_vm0, %v2497_v0 }
 0x8d3   : > { %3923 = vmatpush3.bf16.xpose.msra.mxu1 %v2539_v4 }
 0x8d4   : > { %4057 = vmatprep.subr.msk.bf16.mxu1 %vm832_vm0, %v5665_v2 }
 0x8db   : > { %3925 = vmatpush3.bf16.xpose.msra.mxu1 %v2542_v40 }
 0x8dc   : > { %4058 = vmatprep.subr.msk.bf16.mxu1 %vm832_vm0, %v2501_v28 }
 0x8e2   : > { %v2166_v36 = vpop.xlane.xlu0 %2165 }
 0x8e3   : > { %3927 = vmatpush3.bf16.xpose.msra.mxu1 %v2545_v46 }
 0x8e4   : > { %4059 = vmatprep.subr.msk.bf16.mxu1 %vm832_vm0, %v2503_v22 }
 0x8e6   : > { %v2162_v26 = vpop.xlane.xlu0 %2161 }
 0x8e7   : > { %4359 = vrcp.f32 %v2162_v26  ;;  %v2164_v21 = vpop.xlane.xlu1 %2163 }
 0x8e8   : > { %4361 = vrcp.f32 %v2164_v21 }
 0x8e9   : > { %4363 = vrcp.f32 %v2166_v36 }
 0x8ea   : > { %v2168_v51 = vpop.xlane.xlu0 %2167 }
 0x8eb   : > { %3929 = vmatpush3.bf16.xpose.msra.mxu1 %v2548_v1  ;;  %4365 = vrcp.f32 %v2168_v51  ;;  %v2174_v2 = vpop.xlane.xlu1 %2173 }
 0x8ee   : > { %v2182_v41 = vpop.xlane.xlu0 %2181 }
 0x8ef   : > { %v2170_v31 = vpop.xlane.xlu1 %2169 }
 0x8f1   : > { %v4360_v11 = vpop.eup %4359 }
 0x8f2   : > { %v4362_v47 = vpop.eup %4361  ;;  %v2178_v34 = vpop.xlane.xlu0 %2177  ;;  %v2205_v63 = vmul.f32 %v4360_v11, %v5669_v23 }
 0x8f3   : > { %v4364_v8 = vpop.eup %4363  ;;  %v2176_v14 = vpop.xlane.xlu1 %2175  ;;  %v2206_v56 = vmul.f32 %v4362_v47, %v5671_v59 }
 0x8f4   : > { %4367 = vrcp.f32 %v2176_v14  ;;  %v2207_v53 = vmul.f32 %v4364_v8, %v5663_v57 }
 0x8f5   : > { %v4366_v0 = vpop.eup %4365  ;;  %v2219_v12 = vpack.c.bf16 %v2206_v56, %v2205_v63  ;;  %4369 = vrcp.f32 %v2170_v31 }
 0x8f6   : > { %v2184_v32 = vpop.xlane.xlu0 %2183  ;;  %v2208_v17 = vmul.f32 %v4366_v0, %v5676_v49  ;;  %4371 = vrcp.f32 %v2174_v2 }
 0x8f7   : > { %v2172_v42 = vpop.xlane.xlu1 %2171  ;;  %3906 = vmatprep.mubr.bf16.mxu1 %v2219_v12 }
 0x8f8   : > { %4373 = vrcp.f32 %v2172_v42  ;;  %v2220_v60 = vpack.c.bf16 %v2208_v17, %v2207_v53 }
 0x8f9   : > { %4375 = vrcp.f32 %v2178_v34 }
 0x8fa   : > { %3907 = vmatmul.mubr.bf16.gmra.mrb[52].mxu1 %v2220_v60  ;;  %v2505_v23 = vpop.permute.xlu0 %2504 }
 0x8fb   : > { %v2551_v61 = vsel %vm832_vm0, %v2505_v23, 0  ;;  %v2180_v59 = vpop.xlane.xlu1 %2179  ;;  %4060 = vmatprep.subr.msk.bf16.mxu1 %vm832_vm0, %v2505_v23 }
 0x8fc   : > { %4377 = vrcp.f32 %v2180_v59  ;;  %3931 = vmatpush3.bf16.xpose.msra.mxu1 %v2551_v61 }
 0x8fd   : > { %4379 = vrcp.f32 %v2184_v32 }
 0x8fe   : > { %v2469_v33 = vpop.permute.xlu0 %2468  ;;  %v4368_v57 = vpop.eup %4367  ;;  %4381 = vrcp.f32 %v2182_v41 }
 0x8ff   : > { %v2507_v49 = vpop.permute.xlu1 %2506  ;;  %v4370_v9 = vpop.eup %4369  ;;  %v2212_v25 = vmul.f32 %v4368_v57, %v5691_v19 }
 0x900   : > { %4061 = vmatprep.subr.msk.bf16.mxu1 %vm832_vm0, %v2507_v49  ;;  %v4372_v35 = vpop.eup %4371  ;;  %v2554_v15 = vsel %vm832_vm0, %v2507_v49, 0  ;;  %v2209_v62 = vmul.f32 %v4370_v9, %v5685_v13 }
 0x901   : > { %v2211_v28 = vmul.f32 %v4372_v35, %v5678_v52 }
 0x902   : > { %v4374_v10 = vpop.eup %4373  ;;  %v2473_v58 = vpop.permute.xlu0 %2472 }
 0x903   : > { %v2471_v3 = vpop.permute.xlu1 %2470  ;;  %v2210_v4 = vmul.f32 %v4374_v10, %v5697_v44  ;;  %v4376_v40 = vpop.eup %4375  ;;  %v2222_v26 = vpack.c.bf16 %v2212_v25, %v2211_v28  ;;  %v3527_v10 = vld [vmem:[#allocation9 + $0xc8] sm:$0xff]  }
 0x904   : > { %3933 = vmatpush3.bf16.xpose.msra.mxu1 %v2554_v15  ;;  %v2213_v19 = vmul.f32 %v4376_v40, %v5689_v50 }
 0x905   : > { %v2221_v46 = vpack.c.bf16 %v2210_v4, %v2209_v62  ;;  %v3475_v62 = vld [vmem:[#allocation9 + $0xc0] sm:$0xff]  }
 0x906   : > { %v4378_v36 = vpop.eup %4377  ;;  %v2477_v22 = vpop.permute.xlu0 %2476  ;;  %v3477_v40 = vunpack.c.h.bf16 %v3475_v62 }
 0x907   : > { %v4380_v21 = vpop.eup %4379  ;;  %v2475_v1 = vpop.permute.xlu1 %2474  ;;  %3910 = vmatprep.mubr.bf16.mxu1 %v2221_v46  ;;  %v2214_v51 = vmul.f32 %v4378_v36, %v5701_v6  ;;  %v3476_v46 = vunpack.c.l.bf16 %v3475_v62 }
 0x908   : > { %3911 = vmatmul.mubr.bf16.gmra.mrb[56].mxu1 %v2222_v26  ;;  %v4382_v2 = vpop.eup %4381  ;;  %v2216_v44 = vmul.f32 %v4380_v21, %v5695_v27 }
 0x909   : > { %v2223_v13 = vpack.c.bf16 %v2214_v51, %v2213_v19  ;;  %v2215_v52 = vmul.f32 %v4382_v2, %v5683_v54  ;;  %v3481_v19 = vunpack.c.h.bf16 %v3527_v10  ;;  %v3529_v51 = vld [vmem:[#allocation9 + $0xd8] sm:$0xff]  }
 0x90a   : > { %v2481_v41 = vpop.permute.xlu0 %2480  ;;  %v3489_v2 = vunpack.c.h.bf16 %v3529_v51 }
 0x90b   : > { %v2479_v31 = vpop.permute.xlu1 %2478  ;;  %3914 = vmatprep.mubr.bf16.mxu1 %v2223_v13  ;;  %v2224_v47 = vpack.c.bf16 %v2216_v44, %v2215_v52  ;;  %v3488_v44 = vunpack.c.l.bf16 %v3529_v51  ;;  %v3528_v52 = vld [vmem:[#allocation9 + $0xd0] sm:$0xff]  }
 0x90e   : > { %v2814_v11 = vpop.permute.xlu0 %2813 }
 0x90f   : > { %v2483_v34 = vpop.permute.xlu1 %2482  ;;  %3950 = vmatprep.subr.bf16.mxu0 %v2814_v11 }
 0x910   : > { %3915 = vmatmul.mubr.bf16.gmra.mrb[60].mxu1 %v2224_v47  ;;  %3951 = vmatpush3.bf16.msra.mxu0 %v2814_v11 }
 0x911   : > { %3934 = vmatprep.mubr.msk.bf16.mxu1 %vm832_vm0, %v2469_v33 }
 0x912   : > { %v2818_v6 = vpop.permute.xlu0 %2817 }
 0x913   : > { %v2816_v50 = vpop.permute.xlu1 %2815 }
 0x914   : > { %3952 = vmatprep.subr.bf16.mxu0 %v2816_v50 }
 0x915   : > { %3953 = vmatpush3.bf16.msra.mxu0 %v2816_v50 }
 0x916   : > { %3954 = vmatprep.subr.bf16.mxu0 %v2818_v6 }
 0x918   : > { %3935 = vmatmul.mubr.msk.bf16.vlgmr.msra.gmra.mrb[64].mxu1 %vm832_vm0, %v2471_v3  ;;  %v3480_v3 = vunpack.c.l.bf16 %v3527_v10  ;;  %v3484_v10 = vunpack.c.l.bf16 %v3528_v52 }
 0x919   : > { %3938 = vmatprep.mubr.msk.bf16.mxu1 %vm832_vm0, %v2473_v58  ;;  %3955 = vmatpush3.bf16.msra.mxu0 %v2818_v6 }
 0x920   : > { %3939 = vmatmul.mubr.msk.bf16.gmra.mrb[68].mxu1 %vm832_vm0, %v2475_v1 }
 0x921   : > { %3942 = vmatprep.mubr.msk.bf16.mxu1 %vm832_vm0, %v2477_v22 }
 0x928   : > { %3943 = vmatmul.mubr.msk.bf16.gmra.mrb[72].mxu1 %vm832_vm0, %v2479_v31 }
 0x929   : > { %3946 = vmatprep.mubr.msk.bf16.mxu1 %vm832_vm0, %v2481_v41 }
 0x930   : > { %3947 = vmatmul.mubr.msk.bf16.gmra.mrb[76].mxu1 %vm832_vm0, %v2483_v34  ;;  %v3485_v34 = vunpack.c.h.bf16 %v3528_v52 }
 0x995   : > { %v5774_v54 = vpop.f32.mrb[48].mxu1 }
 0x996   : > { %v5776_v27 = vpop.f32.mrb[49].mxu1 }
 0x997   : > { %v5778_v63 = vpop.f32.mrb[50].mxu1 }
 0x998   : > { %v2355_v8 = vpack.c.bf16 %v5778_v63, %v5774_v54  ;;  %v5782_v14 = vpop.f32.mrb[51].mxu1 }
 0x999   : > { %v2354_v56 = vpack.c.bf16 %v5782_v14, %v5776_v27 }
 0x9cd   : > { %v5786_v0 = vpop.f32.mrb[52].mxu1 }
 0x9ce   : > { %v5788_v12 = vpop.f32.mrb[53].mxu1 }
 0x9cf   : > { %v5790_v32 = vpop.f32.mrb[54].mxu1 }
 0x9d0   : > { %v5794_v17 = vpop.f32.mrb[55].mxu1 }
 0x9d1   : > { %v2356_v42 = vpack.c.bf16 %v5794_v17, %v5788_v12 }
 0x9db   : > { %v5798_v60 = vpop.f32.mrb[56].mxu1 }
 0x9dc   : > { %v5800_v23 = vpop.f32.mrb[57].mxu1 }
 0x9dd   : > { %v5802_v61 = vpop.f32.mrb[58].mxu1 }
 0x9de   : > { %v2359_v59 = vpack.c.bf16 %v5802_v61, %v5798_v60  ;;  %v5806_v33 = vpop.f32.mrb[59].mxu1 }
 0x9df   : > { %v2358_v57 = vpack.c.bf16 %v5806_v33, %v5800_v23  ;;  %v6182_v33 = vld [vmem:[#allocation21_spill] sm:$0xff] }
 0x9e3   : > { %v5810_v49 = vpop.f32.mrb[60].mxu1 }
 0x9e4   : > { %v5812_v9 = vpop.f32.mrb[61].mxu1 }
 0x9e5   : > { %v5814_v35 = vpop.f32.mrb[62].mxu1 }
 0x9e6   : > { %v5818_v25 = vpop.f32.mrb[63].mxu1 }
 0x9e7   : > { %v2360_v15 = vpack.c.bf16 %v5818_v25, %v5812_v9 }
 0x9eb   : > { %v3936_v4 = vpop.f32.mrb[64].mxu1 }
 0x9ec   : > { %v5822_v28 = vadd.f32 %v3936_v4, %v3480_v3  ;;  %v2590_v36 = vpop.f32.mrb[65].mxu1  ;;  %v3531_v3 = vld [vmem:[#allocation9 + $0xe8] sm:$0xff]  }
 0x9ed   : > { %v3937_v22 = vpop.f32.mrb[66].mxu1  ;;  %v5827_v1 = vadd.f32 %v3476_v46, %v2590_v36  ;;  %v3497_v4 = vunpack.c.h.bf16 %v3531_v3  ;;  %v3496_v36 = vunpack.c.l.bf16 %v3531_v3 }
 0x9ee   : > { %2657 = vmax.xlane.f32.xlu0 %v5822_v28  ;;  %v2593_v26 = vpop.f32.mrb[67].mxu1  ;;  %v5831_v41 = vadd.f32 %v3937_v22, %v3481_v19 }
 0x9ef   : > { %v5825_v21 = vadd.f32 %v3477_v40, %v2593_v26  ;;  %v3530_v26 = vld [vmem:[#allocation9 + $0xe0] sm:$0xff]  }
 0x9f0   : > { %v3492_v52 = vunpack.c.l.bf16 %v3530_v26 }
 0x9f1   : > { %2655 = vmax.xlane.f32.xlu1 %v5825_v21 }
 0x9f2   : > { %2653 = vmax.xlane.f32.xlu0 %v5827_v1 }
 0x9f3   : > { %v3940_v13 = vpop.f32.mrb[68].mxu1 }
 0x9f4   : > { %v2606_v31 = vpop.f32.mrb[69].mxu1  ;;  %v5836_v6 = vadd.f32 %v3940_v13, %v3488_v44 }
 0x9f5   : > { %v3941_v11 = vpop.f32.mrb[70].mxu1  ;;  %v5842_v46 = vadd.f32 %v3484_v10, %v2606_v31 }
 0x9f6   : > { %v5833_v47 = vadd.f32 %v3941_v11, %v3489_v2  ;;  %2659 = vmax.xlane.f32.xlu0 %v5831_v41  ;;  %v2609_v50 = vpop.f32.mrb[71].mxu1  ;;  %v3493_v2 = vunpack.c.h.bf16 %v3530_v26  ;;  %v3533_v11 = vld [vmem:[#allocation9 + $0xf8] sm:$0xff]  }
 0x9f7   : > { %v5839_v62 = vadd.f32 %v3485_v34, %v2609_v50  ;;  %v3504_v10 = vunpack.c.l.bf16 %v3533_v11 }
 0x9f8   : > { %2667 = vmax.xlane.f32.xlu1 %v5833_v47 }
 0x9fa   : > { %2665 = vmax.xlane.f32.xlu0 %v5836_v6 }
 0x9fb   : > { %v3944_v40 = vpop.f32.mrb[72].mxu1 }
 0x9fc   : > { %2663 = vmax.xlane.f32.xlu1 %v5839_v62  ;;  %v2622_v22 = vpop.f32.mrb[73].mxu1  ;;  %v5848_v44 = vadd.f32 %v3944_v40, %v3496_v36 }
 0x9fd   : > { %v3945_v19 = vpop.f32.mrb[74].mxu1  ;;  %v5854_v50 = vadd.f32 %v3492_v52, %v2622_v22  ;;  %v3505_v22 = vunpack.c.h.bf16 %v3533_v11 }
 0x9fe   : > { %v5845_v51 = vadd.f32 %v3945_v19, %v3497_v4  ;;  %2661 = vmax.xlane.f32.xlu0 %v5842_v46  ;;  %v2625_v13 = vpop.f32.mrb[75].mxu1  ;;  %v3532_v4 = vld [vmem:[#allocation9 + $0xf0] sm:$0xff]  }
 0x9ff   : > { %v5851_v31 = vadd.f32 %v3493_v2, %v2625_v13  ;;  %v3500_v26 = vunpack.c.l.bf16 %v3532_v4  ;;  %v3501_v52 = vunpack.c.h.bf16 %v3532_v4 }
 0xa00   : > { %2675 = vmax.xlane.f32.xlu1 %v5845_v51 }
 0xa02   : > { %2673 = vmax.xlane.f32.xlu0 %v5848_v44 }
 0xa03   : > { %v3948_v34 = vpop.f32.mrb[76].mxu1 }
 0xa04   : > { %2671 = vmax.xlane.f32.xlu1 %v5851_v31  ;;  %v2638_v3 = vpop.f32.mrb[77].mxu1  ;;  %v5858_v36 = vadd.f32 %v3948_v34, %v3504_v10 }
 0xa05   : > { %v3949_v19 = vpop.f32.mrb[78].mxu1  ;;  %v5861_v2 = vadd.f32 %v3500_v26, %v2638_v3 }
 0xa06   : > { %2669 = vmax.xlane.f32.xlu0 %v5854_v50  ;;  %v2641_v40 = vpop.f32.mrb[79].mxu1  ;;  %v5868_v13 = vadd.f32 %v3949_v19, %v3505_v22 }
 0xa07   : > { %v5871_v34 = vadd.f32 %v3501_v52, %v2641_v40 }
 0xa0a   : > { %2681 = vmax.xlane.f32.xlu0 %v5858_v36 }
 0xa0e   : > { %2677 = vmax.xlane.f32.xlu0 %v5861_v2 }
 0xa15   : > { %2821 = vrot.lane.b32.xlu1 %v5024_v20, %s4650_s7 }
 0xa24   : > { %2819 = vrot.lane.b32.xlu0 %v4995_v55, %s4650_s7 }
 0xa39   : > { %2683 = vmax.xlane.f32.xlu1 %v5868_v13 }
 0xa3d   : > { %2679 = vmax.xlane.f32.xlu1 %v5871_v34 }
 0xa4e   : > { %2823 = vrot.lane.b32.xlu1 %v5019_v18, %s4650_s7 }
 0xa7b   : > { %v2658_v10 = vpop.xlane.xlu0 %2657 }
 0xa7c   : > { %v2687_v3 = vsub.f32 %v5822_v28, %v2658_v10 }
 0xa7e   : > { %v2705_v20 = vmul.f32 1.442695, %v2687_v3  ;;  %v2656_v55 = vpop.xlane.xlu1 %2655 }
 0xa7f   : > { %v2654_v26 = vpop.xlane.xlu0 %2653  ;;  %v2686_v4 = vsub.f32 %v5825_v21, %v2656_v55 }
 0xa80   : > { %4383 = vpow2.f32 %v2705_v20  ;;  %v2685_v11 = vsub.f32 %v5827_v1, %v2654_v26 }
 0xa81   : > { %v2703_v53 = vmul.f32 1.442695, %v2686_v4 }
 0xa82   : > { %v2701_v19 = vmul.f32 1.442695, %v2685_v11 }
 0xa83   : > { %v2660_v22 = vpop.xlane.xlu0 %2659 }
 0xa84   : > { %4385 = vpow2.f32 %v2701_v19  ;;  %v2688_v40 = vsub.f32 %v5831_v41, %v2660_v22 }
 0xa85   : > { %v2668_v52 = vpop.xlane.xlu1 %2667 }
 0xa86   : > { %v2707_v58 = vmul.f32 1.442695, %v2688_v40  ;;  %v2692_v26 = vsub.f32 %v5833_v47, %v2668_v52 }
 0xa87   : > { %v2666_v18 = vpop.xlane.xlu0 %2665 }
 0xa88   : > { %4387 = vpow2.f32 %v2707_v58  ;;  %v2691_v28 = vsub.f32 %v5836_v6, %v2666_v18  ;;  %v2715_v4 = vmul.f32 1.442695, %v2692_v26 }
 0xa89   : > { %v2664_v10 = vpop.xlane.xlu1 %2663  ;;  %4389 = vpow2.f32 %v2703_v53 }
 0xa8a   : > { %v5881_v3 = vpop.eup %4383  ;;  %v2713_v20 = vmul.f32 1.442695, %v2691_v28  ;;  %v2690_v1 = vsub.f32 %v5839_v62, %v2664_v10 }
 0xa8b   : > { %2737 = vadd.xlane.f32.xlu1 %v5881_v3  ;;  %v2662_v21 = vpop.xlane.xlu0 %2661 }
 0xa8c   : > { %4391 = vpow2.f32 %v2713_v20  ;;  %v2711_v41 = vmul.f32 1.442695, %v2690_v1  ;;  %v2689_v55 = vsub.f32 %v5842_v46, %v2662_v21 }
 0xa8d   : > { %v2676_v6 = vpop.xlane.xlu1 %2675 }
 0xa8e   : > { %v5887_v11 = vpop.eup %4385  ;;  %v2709_v58 = vmul.f32 1.442695, %v2689_v55  ;;  %4393 = vpow2.f32 %v2711_v41  ;;  %v2696_v47 = vsub.f32 %v5845_v51, %v2676_v6 }
 0xa8f   : > { %2733 = vadd.xlane.f32.xlu1 %v5887_v11  ;;  %v2674_v19 = vpop.xlane.xlu0 %2673 }
 0xa90   : > { %4395 = vpow2.f32 %v2709_v58  ;;  %v2695_v53 = vsub.f32 %v5848_v44, %v2674_v19  ;;  %v2723_v20 = vmul.f32 1.442695, %v2696_v47 }
 0xa91   : > { %4397 = vpow2.f32 %v2715_v4  ;;  %v2672_v40 = vpop.xlane.xlu1 %2671 }
 0xa92   : > { %v5891_v62 = vpop.eup %4387  ;;  %v2721_v22 = vmul.f32 1.442695, %v2695_v53  ;;  %v2694_v44 = vsub.f32 %v5851_v31, %v2672_v40  ;;  %v6171_v40 = vpack.c.bf16 %v5564_v16, %v5558_v7  ;;  %v6175_v16 = vpack.c.bf16 %v5572_v5, %v5568_v37  ;;  %v6179_v37 = vld [vmem:[#allocation22_spill] sm:$0xff]  ;;  %v6180_v5 = vld [vmem:[#allocation20_spill] sm:$0xff] }
 0xa93   : > { %2739 = vadd.xlane.f32.xlu1 %v5891_v62  ;;  %v2670_v46 = vpop.xlane.xlu0 %2669  ;;  %v5896_v18 = vpop.eup %4389 }
 0xa94   : > { %v2693_v52 = vsub.f32 %v5854_v50, %v2670_v46  ;;  %4399 = vpow2.f32 %v2721_v22  ;;  %v2719_v41 = vmul.f32 1.442695, %v2694_v44 }
 0xa95   : > { %v2822_v4 = vpop.permute.xlu1 %2821 }
 0xa96   : > { %v5898_v28 = vpop.eup %4391  ;;  %v2717_v10 = vmul.f32 1.442695, %v2693_v52  ;;  %v6172_v52 = vpack.c.bf16 %v5536_v24, %v5532_v38 }
 0xa97   : > { %2735 = vadd.xlane.f32.xlu1 %v5896_v18  ;;  %2745 = vadd.xlane.f32.xlu0 %v5898_v28  ;;  %v2682_v51 = vpop.xlane.xlu0 %2681 }
 0xa98   : > { %4401 = vpow2.f32 %v2717_v10  ;;  %v2699_v1 = vsub.f32 %v5858_v36, %v2682_v51  ;;  %v5904_v21 = vpop.eup %4393 }
 0xa99   : > { %4403 = vpow2.f32 %v2723_v20  ;;  %v6173_v20 = vpack.c.bf16 %v5560_v48, %v5556_v29  ;;  %v6174_v29 = vpack.c.bf16 %v5576_v39, %v5570_v30  ;;  %v6176_v30 = vld [vmem:[#allocation18_spill] sm:$0xff]  ;;  %v6177_v39 = vld [vmem:[#allocation17_spill] sm:$0xff] }
 0xa9a   : > { %v5906_v50 = vpop.eup %4395  ;;  %v2729_v26 = vmul.f32 1.442695, %v2699_v1  ;;  %v6178_v61 = vpack.c.bf16 %v6176_v30, %v6177_v39 }
 0xa9b   : > { %2743 = vadd.xlane.f32.xlu1 %v5904_v21  ;;  %2741 = vadd.xlane.f32.xlu0 %v5906_v50  ;;  %v2678_v31 = vpop.xlane.xlu0 %2677  ;;  %v5911_v58 = vpop.eup %4397 }
 0xa9c   : > { %4405 = vpow2.f32 %v2729_v26  ;;  %v2697_v55 = vsub.f32 %v5861_v2, %v2678_v31 }
 0xa9d   : > { %4407 = vpow2.f32 %v2719_v41 }
 0xa9e   : > { %v2725_v6 = vmul.f32 1.442695, %v2697_v55  ;;  %v5914_v19 = vpop.eup %4399 }
 0xa9f   : > { %2747 = vadd.xlane.f32.xlu0 %v5911_v58  ;;  %v2820_v36 = vpop.permute.xlu0 %2819 }
 0xaa0   : > { %4409 = vpow2.f32 %v2725_v6  ;;  %3956 = vmatprep.subr.bf16.mxu0 %v2820_v36 }
 0xaa1   : > { %3957 = vmatpush3.bf16.msra.mxu0 %v2820_v36 }
 0xaa2   : > { %v5916_v53 = vpop.eup %4401  ;;  %3958 = vmatprep.subr.bf16.mxu0 %v2822_v4 }
 0xaa3   : > { %2753 = vadd.xlane.f32.xlu0 %v5914_v19  ;;  %2749 = vadd.xlane.f32.xlu1 %v5916_v53  ;;  %v5920_v2 = vpop.eup %4403 }
 0xaa5   : > { %3959 = vmatpush3.bf16.msra.mxu0 %v2822_v4 }
 0xaa6   : > { %v5922_v47 = vpop.eup %4405 }
 0xaa7   : > { %2755 = vadd.xlane.f32.xlu0 %v5920_v2  ;;  %2761 = vadd.xlane.f32.xlu1 %v5922_v47  ;;  %v5926_v22 = vpop.eup %4407 }
 0xaaa   : > { %v5928_v46 = vpop.eup %4409 }
 0xaab   : > { %2751 = vadd.xlane.f32.xlu0 %v5926_v22  ;;  %2757 = vadd.xlane.f32.xlu1 %v5928_v46 }
 0xabc   : > { %2827 = vrot.lane.b32.xlu1 %v5043_v43, %s4650_s7 }
 0xac0   : > { %1798 = vrot.lane.b32.xlu1 %v6171_v40, %s4650_s7 }
 0xac1   : > { %2825 = vrot.lane.b32.xlu0 %v5048_v45, %s4650_s7 }
 0xac4   : > { %1792 = vrot.lane.b32.xlu1 %v6172_v52, %s4650_s7 }
 0xac6   : > { %v2684_v10 = vpop.xlane.xlu1 %2683 }
 0xac7   : > { %v2700_v38 = vsub.f32 %v5868_v13, %v2684_v10 }
 0xac8   : > { %1800 = vrot.lane.b32.xlu1 %v6173_v20, %s4650_s7 }
 0xac9   : > { %v2731_v48 = vmul.f32 1.442695, %v2700_v38 }
 0xaca   : > { %v2680_v43 = vpop.xlane.xlu1 %2679 }
 0xacb   : > { %v2698_v7 = vsub.f32 %v5871_v34, %v2680_v43 }
 0xacc   : > { %2378 = vrot.lane.b32.xlu1 %v2358_v57, %s4649_s11  ;;  %v6183_v57 = vld [vmem:[#allocation19_spill] sm:$0xff] }
 0xacd   : > { %v2727_v24 = vmul.f32 1.442695, %v2698_v7  ;;  %v6184_v9 = vpack.c.bf16 %v6182_v33, %v6183_v57 }
 0xace   : > { %v2824_v45 = vpop.permute.xlu1 %2823 }
 0xacf   : > { %3960 = vmatprep.subr.bf16.mxu0 %v2824_v45  ;;  %4411 = vpow2.f32 %v2727_v24 }
 0xad0   : > { %2380 = vrot.lane.b32.xlu1 %v2359_v59, %s4649_s11  ;;  %3961 = vmatpush3.bf16.msra.mxu0 %v2824_v45  ;;  %4413 = vpow2.f32 %v2731_v48  ;;  %v6181_v59 = vpack.c.bf16 %v6179_v37, %v6180_v5 }
 0xad4   : > { %1802 = vrot.lane.b32.xlu1 %v6174_v29, %s4650_s7 }
 0xad8   : > { %1804 = vrot.lane.b32.xlu1 %v6175_v16, %s4650_s7 }
 0xad9   : > { %v5970_v60 = vpop.eup %4411 }
 0xada   : > { %v5973_v23 = vpop.eup %4413 }
 0xadc   : > { %2382 = vrot.lane.b32.xlu1 %v2360_v15, %s4649_s11 }
 0xae0   : > { %2759 = vadd.xlane.f32.xlu0 %v5970_v60 }
 0xae4   : > { %2763 = vadd.xlane.f32.xlu0 %v5973_v23 }
 0xafa   : > { %1790 = vrot.lane.b32.xlu0 %v6178_v61, %s4650_s7 }
 0xafe   : > { %2370 = vrot.lane.b32.xlu0 %v2354_v56, %s4649_s11 }
 0xb02   : > { %2372 = vrot.lane.b32.xlu0 %v2355_v8, %s4649_s11 }
 0xb06   : > { %1794 = vrot.lane.b32.xlu0 %v6181_v59, %s4650_s7 }
 0xb0a   : > { %1796 = vrot.lane.b32.xlu0 %v6184_v9, %s4650_s7 }
 0xb0e   : > { %2374 = vrot.lane.b32.xlu0 %v2356_v42, %s4649_s11 }
 0xb18   : > { %v2738_v27 = vpop.xlane.xlu1 %2737 }
 0xb1c   : > { %v2734_v14 = vpop.xlane.xlu1 %2733 }
 0xb1d   : > { %4415 = vrcp.f32 %v2734_v14 }
 0xb20   : > { %v2740_v56 = vpop.xlane.xlu1 %2739 }
 0xb24   : > { %v2736_v54 = vpop.xlane.xlu1 %2735  ;;  %v2746_v63 = vpop.xlane.xlu0 %2745 }
 0xb25   : > { %4417 = vrcp.f32 %v2736_v54 }
 0xb26   : > { %4419 = vrcp.f32 %v2740_v56 }
 0xb27   : > { %v4416_v13 = vpop.eup %4415 }
 0xb28   : > { %v2742_v8 = vpop.xlane.xlu0 %2741  ;;  %v2744_v25 = vpop.xlane.xlu1 %2743  ;;  %v2781_v1 = vmul.f32 %v4416_v13, %v5887_v11 }
 0xb29   : > { %4421 = vrcp.f32 %v2744_v25 }
 0xb2a   : > { %4423 = vrcp.f32 %v2742_v8 }
 0xb2b   : > { %4425 = vrcp.f32 %v2738_v27 }
 0xb2c   : > { %v2748_v15 = vpop.xlane.xlu0 %2747 }
 0xb2d   : > { %4427 = vrcp.f32 %v2748_v15 }
 0xb2f   : > { %v4418_v34 = vpop.eup %4417 }
 0xb30   : > { %v2750_v44 = vpop.xlane.xlu1 %2749  ;;  %v2754_v51 = vpop.xlane.xlu0 %2753  ;;  %v2782_v26 = vmul.f32 %v4418_v34, %v5896_v18 }
 0xb31   : > { %v4420_v55 = vpop.eup %4419 }
 0xb32   : > { %v2797_v12 = vpack.c.bf16 %v2782_v26, %v2781_v1  ;;  %v2784_v40 = vmul.f32 %v4420_v55, %v5891_v62 }
 0xb33   : > { %v4422_v6 = vpop.eup %4421 }
 0xb34   : > { %3966 = vmatprep.mubr.bf16.mxu0 %v2797_v12  ;;  %v6002_v17 = vpop.xlane.xlu1 %2761  ;;  %v2756_v42 = vpop.xlane.xlu0 %2755  ;;  %v2786_v20 = vmul.f32 %v4422_v6, %v5904_v21  ;;  %v4183_v12 = vld [vmem:[#allocation10] sm:$0xff]   ;;  %v4190_v6 = vld [vmem:[#allocation10 + $0x38] sm:$0xff]  }
 0xb35   : > { %v4424_v4 = vpop.eup %4423  ;;  %4014 = vmatprep.subr.bf16.mxu1 %v4183_v12 }
 0xb36   : > { %v4426_v18 = vpop.eup %4425  ;;  %v2785_v10 = vmul.f32 %v4424_v4, %v5906_v50  ;;  %4022 = vmatpush3.bf16.msra.mxu1 %v4183_v12 }
 0xb37   : > { %v2783_v43 = vmul.f32 %v4426_v18, %v5881_v3  ;;  %v4428_v45 = vpop.eup %4427 }
 0xb38   : > { %v2758_v41 = vpop.xlane.xlu1 %2757  ;;  %v2752_v31 = vpop.xlane.xlu0 %2751  ;;  %v2799_v24 = vpack.c.bf16 %v2786_v20, %v2785_v10  ;;  %v2788_v21 = vmul.f32 %v4428_v45, %v5911_v58 }
 0xb39   : > { %4429 = vrcp.f32 %v2752_v31  ;;  %v2798_v7 = vpack.c.bf16 %v2784_v40, %v2783_v43  ;;  %v4189_v31 = vld [vmem:[#allocation10 + $0x30] sm:$0xff]  }
 0xb3a   : > { %4431 = vrcp.f32 %v2746_v63 }
 0xb3b   : > { %4433 = vrcp.f32 %v2750_v44 }
 0xb3c   : > { %v2828_v36 = vpop.permute.xlu1 %2827  ;;  %v2826_v11 = vpop.permute.xlu0 %2825  ;;  %4435 = vrcp.f32 %v2756_v42  ;;  %v4187_v42 = vld [vmem:[#allocation10 + $0x20] sm:$0xff]  }
 0xb3d   : > { %3962 = vmatprep.subr.bf16.mxu0 %v2826_v11  ;;  %4437 = vrcp.f32 %v2754_v51 }
 0xb3e   : > { %3963 = vmatpush3.bf16.msra.mxu0 %v2826_v11  ;;  %4439 = vrcp.f32 %v2758_v41  ;;  %v4188_v41 = vld [vmem:[#allocation10 + $0x28] sm:$0xff]  }
 0xb3f   : > { %3964 = vmatprep.subr.bf16.mxu0 %v2828_v36 }
 0xb40   : > { %v1799_v52 = vpop.permute.xlu1 %1798 }
 0xb41   : > { %1819 = vst.msk [vmem:[#allocation3 + $0x20] sm:$0xff] %vm1814_vm1, %v1799_v52 }
 0xb42   : > { %3965 = vmatpush3.bf16.msra.mxu0 %v2828_v36 }
 0xb43   : > { %v4430_v29 = vpop.eup %4429  ;;  %3982 = vmatprep.subr.bf16.mxu0 %v4183_v12 }
 0xb44   : > { %v1793_v38 = vpop.permute.xlu1 %1792  ;;  %v4432_v62 = vpop.eup %4431  ;;  %v2790_v3 = vmul.f32 %v4430_v29, %v5926_v22 }
 0xb45   : > { %1816 = vst.msk [vmem:[#allocation3 + $0x8] sm:$0xff] %vm1814_vm1, %v1793_v38  ;;  %3967 = vmatmul.mubr.bf16.vlgmr.msra.gmra.mrb[80].mxu0 %v2798_v7  ;;  %v4434_v50 = vpop.eup %4433  ;;  %v2787_v16 = vmul.f32 %v4432_v62, %v5898_v28  ;;  %v6185_v38 = vpack.c.bf16 %v5790_v32, %v5786_v0 }
 0xb46   : > { %3970 = vmatprep.mubr.bf16.mxu0 %v2799_v24  ;;  %v2789_v30 = vmul.f32 %v4434_v50, %v5916_v53  ;;  %v4436_v61 = vpop.eup %4435  ;;  %3983 = vmatpush3.bf16.msra.mxu0 %v4183_v12 }
 0xb47   : > { %v2800_v39 = vpack.c.bf16 %v2788_v21, %v2787_v16  ;;  %v4438_v59 = vpop.eup %4437  ;;  %v2792_v58 = vmul.f32 %v4436_v61, %v5920_v2 }
 0xb48   : > { %v1801_v48 = vpop.permute.xlu1 %1800  ;;  %v2801_v5 = vpack.c.bf16 %v2790_v3, %v2789_v30  ;;  %v2791_v22 = vmul.f32 %v4438_v59, %v5914_v19  ;;  %v4440_v19 = vpop.eup %4439  ;;  %v6186_v3 = vpack.c.bf16 %v5814_v35, %v5810_v49 }
 0xb49   : > { %1820 = vst.msk [vmem:[#allocation3 + $0x28] sm:$0xff] %vm1814_vm1, %v1801_v48  ;;  %v2793_v63 = vmul.f32 %v4440_v19, %v5928_v46 }
 0xb4a   : > { %v2802_v28 = vpack.c.bf16 %v2792_v58, %v2791_v22 }
 0xb4c   : > { %v2379_v37 = vpop.permute.xlu1 %2378 }
 0xb4d   : > { %2399 = vst.msk [vmem:[#allocation3 + $0x20] sm:$0xff] %vm2394_vm2, %v2379_v37  ;;  %3971 = vmatmul.mubr.bf16.gmra.mrb[84].mxu0 %v2800_v39 }
 0xb4e   : > { %3974 = vmatprep.mubr.bf16.mxu0 %v2801_v5 }
 0xb50   : > { %v2381_v33 = vpop.permute.xlu1 %2380 }
 0xb51   : > { %2400 = vst.msk [vmem:[#allocation3 + $0x28] sm:$0xff] %vm2394_vm2, %v2381_v33 }
 0xb54   : > { %v1803_v57 = vpop.permute.xlu1 %1802 }
 0xb55   : > { %1821 = vst.msk [vmem:[#allocation3 + $0x30] sm:$0xff] %vm1814_vm1, %v1803_v57  ;;  %3975 = vmatmul.mubr.bf16.gmra.mrb[88].mxu0 %v2802_v28 }
 0xb58   : > { %v1805_v53 = vpop.permute.xlu1 %1804 }
 0xb59   : > { %1822 = vst.msk [vmem:[#allocation3 + $0x38] sm:$0xff] %vm1814_vm1, %v1805_v53 }
 0xb5c   : > { %v2383_v9 = vpop.permute.xlu1 %2382 }
 0xb5d   : > { %2401 = vst.msk [vmem:[#allocation3 + $0x30] sm:$0xff] %vm2394_vm2, %v2383_v9 }
 0xb6d   : > { %v2760_v27 = vpop.xlane.xlu0 %2759 }
 0xb6e   : > { %4441 = vrcp.f32 %v2760_v27 }
 0xb6f   : > { %4443 = vrcp.f32 %v6002_v17  ;;  %v4184_v17 = vld [vmem:[#allocation10 + $0x8] sm:$0xff]  }
 0xb70   : > { %3984 = vmatprep.subr.bf16.mxu0 %v4184_v17  ;;  %4015 = vmatprep.subr.bf16.mxu1 %v4184_v17 }
 0xb71   : > { %v2764_v2 = vpop.xlane.xlu0 %2763  ;;  %3985 = vmatpush3.bf16.msra.mxu0 %v4184_v17  ;;  %4023 = vmatpush3.bf16.msra.mxu1 %v4184_v17 }
 0xb72   : > { %4445 = vrcp.f32 %v2764_v2 }
 0xb75   : > { %v1791_v14 = vpop.permute.xlu0 %1790 }
 0xb76   : > { %1815 = vst.msk [vmem:[#allocation3] sm:$0xff] %vm1814_vm1, %v1791_v14 }
 0xb78   : > { %v4442_v56 = vpop.eup %4441 }
 0xb79   : > { %v2371_v54 = vpop.permute.xlu0 %2370  ;;  %v2794_v8 = vmul.f32 %v4442_v56, %v5970_v60  ;;  %v4444_v25 = vpop.eup %4443 }
 0xb7a   : > { %2395 = vst.msk [vmem:[#allocation3] sm:$0xff] %vm2394_vm2, %v2371_v54  ;;  %v2795_v44 = vmul.f32 %v4444_v25, %v5922_v47  ;;  %v4185_v47 = vld [vmem:[#allocation10 + $0x10] sm:$0xff]  }
 0xb7b   : > { %v2803_v15 = vpack.c.bf16 %v2794_v8, %v2793_v63  ;;  %3986 = vmatprep.subr.bf16.mxu0 %v4185_v47  ;;  %4016 = vmatprep.subr.bf16.mxu1 %v4185_v47  ;;  %v3362_v63 = vld [vmem:[%s6138_s5] ss:$0 sm:$0xff] }
 0xb7c   : > { %v4446_v13 = vpop.eup %4445  ;;  %3987 = vmatpush3.bf16.msra.mxu0 %v4185_v47  ;;  %4024 = vmatpush3.bf16.msra.mxu1 %v4185_v47 }
 0xb7d   : > { %3978 = vmatprep.mubr.bf16.mxu0 %v2803_v15  ;;  %v2373_v34 = vpop.permute.xlu0 %2372  ;;  %v2796_v51 = vmul.f32 %v4446_v13, %v5973_v23  ;;  %v4186_v23 = vld [vmem:[#allocation10 + $0x18] sm:$0xff]  }
 0xb7e   : > { %2396 = vst.msk [vmem:[#allocation3 + $0x8] sm:$0xff] %vm2394_vm2, %v2373_v34  ;;  %3988 = vmatprep.subr.bf16.mxu0 %v4186_v23  ;;  %4017 = vmatprep.subr.bf16.mxu1 %v4186_v23 }
 0xb7f   : > { %v2804_v1 = vpack.c.bf16 %v2796_v51, %v2795_v44 }
 0xb80   : > { %3989 = vmatpush3.bf16.msra.mxu0 %v4186_v23  ;;  %4025 = vmatpush3.bf16.msra.mxu1 %v4186_v23 }
 0xb81   : > { %3979 = vmatmul.mubr.bf16.gmra.mrb[92].mxu0 %v2804_v1  ;;  %v1795_v26 = vpop.permute.xlu0 %1794  ;;  %3990 = vmatprep.subr.bf16.mxu0 %v4187_v42 }
 0xb82   : > { %1817 = vst.msk [vmem:[#allocation3 + $0x10] sm:$0xff] %vm1814_vm1, %v1795_v26  ;;  %4018 = vmatprep.subr.bf16.mxu1 %v4187_v42 }
 0xb84   : > { %3991 = vmatpush3.bf16.msra.mxu0 %v4187_v42  ;;  %4026 = vmatpush3.bf16.msra.mxu1 %v4187_v42 }
 0xb85   : > { %v1797_v46 = vpop.permute.xlu0 %1796  ;;  %3992 = vmatprep.subr.bf16.mxu0 %v4188_v41  ;;  %4019 = vmatprep.subr.bf16.mxu1 %v4188_v41 }
 0xb86   : > { %1818 = vst.msk [vmem:[#allocation3 + $0x18] sm:$0xff] %vm1814_vm1, %v1797_v46 }
 0xb88   : > { %3993 = vmatpush3.bf16.msra.mxu0 %v4188_v41  ;;  %4027 = vmatpush3.bf16.msra.mxu1 %v4188_v41 }
 0xb89   : > { %v2375_v60 = vpop.permute.xlu0 %2374  ;;  %3994 = vmatprep.subr.bf16.mxu0 %v4189_v31  ;;  %4020 = vmatprep.subr.bf16.mxu1 %v4189_v31 }
 0xb8a   : > { %2397 = vst.msk [vmem:[#allocation3 + $0x10] sm:$0xff] %vm2394_vm2, %v2375_v60 }
 0xb8c   : > { %3995 = vmatpush3.bf16.msra.mxu0 %v4189_v31  ;;  %4028 = vmatpush3.bf16.msra.mxu1 %v4189_v31 }
 0xb8d   : > { %3996 = vmatprep.subr.bf16.mxu0 %v4190_v6  ;;  %4021 = vmatprep.subr.bf16.mxu1 %v4190_v6 }
 0xb90   : > { %3997 = vmatpush3.bf16.msra.mxu0 %v4190_v6  ;;  %4029 = vmatpush3.bf16.msra.mxu1 %v4190_v6 }
 0xc18   : > { %v3968_v55 = vpop.f32.mrb[80].mxu0 }
 0xc19   : > { %v2871_v36 = vpop.f32.mrb[81].mxu0 }
 0xc1a   : > { %v3969_v11 = vpop.f32.mrb[82].mxu0 }
 0xc1b   : > { %v2935_v4 = vpack.c.bf16 %v3969_v11, %v3968_v55  ;;  %v2874_v18 = vpop.f32.mrb[83].mxu0 }
 0xc1c   : > { %v2934_v40 = vpack.c.bf16 %v2874_v18, %v2871_v36 }
 0xc1d   : > { %2952 = vrot.lane.b32.xlu0 %v2935_v4, %s4648_s19 }
 0xc20   : > { %v3972_v52 = vpop.f32.mrb[84].mxu0 }
 0xc21   : > { %2950 = vrot.lane.b32.xlu0 %v2934_v40, %s4648_s19  ;;  %v2887_v10 = vpop.f32.mrb[85].mxu0 }
 0xc22   : > { %v3973_v20 = vpop.f32.mrb[86].mxu0 }
 0xc23   : > { %v2937_v43 = vpack.c.bf16 %v3973_v20, %v3972_v52  ;;  %v2890_v7 = vpop.f32.mrb[87].mxu0 }
 0xc24   : > { %v2936_v45 = vpack.c.bf16 %v2890_v7, %v2887_v10 }
 0xc25   : > { %2376 = vrot.lane.b32.xlu0 %v6185_v38, %s4649_s11 }
 0xc28   : > { %v3976_v24 = vpop.f32.mrb[88].mxu0 }
 0xc29   : > { %2954 = vrot.lane.b32.xlu0 %v2936_v45, %s4648_s19  ;;  %v2903_v29 = vpop.f32.mrb[89].mxu0 }
 0xc2a   : > { %v3977_v62 = vpop.f32.mrb[90].mxu0 }
 0xc2b   : > { %v2939_v50 = vpack.c.bf16 %v3977_v62, %v3976_v24  ;;  %v2906_v21 = vpop.f32.mrb[91].mxu0 }
 0xc2c   : > { %v2938_v48 = vpack.c.bf16 %v2906_v21, %v2903_v29 }
 0xc2d   : > { %2956 = vrot.lane.b32.xlu0 %v2937_v43, %s4648_s19  ;;  %2960 = vrot.lane.b32.xlu1 %v2939_v50, %s4648_s19 }
 0xc31   : > { %2958 = vrot.lane.b32.xlu1 %v2938_v48, %s4648_s19 }
 0xc35   : > { %2384 = vrot.lane.b32.xlu1 %v6186_v3, %s4649_s11 }
 0xc54   : > { %v3980_v0 = vpop.f32.mrb[92].mxu0 }
 0xc55   : > { %v2919_v32 = vpop.f32.mrb[93].mxu0 }
 0xc56   : > { %v3981_v16 = vpop.f32.mrb[94].mxu0 }
 0xc57   : > { %v2941_v30 = vpack.c.bf16 %v3981_v16, %v3980_v0  ;;  %v2922_v39 = vpop.f32.mrb[95].mxu0 }
 0xc58   : > { %v2940_v61 = vpack.c.bf16 %v2922_v39, %v2919_v32 }
 0xc5a   : > { %2962 = vrot.lane.b32.xlu1 %v2940_v61, %s4648_s19 }
 0xc5e   : > { %2964 = vrot.lane.b32.xlu1 %v2941_v30, %s4648_s19 }
 0xc8f   : > { %v2953_v37 = vpop.permute.xlu0 %2952 }
 0xc90   : > { %2976 = vst.msk [vmem:[#allocation3 + $0x8] sm:$0xff] %vm2974_vm3, %v2953_v37 }
 0xc93   : > { %v2951_v5 = vpop.permute.xlu0 %2950 }
 0xc94   : > { %2975 = vst.msk [vmem:[#allocation3] sm:$0xff] %vm2974_vm3, %v2951_v5 }
 0xc97   : > { %v2377_v59 = vpop.permute.xlu0 %2376  ;;  %v2984_v58 = vld [vmem:[#allocation3 + $0x8] sm:$0xff] }
 0xc98   : > { %2398 = vst.msk [vmem:[#allocation3 + $0x18] sm:$0xff] %vm2394_vm2, %v2377_v59 }
 0xc9b   : > { %v2955_v49 = vpop.permute.xlu0 %2954  ;;  %v2983_v35 = vld [vmem:[#allocation3] sm:$0xff] }
 0xc9c   : > { %2977 = vst.msk [vmem:[#allocation3 + $0x10] sm:$0xff] %vm2974_vm3, %v2955_v49  ;;  %3998 = vmatprep.mubr.bf16.mxu0 %v2983_v35 }
 0xc9d   : > { %3999 = vmatmul.mubr.bf16.vlgmr.msra.gmra.mrb[96].mxu0 %v2984_v58 }
 0xc9f   : > { %v2961_v33 = vpop.permute.xlu1 %2960  ;;  %v2957_v22 = vpop.permute.xlu0 %2956 }
 0xca0   : > { %2980 = vst.msk [vmem:[#allocation3 + $0x28] sm:$0xff] %vm2974_vm3, %v2961_v33  ;;  %2978 = vst.msk [vmem:[#allocation3 + $0x18] sm:$0xff] %vm2974_vm3, %v2957_v22 }
 0xca3   : > { %v2959_v28 = vpop.permute.xlu1 %2958  ;;  %v2985_v57 = vld [vmem:[#allocation3 + $0x10] sm:$0xff] }
 0xca4   : > { %2979 = vst.msk [vmem:[#allocation3 + $0x20] sm:$0xff] %vm2974_vm3, %v2959_v28  ;;  %4002 = vmatprep.mubr.bf16.mxu0 %v2985_v57 }
 0xca7   : > { %v2385_v53 = vpop.permute.xlu1 %2384  ;;  %v2986_v9 = vld [vmem:[#allocation3 + $0x18] sm:$0xff]  ;;  %v2988_v2 = vld [vmem:[#allocation3 + $0x28] sm:$0xff] }
 0xca8   : > { %2402 = vst.msk [vmem:[#allocation3 + $0x38] sm:$0xff] %vm2394_vm2, %v2385_v53  ;;  %4003 = vmatmul.mubr.bf16.gmra.mrb[100].mxu0 %v2986_v9 }
 0xcab   : > { %v2987_v27 = vld [vmem:[#allocation3 + $0x20] sm:$0xff] }
 0xcac   : > { %4006 = vmatprep.mubr.bf16.mxu1 %v2987_v27 }
 0xcad   : > { %4007 = vmatmul.mubr.bf16.vlgmr.msra.gmra.mrb[80].mxu1 %v2988_v2 }
 0xccc   : > { %v2963_v14 = vpop.permute.xlu1 %2962 }
 0xccd   : > { %2981 = vst.msk [vmem:[#allocation3 + $0x30] sm:$0xff] %vm2974_vm3, %v2963_v14 }
 0xcd0   : > { %v2965_v19 = vpop.permute.xlu1 %2964 }
 0xcd1   : > { %2982 = vst.msk [vmem:[#allocation3 + $0x38] sm:$0xff] %vm2974_vm3, %v2965_v19 }
 0xcd4   : > { %v2989_v56 = vld [vmem:[#allocation3 + $0x30] sm:$0xff] }
 0xcd5   : > { %4010 = vmatprep.mubr.bf16.mxu1 %v2989_v56 }
 0xcd8   : > { %v2990_v54 = vld [vmem:[#allocation3 + $0x38] sm:$0xff] }
 0xcd9   : > { %4011 = vmatmul.mubr.bf16.gmra.mrb[84].mxu1 %v2990_v54 }
 0xd70   : > { %v4000_v8 = vpop.f32.mrb[96].mxu0 }
 0xd71   : > { %v3105_v25 = vadd.f32 %v4000_v8, %v3362_v63  ;;  %v3096_v15 = vpop.f32.mrb[97].mxu0 }
 0xd72   : > { %v3097_v13 = vadd.f32 %v3362_v63, %v3096_v15  ;;  %v4001_v34 = vpop.f32.mrb[98].mxu0 }
 0xd73   : > { %3161 = vst [vmem:[%s6064_s17 + $0x10] sm:$0xff] %v3105_v25  ;;  %v3108_v44 = vadd.f32 %v4001_v34, %v3362_v63  ;;  %v3099_v51 = vpop.f32.mrb[99].mxu0 }
 0xd74   : > { %3159 = vst [vmem:[%s6064_s17] sm:$0xff] %v3097_v13  ;;  %v3100_v1 = vadd.f32 %v3362_v63, %v3099_v51 }
 0xd75   : > { %3162 = vst [vmem:[%s6064_s17 + $0x18] sm:$0xff] %v3108_v44 }
 0xd76   : > { %3160 = vst [vmem:[%s6064_s17 + $0x8] sm:$0xff] %v3100_v1 }
 0xd7b   : > { %v4004_v26 = vpop.f32.mrb[100].mxu0 }
 0xd7c   : > { %v3121_v46 = vadd.f32 %v4004_v26, %v3362_v63  ;;  %v3112_v60 = vpop.f32.mrb[101].mxu0 }
 0xd7d   : > { %v3113_v12 = vadd.f32 %v3362_v63, %v3112_v60  ;;  %v4005_v17 = vpop.f32.mrb[102].mxu0 }
 0xd7e   : > { %3165 = vst [vmem:[%s6064_s17 + $0x30] sm:$0xff] %v3121_v46  ;;  %v3124_v47 = vadd.f32 %v4005_v17, %v3362_v63  ;;  %v3115_v23 = vpop.f32.mrb[103].mxu0 }
 0xd7f   : > { %3163 = vst [vmem:[%s6064_s17 + $0x20] sm:$0xff] %v3113_v12  ;;  %v3116_v42 = vadd.f32 %v3362_v63, %v3115_v23 }
 0xd80   : > { %3166 = vst [vmem:[%s6064_s17 + $0x38] sm:$0xff] %v3124_v47  ;;  %v4008_v41 = vpop.f32.mrb[80].mxu1 }
 0xd81   : > { %3164 = vst [vmem:[%s6064_s17 + $0x28] sm:$0xff] %v3116_v42  ;;  %v3137_v31 = vadd.f32 %v4008_v41, %v3362_v63  ;;  %v3128_v55 = vpop.f32.mrb[81].mxu1 }
 0xd82   : > { %v3129_v6 = vadd.f32 %v3362_v63, %v3128_v55  ;;  %v4009_v36 = vpop.f32.mrb[82].mxu1 }
 0xd83   : > { %3169 = vst [vmem:[%s6064_s17 + $0x50] sm:$0xff] %v3137_v31  ;;  %v3140_v11 = vadd.f32 %v4009_v36, %v3362_v63  ;;  %v3131_v4 = vpop.f32.mrb[83].mxu1 }
 0xd84   : > { %3167 = vst [vmem:[%s6064_s17 + $0x40] sm:$0xff] %v3129_v6  ;;  %v3132_v18 = vadd.f32 %v3362_v63, %v3131_v4 }
 0xd85   : > { %3170 = vst [vmem:[%s6064_s17 + $0x58] sm:$0xff] %v3140_v11 }
 0xd86   : > { %3168 = vst [vmem:[%s6064_s17 + $0x48] sm:$0xff] %v3132_v18 }
 0xdac   : > { %v4012_v40 = vpop.f32.mrb[84].mxu1 }
 0xdad   : > { %v3153_v52 = vadd.f32 %v4012_v40, %v3362_v63  ;;  %v3144_v10 = vpop.f32.mrb[85].mxu1 }
 0xdae   : > { %v3145_v20 = vadd.f32 %v3362_v63, %v3144_v10  ;;  %v4013_v43 = vpop.f32.mrb[86].mxu1 }
 0xdaf   : > { %3173 = vst [vmem:[%s6064_s17 + $0x70] sm:$0xff] %v3153_v52  ;;  %v3156_v7 = vadd.f32 %v4013_v43, %v3362_v63  ;;  %v3147_v45 = vpop.f32.mrb[87].mxu1 }
 0xdb0   : > { %3171 = vst [vmem:[%s6064_s17 + $0x60] sm:$0xff] %v3145_v20  ;;  %v3148_v38 = vadd.f32 %v3362_v63, %v3147_v45 }
 0xdb1   : > { %3174 = vst [vmem:[%s6064_s17 + $0x78] sm:$0xff] %v3156_v7 }
 0xdb2   : > { %3172 = vst [vmem:[%s6064_s17 + $0x68] sm:$0xff] %v3148_v38 }
 0xdb3   : > { %4574 = shalt.err (!%p4571_p4)
}
 0xdb4   : > { %s4575_s19 = scalar_lea.hbm %s6084_s16, 2048  ;;  %s4579_s10 = scalar_lea.hbm %s6139_s6, 4096 }
 0xdb5   : > { %p4576_p9 = scmp.ne.s32.totalorder %s6084_s16, %s4575_s19  ;;  %p4580_p8 = scmp.lt.u32.totalorder %s6084_s16, %s6139_s6 }
 0xdb6   : > { %p4581_p13 = scmp.lt.u32.totalorder %s4579_s10, %s4575_s19  ;;  %p4583_p10 = scmp.lt.u32.totalorder %s4575_s19, %s6084_s16 }
 0xdb7   : > { %p4577_p0 = pnand %p4576_p9, %p4831_p5 }
 0xdb8   : > { %p4582_p6 = por %p4581_p13, %p4580_p8 }
 0xdb9   : > { %p4578_p11 = pneg %p4577_p0 }
 0xdba   : > { %p4584_p3 = por %p4583_p10, %p4582_p6 }
 0xdbc   : > { %p4585_p7 = pnand %p4584_p3, %p4578_p11 }
 0xdbe   : > { %4588 = shalt.err (!%p4585_p7)
}
 0xdbf   : > { %s4652_s18 = smov 128   ;;  %s4653_s26 = smov 8  }
 0xdc0   : > { %4076 = dma.vmem_to_hbm [thread:$0]  (%p4831_p5), %s6086_s20, 2048, %s6084_s16, %s3176_s25, %s4652_s18, %s4652_s18, %s4653_s26  }
 0xdc1 PF: > { %s3204_s30 = sand.u32 1, %s4623_s21   ;;  %p6187_p12 = scmp.ne.s32.totalorder %s6151_s28, 0 }
 0xdc2   : > { %p6188_p2 = scmp.ge.s32.totalorder %s4635_s24, 2  ;;  %s3205_s14 = scalar_lea.sflag [#allocation6], %s3204_s30 }
 0xdc4   : > { %p4093_p1 = pnand %p6188_p2, %p6187_p12 }
 0xdc6   : > { %4618 = dma.done.wait (!%p4093_p1), %s3205_s14, 2048  }
 0xdc7   : > { %4620 = vsyncadd (!%p4093_p1), %s3205_s14, 4294965248  ;;  %p21_p4 = scmp.ge.s32.totalorder %s4799_s12, 4   ;;  %s6189_s21 = smov %s4627_s22 }
 0xdc8   : > { %s6190_s22 = smov %s4631_s23  ;;  %s6191_s23 = smov %s4827_s8 }
 0xdc9   : > { %s6192_s24 = smov %s4799_s12  ;;  %23 = sbr.rel (!%p21_p4) target bundleno = 9 (0x9), region = 104 }
 0xdd0   :  { %3210 = vsyncpa [#allocation5], 1 }
 0xdd1   :  { %3212 = vsyncpa [#allocation5 + $0x1], 1 }
 0xdd2   :  { %3213 = vsyncpa [#allocation8], 1 }
 0xdd3   :  { %3214 = vsyncpa [#allocation11], 1 }
 0xdd4   :  { %3215 = vsyncpa [#allocation6], 1 }
 0xdd5   :  { %3217 = vsyncpa [#allocation6 + $0x1], 1 }

</bundles_post_ra>
